<compile_context>
chip_gen: v6e
topology: v6e:2x2x1
jax: 0.10.0
libtpu: 0.0.40
codegen_flags: <defaults>
</compile_context>

<pallas_src>
import math
import functools

import jax
import jax.numpy as jnp
from jax.experimental import pallas as pl
from jax.experimental.pallas import tpu as pltpu

HIDDEN = 128
NHEAD = 8
HEAD_DIM = HIDDEN // NHEAD          # 16
FFN_DIM = 2048
NUM_LAYERS = 5
LN_EPS = 1e-5
MAX_LEN = 5000
MATMUL_DTYPE = jnp.bfloat16         # MXU-native input dtype; accumulation f32.


def _cparams(*sem):
    return pltpu.CompilerParams(
        dimension_semantics=sem,
        vmem_limit_bytes=32 * 1024 * 1024,
    )


def _layernorm(x, gamma, beta):
    """Row-wise layernorm over the last dim (f32)."""
    mean = jnp.mean(x, axis=-1, keepdims=True)
    xc = x - mean
    var = jnp.mean(xc * xc, axis=-1, keepdims=True)
    return xc * jax.lax.rsqrt(var + LN_EPS) * gamma + beta


# -------------------- fused input projection + positional encoding ----------

def _input_pe_kernel(x_ref, w_ref, b_ref, pe_ref, o_ref):
    x = x_ref[0].astype(MATMUL_DTYPE)                      # (S, in_dim)
    y = jnp.dot(x, w_ref[...], preferred_element_type=jnp.float32)
    y = y + b_ref[...] + pe_ref[0]                         # bias + PE (broadcast over S)
    o_ref[0] = y


def input_projection(x, w_bf16, b, pe_b):
    B, S, in_dim = x.shape
    D = w_bf16.shape[1]
    return pl.pallas_call(
        _input_pe_kernel,
        out_shape=jax.ShapeDtypeStruct((B, S, D), jnp.float32),
        grid=(B,),
        in_specs=[
            pl.BlockSpec((1, S, in_dim), lambda b: (b, 0, 0)),
            pl.BlockSpec((in_dim, D), lambda b: (0, 0)),     # weight resident
            pl.BlockSpec((1, D), lambda b: (0, 0)),
            pl.BlockSpec((1, 1, D), lambda b: (b, 0, 0)),    # pe[:B] quirk
        ],
        out_specs=pl.BlockSpec((1, S, D), lambda b: (b, 0, 0)),
        compiler_params=_cparams("parallel"),
    )(x, w_bf16, b.reshape(1, D), pe_b)


# -------------------- fused attention block (LN1 -> MHA -> out_proj -> +x) --

def _attn_block_kernel(x_ref, wqkv_ref, bqkv_ref, wo_ref, bo_ref,
                       g_ref, bln_ref, o_ref, *, nhead, head_dim, scale):
    x = x_ref[0]                                           # (S, D) f32
    S, D = x.shape

    xn = _layernorm(x, g_ref[...], bln_ref[...])
    qkv = jnp.dot(xn.astype(MATMUL_DTYPE), wqkv_ref[...],
                  preferred_element_type=jnp.float32) + bqkv_ref[...]  # (S, 3D)

    # Causal mask generated in-kernel (no HBM mask traffic).
    qi = jax.lax.broadcasted_iota(jnp.int32, (S, S), 0)
    ki = jax.lax.broadcasted_iota(jnp.int32, (S, S), 1)
    causal = ki <= qi

    # One lane-dense transpose of the whole K block; per-head sublane slices.
    kt = qkv[:, D:2 * D].T                                 # (D, S) f32
    wo = wo_ref[...]                                       # (D, D) bf16

    acc = jnp.zeros((S, D), jnp.float32)
    for h in range(nhead):                                 # static unroll
        lo = h * head_dim
        qh = qkv[:, lo:lo + head_dim]                      # (S, Hd)
        khT = kt[lo:lo + head_dim, :]                      # (Hd, S)
        vh = qkv[:, 2 * D + lo:2 * D + lo + head_dim]      # (S, Hd)

        s = jnp.dot(qh.astype(MATMUL_DTYPE), khT.astype(MATMUL_DTYPE),
                    preferred_element_type=jnp.float32) * scale        # (S, S)
        s = jnp.where(causal, s, -jnp.inf)
        m = jnp.max(s, axis=-1, keepdims=True)
        p = jnp.exp(s - m)
        denom = jnp.sum(p, axis=-1, keepdims=True)
        p = p * pl.reciprocal(denom, approx=True)          # EUP, frees VPU slots

        oh = jnp.dot(p.astype(MATMUL_DTYPE), vh.astype(MATMUL_DTYPE),
                     preferred_element_type=jnp.float32)   # (S, Hd)
        # Fold out_proj per head -> lane-dense (S, D) accumulation, no concat
        # of narrow head slices needed.
        acc = acc + jnp.dot(oh.astype(MATMUL_DTYPE), wo[lo:lo + head_dim, :],
                            preferred_element_type=jnp.float32)

    o_ref[0] = x + acc + bo_ref[...]


def attention_block(x, layer_bf16, layer):
    B, S, D = x.shape
    kern = functools.partial(_attn_block_kernel, nhead=NHEAD,
                             head_dim=HEAD_DIM, scale=1.0 / math.sqrt(HEAD_DIM))
    return pl.pallas_call(
        kern,
        out_shape=jax.ShapeDtypeStruct((B, S, D), jnp.float32),
        grid=(B,),
        in_specs=[
            pl.BlockSpec((1, S, D), lambda b: (b, 0, 0)),
            pl.BlockSpec((D, 3 * D), lambda b: (0, 0)),      # weights resident
            pl.BlockSpec((1, 3 * D), lambda b: (0, 0)),
            pl.BlockSpec((D, D), lambda b: (0, 0)),
            pl.BlockSpec((1, D), lambda b: (0, 0)),
            pl.BlockSpec((1, D), lambda b: (0, 0)),
            pl.BlockSpec((1, D), lambda b: (0, 0)),
        ],
        out_specs=pl.BlockSpec((1, S, D), lambda b: (b, 0, 0)),
        compiler_params=_cparams("parallel"),
    )(x,
      layer_bf16["in_proj_w_t"], layer["in_proj_b"].reshape(1, 3 * D),
      layer_bf16["out_proj_w_t"], layer["out_proj_b"].reshape(1, D),
      layer["ln1_g"].reshape(1, D), layer["ln1_b"].reshape(1, D))


# -------------------- fused FFN block (LN2 -> FFN1+ReLU -> FFN2 -> +x) ------

def _ffn_block_kernel(x_ref, w1_ref, b1_ref, w2_ref, b2_ref,
                      g_ref, bln_ref, o_ref):
    x = x_ref[...]                                          # (tile_m, D) f32
    xn = _layernorm(x, g_ref[...], bln_ref[...])
    h = jnp.dot(xn.astype(MATMUL_DTYPE), w1_ref[...],
                preferred_element_type=jnp.float32) + b1_ref[...]
    h = jnp.maximum(h, 0.0)
    f = jnp.dot(h.astype(MATMUL_DTYPE), w2_ref[...],
                preferred_element_type=jnp.float32) + b2_ref[...]
    o_ref[...] = x + f


def ffn_block(x2d, layer_bf16, layer, tile_m):
    M, D = x2d.shape
    F = layer_bf16["lin1_w_t"].shape[1]
    return pl.pallas_call(
        _ffn_block_kernel,
        out_shape=jax.ShapeDtypeStruct((M, D), jnp.float32),
        grid=(pl.cdiv(M, tile_m),),
        in_specs=[
            pl.BlockSpec((tile_m, D), lambda i: (i, 0)),     # activations tiled
            pl.BlockSpec((D, F), lambda i: (0, 0)),          # weights resident
            pl.BlockSpec((1, F), lambda i: (0, 0)),
            pl.BlockSpec((F, D), lambda i: (0, 0)),
            pl.BlockSpec((1, D), lambda i: (0, 0)),
            pl.BlockSpec((1, D), lambda i: (0, 0)),
            pl.BlockSpec((1, D), lambda i: (0, 0)),
        ],
        out_specs=pl.BlockSpec((tile_m, D), lambda i: (i, 0)),
        compiler_params=_cparams("parallel"),
    )(x2d,
      layer_bf16["lin1_w_t"], layer["lin1_b"].reshape(1, F),
      layer_bf16["lin2_w_t"], layer["lin2_b"].reshape(1, D),
      layer["ln2_g"].reshape(1, D), layer["ln2_b"].reshape(1, D))


# -------------------- fused decoder linear + ReLU ---------------------------

def _decoder_kernel(x_ref, w_ref, b_ref, o_ref):
    y = jnp.dot(x_ref[...].astype(MATMUL_DTYPE), w_ref[...],
                preferred_element_type=jnp.float32) + b_ref[...]
    o_ref[...] = jnp.maximum(y, 0.0)


def decoder_block(x2d, w_bf16, b, tile_m):
    M, D = x2d.shape
    N = w_bf16.shape[1]
    # Final op has out_dim < 128 (masked partial stores) -- accepted only here.
    return pl.pallas_call(
        _decoder_kernel,
        out_shape=jax.ShapeDtypeStruct((M, N), jnp.float32),
        grid=(pl.cdiv(M, tile_m),),
        in_specs=[
            pl.BlockSpec((tile_m, D), lambda i: (i, 0)),
            pl.BlockSpec((D, N), lambda i: (0, 0)),
            pl.BlockSpec((1, N), lambda i: (0, 0)),
        ],
        out_specs=pl.BlockSpec((tile_m, N), lambda i: (i, 0)),
        compiler_params=_cparams("parallel"),
    )(x2d, w_bf16, b.reshape(1, N))


# -------------------- model glue (plain JAX) --------------------------------

def make_positional_encoding(d_model=HIDDEN, max_len=MAX_LEN):
    pe = jnp.zeros((max_len, d_model), dtype=jnp.float32)
    position = jnp.arange(0, max_len, dtype=jnp.float32)[:, None]
    div_term = jnp.exp(jnp.arange(0, d_model, 2, dtype=jnp.float32)
                       * (-math.log(10000.0) / d_model))
    pe = pe.at[:, 0::2].set(jnp.sin(position * div_term))
    pe = pe.at[:, 1::2].set(jnp.cos(position * div_term))
    return pe[:, None, :]                                   # (max_len, 1, d_model)


def init_params(key, in_dim, out_dim):
    initrange = 0.1
    keys = jax.random.split(key, 4 + NUM_LAYERS)
    params = {
        # nn.Linear weights are (out, in) in torch; store transposed (in, out).
        "input_w": jax.random.uniform(keys[0], (in_dim, HIDDEN),
                                      minval=-initrange, maxval=initrange),
        "input_b": jnp.zeros((HIDDEN,), jnp.float32),
        "dec_w": jax.random.uniform(keys[1], (HIDDEN, out_dim),
                                    minval=-initrange, maxval=initrange),
        "dec_b": jnp.zeros((out_dim,), jnp.float32),
        "pe": make_positional_encoding(),
        "layers": [],
    }
    for l in range(NUM_LAYERS):
        lk = jax.random.split(keys[4 + l], 6)
        s_attn = 1.0 / math.sqrt(HIDDEN)
        s_ffn1 = 1.0 / math.sqrt(HIDDEN)
        s_ffn2 = 1.0 / math.sqrt(FFN_DIM)
        layer = {
            # in_proj_weight.T: (D, 3D); columns [0:D]=q, [D:2D]=k, [2D:3D]=v
            "in_proj_w_t": jax.random.uniform(lk[0], (HIDDEN, 3 * HIDDEN),
                                              minval=-s_attn, maxval=s_attn),
            "in_proj_b": jnp.zeros((3 * HIDDEN,), jnp.float32),
            "out_proj_w_t": jax.random.uniform(lk[1], (HIDDEN, HIDDEN),
                                               minval=-s_attn, maxval=s_attn),
            "out_proj_b": jnp.zeros((HIDDEN,), jnp.float32),
            "lin1_w_t": jax.random.uniform(lk[2], (HIDDEN, FFN_DIM),
                                           minval=-s_ffn1, maxval=s_ffn1),
            "lin1_b": jax.random.uniform(lk[3], (FFN_DIM,),
                                         minval=-s_ffn1, maxval=s_ffn1),
            "lin2_w_t": jax.random.uniform(lk[4], (FFN_DIM, HIDDEN),
                                           minval=-s_ffn2, maxval=s_ffn2),
            "lin2_b": jax.random.uniform(lk[5], (HIDDEN,),
                                         minval=-s_ffn2, maxval=s_ffn2),
            "ln1_g": jnp.ones((HIDDEN,), jnp.float32),
            "ln1_b": jnp.zeros((HIDDEN,), jnp.float32),
            "ln2_g": jnp.ones((HIDDEN,), jnp.float32),
            "ln2_b": jnp.zeros((HIDDEN,), jnp.float32),
        }
        params["layers"].append(layer)
    return params


def transformer_forward(tec, params):
    """tec: (B, S, in_dim) -> (B, S, out_dim)"""
    B, S, _ = tec.shape
    D = HIDDEN
    M = B * S
    tile_m = M if M <= 512 else 512                       # row-tile for FFN/decoder

    bf = lambda w: w.astype(MATMUL_DTYPE)                 # MXU-native weight copies

    # PositionalEncoding: x + pe[:x.size(0)]  (pe indexed by BATCH, broadcast
    # over the sequence axis -- exact reproduction of the PyTorch code).
    pe_b = params["pe"][:B]                               # (B, 1, D)

    h = input_projection(tec, bf(params["input_w"]), params["input_b"], pe_b)

    for layer in params["layers"]:
        layer_bf16 = {
            "in_proj_w_t": bf(layer["in_proj_w_t"]),
            "out_proj_w_t": bf(layer["out_proj_w_t"]),
            "lin1_w_t": bf(layer["lin1_w_t"]),
            "lin2_w_t": bf(layer["lin2_w_t"]),
        }
        h = attention_block(h, layer_bf16, layer)
        h = ffn_block(h.reshape(M, D), layer_bf16, layer, tile_m).reshape(B, S, D)

    out = decoder_block(h.reshape(M, D), bf(params["dec_w"]),
                        params["dec_b"], tile_m)
    return out.reshape(B, S, params["dec_w"].shape[1])


if __name__ == "__main__":
    B, S, IN_DIM, OUT_DIM = 2, 8, 16, 4

    key = jax.random.PRNGKey(0)
    kx, kp = jax.random.split(key)
    tec = jax.random.normal(kx, (B, S, IN_DIM), dtype=jnp.float32)
    params = init_params(kp, IN_DIM, OUT_DIM)

    fwd = jax.jit(transformer_forward)
    out = fwd(tec, params)
    jax.block_until_ready(out)

    assert out.shape == (B, S, OUT_DIM)
    assert bool(jnp.all(jnp.isfinite(out)))
    assert bool(jnp.all(out >= 0.0))  # final ReLU
    print("KERNEL_OK")
</pallas_src>

<mosaic_0001>
module attributes {stable_mosaic.version = 11 : i64} {
  func.func @_input_pe_kernel(%arg0: i32, %arg1: memref<1x8x16xf32, #tpu.memory_space<vmem>>, %arg2: memref<16x128xbf16, #tpu.memory_space<vmem>>, %arg3: memref<1x128xf32, #tpu.memory_space<vmem>>, %arg4: memref<1x1x128xf32, #tpu.memory_space<vmem>>, %arg5: memref<1x8x128xf32, #tpu.memory_space<vmem>>) attributes {dimension_semantics = [#tpu.dimension_semantics<parallel>], iteration_bounds = array<i64: 2>, scalar_prefetch = 0 : i64, scratch_operands = 0 : i64, tpu.core_type = #tpu.core_type<tc>, window_params = [{transform_indices = @transform_0, window_bounds = array<i64: 1, 8, 16>}, {pipeline_mode = #tpu.pipeline_mode<synchronous>, transform_indices = @transform_1, window_bounds = array<i64: 16, 128>}, {pipeline_mode = #tpu.pipeline_mode<synchronous>, transform_indices = @transform_2, window_bounds = array<i64: 1, 128>}, {transform_indices = @transform_3, window_bounds = array<i64: 1, 1, 128>}, {transform_indices = @transform_4, window_bounds = array<i64: 1, 8, 128>}]} {
    %c0 = arith.constant 0 : index
    %c0_0 = arith.constant 0 : index
    %c0_1 = arith.constant 0 : index
    %0 = vector.load %arg1[%c0, %c0_0, %c0_1] : memref<1x8x16xf32, #tpu.memory_space<vmem>>, vector<1x8x16xf32>
    %1 = vector.shape_cast %0 : vector<1x8x16xf32> to vector<8x16xf32>
    %2 = arith.truncf %1 : vector<8x16xf32> to vector<8x16xbf16>
    %c0_2 = arith.constant 0 : index
    %c0_3 = arith.constant 0 : index
    %3 = vector.load %arg2[%c0_2, %c0_3] : memref<16x128xbf16, #tpu.memory_space<vmem>>, vector<16x128xbf16>
    %cst = arith.constant dense<0.000000e+00> : vector<8x128xf32>
    %4 = tpu.matmul %2, %3, %cst {dimension_numbers = #tpu.dot_dimension_numbers<[1], [0], [0], [1], [0, 0, 1, 1], [], []>} : vector<8x16xbf16>, vector<16x128xbf16>, vector<8x128xf32> -> vector<8x128xf32>
    %c0_4 = arith.constant 0 : index
    %c0_5 = arith.constant 0 : index
    %5 = vector.load %arg3[%c0_4, %c0_5] : memref<1x128xf32, #tpu.memory_space<vmem>>, vector<1x128xf32>
    %6 = vector.broadcast %5 : vector<1x128xf32> to vector<8x128xf32>
    %7 = arith.addf %4, %6 : vector<8x128xf32>
    %c0_6 = arith.constant 0 : index
    %c0_7 = arith.constant 0 : index
    %c0_8 = arith.constant 0 : index
    %8 = vector.load %arg4[%c0_6, %c0_7, %c0_8] : memref<1x1x128xf32, #tpu.memory_space<vmem>>, vector<1x1x128xf32>
    %9 = vector.shape_cast %8 : vector<1x1x128xf32> to vector<1x128xf32>
    %10 = vector.broadcast %9 : vector<1x128xf32> to vector<8x128xf32>
    %11 = arith.addf %7, %10 : vector<8x128xf32>
    %c0_9 = arith.constant 0 : index
    %c0_10 = arith.constant 0 : index
    %c0_11 = arith.constant 0 : index
    %12 = vector.load %arg5[%c0_9, %c0_10, %c0_11] : memref<1x8x128xf32, #tpu.memory_space<vmem>>, vector<1x8x128xf32>
    %13 = vector.shape_cast %12 : vector<1x8x128xf32> to vector<8x128xf32>
    %14 = vector.shape_cast %11 : vector<8x128xf32> to vector<1x8x128xf32>
    tpu.vector_store %arg5[%c0_9, %c0_10, %c0_11], %14 {strides = array<i32>} : memref<1x8x128xf32, #tpu.memory_space<vmem>>, vector<1x8x128xf32>,
    return
  }
  func.func @transform_0(%arg0: i32) -> (i32, i32, i32) {
    %c0_i32 = arith.constant 0 : i32
    %c0_i32_0 = arith.constant 0 : i32
    %c0_i32_1 = arith.constant 0 : i32
    return %arg0, %c0_i32, %c0_i32_0 : i32, i32, i32
  }
  func.func @transform_1(%arg0: i32) -> (i32, i32) {
    %c0_i32 = arith.constant 0 : i32
    %c0_i32_0 = arith.constant 0 : i32
    %c0_i32_1 = arith.constant 0 : i32
    return %c0_i32, %c0_i32_0 : i32, i32
  }
  func.func @transform_2(%arg0: i32) -> (i32, i32) {
    %c0_i32 = arith.constant 0 : i32
    %c0_i32_0 = arith.constant 0 : i32
    %c0_i32_1 = arith.constant 0 : i32
    return %c0_i32, %c0_i32_0 : i32, i32
  }
  func.func @transform_3(%arg0: i32) -> (i32, i32, i32) {
    %c0_i32 = arith.constant 0 : i32
    %c0_i32_0 = arith.constant 0 : i32
    %c0_i32_1 = arith.constant 0 : i32
    return %arg0, %c0_i32, %c0_i32_0 : i32, i32, i32
  }
  func.func @transform_4(%arg0: i32) -> (i32, i32, i32) {
    %c0_i32 = arith.constant 0 : i32
    %c0_i32_0 = arith.constant 0 : i32
    %c0_i32_1 = arith.constant 0 : i32
    return %arg0, %c0_i32, %c0_i32_0 : i32, i32, i32
  }
}

module attributes {stable_mosaic.version = 11 : i64} {
  func.func @_attn_block_kernel(%arg0: i32, %arg1: memref<1x8x128xf32, #tpu.memory_space<vmem>>, %arg2: memref<128x384xbf16, #tpu.memory_space<vmem>>, %arg3: memref<1x384xf32, #tpu.memory_space<vmem>>, %arg4: memref<128x128xbf16, #tpu.memory_space<vmem>>, %arg5: memref<1x128xf32, #tpu.memory_space<vmem>>, %arg6: memref<1x128xf32, #tpu.memory_space<vmem>>, %arg7: memref<1x128xf32, #tpu.memory_space<vmem>>, %arg8: memref<1x8x128xf32, #tpu.memory_space<vmem>>) attributes {dimension_semantics = [#tpu.dimension_semantics<parallel>], iteration_bounds = array<i64: 2>, scalar_prefetch = 0 : i64, scratch_operands = 0 : i64, tpu.core_type = #tpu.core_type<tc>, window_params = [{transform_indices = @transform_0, window_bounds = array<i64: 1, 8, 128>}, {pipeline_mode = #tpu.pipeline_mode<synchronous>, transform_indices = @transform_1, window_bounds = array<i64: 128, 384>}, {pipeline_mode = #tpu.pipeline_mode<synchronous>, transform_indices = @transform_2, window_bounds = array<i64: 1, 384>}, {pipeline_mode = #tpu.pipeline_mode<synchronous>, transform_indices = @transform_3, window_bounds = array<i64: 128, 128>}, {pipeline_mode = #tpu.pipeline_mode<synchronous>, transform_indices = @transform_4, window_bounds = array<i64: 1, 128>}, {pipeline_mode = #tpu.pipeline_mode<synchronous>, transform_indices = @transform_5, window_bounds = array<i64: 1, 128>}, {pipeline_mode = #tpu.pipeline_mode<synchronous>, transform_indices = @transform_6, window_bounds = array<i64: 1, 128>}, {transform_indices = @transform_7, window_bounds = array<i64: 1, 8, 128>}]} {
    %c0 = arith.constant 0 : index
    %c0_0 = arith.constant 0 : index
    %c0_1 = arith.constant 0 : index
    %0 = vector.load %arg1[%c0, %c0_0, %c0_1] : memref<1x8x128xf32, #tpu.memory_space<vmem>>, vector<1x8x128xf32>
    %1 = vector.shape_cast %0 : vector<1x8x128xf32> to vector<8x128xf32>
    %c0_2 = arith.constant 0 : index
    %c0_3 = arith.constant 0 : index
    %2 = vector.load %arg6[%c0_2, %c0_3] : memref<1x128xf32, #tpu.memory_space<vmem>>, vector<1x128xf32>
    %c0_4 = arith.constant 0 : index
    %c0_5 = arith.constant 0 : index
    %3 = vector.load %arg7[%c0_4, %c0_5] : memref<1x128xf32, #tpu.memory_space<vmem>>, vector<1x128xf32>
    %cst = arith.constant dense<0.000000e+00> : vector<8xf32>
    %4 = vector.multi_reduction <add>, %1, %cst [1] : vector<8x128xf32> to vector<8xf32>
    %5 = vector.shape_cast %4 : vector<8xf32> to vector<8x1xf32>
    %cst_6 = arith.constant 1.280000e+02 : f32
    %6 = vector.broadcast %cst_6 : f32 to vector<8x1xf32>
    %7 = arith.divf %5, %6 : vector<8x1xf32>
    %8 = vector.broadcast %7 : vector<8x1xf32> to vector<8x128xf32>
    %9 = arith.subf %1, %8 : vector<8x128xf32>
    %10 = arith.mulf %9, %9 : vector<8x128xf32>
    %cst_7 = arith.constant dense<0.000000e+00> : vector<8xf32>
    %11 = vector.multi_reduction <add>, %10, %cst_7 [1] : vector<8x128xf32> to vector<8xf32>
    %12 = vector.shape_cast %11 : vector<8xf32> to vector<8x1xf32>
    %cst_8 = arith.constant 1.280000e+02 : f32
    %13 = vector.broadcast %cst_8 : f32 to vector<8x1xf32>
    %14 = arith.divf %12, %13 : vector<8x1xf32>
    %cst_9 = arith.constant 9.99999974E-6 : f32
    %15 = vector.broadcast %cst_9 : f32 to vector<8x1xf32>
    %16 = arith.addf %14, %15 : vector<8x1xf32>
    %17 = math.rsqrt %16 : vector<8x1xf32>
    %18 = vector.broadcast %17 : vector<8x1xf32> to vector<8x128xf32>
    %19 = arith.mulf %9, %18 : vector<8x128xf32>
    %20 = vector.broadcast %2 : vector<1x128xf32> to vector<8x128xf32>
    %21 = arith.mulf %19, %20 : vector<8x128xf32>
    %22 = vector.broadcast %3 : vector<1x128xf32> to vector<8x128xf32>
    %23 = arith.addf %21, %22 : vector<8x128xf32>
    %24 = arith.truncf %23 : vector<8x128xf32> to vector<8x128xbf16>
    %c0_10 = arith.constant 0 : index
    %c0_11 = arith.constant 0 : index
    %25 = vector.load %arg2[%c0_10, %c0_11] : memref<128x384xbf16, #tpu.memory_space<vmem>>, vector<128x384xbf16>
    %cst_12 = arith.constant dense<0.000000e+00> : vector<8x384xf32>
    %26 = tpu.matmul %24, %25, %cst_12 {dimension_numbers = #tpu.dot_dimension_numbers<[1], [0], [0], [1], [0, 0, 1, 1], [], []>} : vector<8x128xbf16>, vector<128x384xbf16>, vector<8x384xf32> -> vector<8x384xf32>
    %c0_13 = arith.constant 0 : index
    %c0_14 = arith.constant 0 : index
    %27 = vector.load %arg3[%c0_13, %c0_14] : memref<1x384xf32, #tpu.memory_space<vmem>>, vector<1x384xf32>
    %28 = vector.broadcast %27 : vector<1x384xf32> to vector<8x384xf32>
    %29 = arith.addf %26, %28 : vector<8x384xf32>
    %30 = tpu.iota {dimensions = array<i32: 0>} : vector<8x8xi32>
    %31 = tpu.iota {dimensions = array<i32: 1>} : vector<8x8xi32>
    %32 = arith.cmpi sle, %31, %30 : vector<8x8xi32>
    %33 = vector.extract_strided_slice %29 {offsets = [0, 128], sizes = [8, 128], strides = [1, 1]} : vector<8x384xf32> to vector<8x128xf32>
    %34 = tpu.transpose %33, [1, 0] : vector<8x128xf32> -> vector<128x8xf32>
    %c0_15 = arith.constant 0 : index
    %c0_16 = arith.constant 0 : index
    %35 = vector.load %arg4[%c0_15, %c0_16] : memref<128x128xbf16, #tpu.memory_space<vmem>>, vector<128x128xbf16>
    %cst_17 = arith.constant 0.000000e+00 : f32
    %36 = vector.broadcast %cst_17 : f32 to vector<8x128xf32>
    %37 = vector.extract_strided_slice %29 {offsets = [0, 0], sizes = [8, 16], strides = [1, 1]} : vector<8x384xf32> to vector<8x16xf32>
    %38 = vector.extract_strided_slice %34 {offsets = [0, 0], sizes = [16, 8], strides = [1, 1]} : vector<128x8xf32> to vector<16x8xf32>
    %39 = vector.extract_strided_slice %29 {offsets = [0, 256], sizes = [8, 16], strides = [1, 1]} : vector<8x384xf32> to vector<8x16xf32>
    %40 = arith.truncf %37 : vector<8x16xf32> to vector<8x16xbf16>
    %41 = arith.truncf %38 : vector<16x8xf32> to vector<16x8xbf16>
    %cst_18 = arith.constant dense<0.000000e+00> : vector<8x8xf32>
    %42 = tpu.matmul %40, %41, %cst_18 {dimension_numbers = #tpu.dot_dimension_numbers<[1], [0], [0], [1], [0, 0, 1, 1], [], []>} : vector<8x16xbf16>, vector<16x8xbf16>, vector<8x8xf32> -> vector<8x8xf32>
    %cst_19 = arith.constant 2.500000e-01 : f32
    %43 = vector.broadcast %cst_19 : f32 to vector<8x8xf32>
    %44 = arith.mulf %42, %43 : vector<8x8xf32>
    %cst_20 = arith.constant 0xFF800000 : f32
    %45 = vector.broadcast %cst_20 : f32 to vector<8x8xf32>
    %46 = arith.select %32, %44, %45 : vector<8x8xi1>, vector<8x8xf32>
    %cst_21 = arith.constant dense<0xFF800000> : vector<8xf32>
    %47 = vector.multi_reduction <maximumf>, %46, %cst_21 [1] : vector<8x8xf32> to vector<8xf32>
    %48 = vector.shape_cast %47 : vector<8xf32> to vector<8x1xf32>
    %49 = vector.broadcast %48 : vector<8x1xf32> to vector<8x8xf32>
    %50 = arith.subf %46, %49 : vector<8x8xf32>
    %51 = math.exp %50 : vector<8x8xf32>
    %cst_22 = arith.constant dense<0.000000e+00> : vector<8xf32>
    %52 = vector.multi_reduction <add>, %51, %cst_22 [1] : vector<8x8xf32> to vector<8xf32>
    %53 = vector.shape_cast %52 : vector<8xf32> to vector<8x1xf32>
    %54 = tpu.reciprocal %53 {approx = true} : vector<8x1xf32> -> vector<8x1xf32>
    %55 = vector.broadcast %54 : vector<8x1xf32> to vector<8x8xf32>
    %56 = arith.mulf %51, %55 : vector<8x8xf32>
    %57 = arith.truncf %56 : vector<8x8xf32> to vector<8x8xbf16>
    %58 = arith.truncf %39 : vector<8x16xf32> to vector<8x16xbf16>
    %cst_23 = arith.constant dense<0.000000e+00> : vector<8x16xf32>
    %59 = tpu.matmul %57, %58, %cst_23 {dimension_numbers = #tpu.dot_dimension_numbers<[1], [0], [0], [1], [0, 0, 1, 1], [], []>} : vector<8x8xbf16>, vector<8x16xbf16>, vector<8x16xf32> -> vector<8x16xf32>
    %60 = arith.truncf %59 : vector<8x16xf32> to vector<8x16xbf16>
    %61 = vector.extract_strided_slice %35 {offsets = [0, 0], sizes = [16, 128], strides = [1, 1]} : vector<128x128xbf16> to vector<16x128xbf16>
    %cst_24 = arith.constant dense<0.000000e+00> : vector<8x128xf32>
    %62 = tpu.matmul %60, %61, %cst_24 {dimension_numbers = #tpu.dot_dimension_numbers<[1], [0], [0], [1], [0, 0, 1, 1], [], []>} : vector<8x16xbf16>, vector<16x128xbf16>, vector<8x128xf32> -> vector<8x128xf32>
    %63 = arith.addf %36, %62 : vector<8x128xf32>
    %64 = vector.extract_strided_slice %29 {offsets = [0, 16], sizes = [8, 16], strides = [1, 1]} : vector<8x384xf32> to vector<8x16xf32>
    %65 = vector.extract_strided_slice %34 {offsets = [16, 0], sizes = [16, 8], strides = [1, 1]} : vector<128x8xf32> to vector<16x8xf32>
    %66 = vector.extract_strided_slice %29 {offsets = [0, 272], sizes = [8, 16], strides = [1, 1]} : vector<8x384xf32> to vector<8x16xf32>
    %67 = arith.truncf %64 : vector<8x16xf32> to vector<8x16xbf16>
    %68 = arith.truncf %65 : vector<16x8xf32> to vector<16x8xbf16>
    %cst_25 = arith.constant dense<0.000000e+00> : vector<8x8xf32>
    %69 = tpu.matmul %67, %68, %cst_25 {dimension_numbers = #tpu.dot_dimension_numbers<[1], [0], [0], [1], [0, 0, 1, 1], [], []>} : vector<8x16xbf16>, vector<16x8xbf16>, vector<8x8xf32> -> vector<8x8xf32>
    %cst_26 = arith.constant 2.500000e-01 : f32
    %70 = vector.broadcast %cst_26 : f32 to vector<8x8xf32>
    %71 = arith.mulf %69, %70 : vector<8x8xf32>
    %cst_27 = arith.constant 0xFF800000 : f32
    %72 = vector.broadcast %cst_27 : f32 to vector<8x8xf32>
    %73 = arith.select %32, %71, %72 : vector<8x8xi1>, vector<8x8xf32>
    %cst_28 = arith.constant dense<0xFF800000> : vector<8xf32>
    %74 = vector.multi_reduction <maximumf>, %73, %cst_28 [1] : vector<8x8xf32> to vector<8xf32>
    %75 = vector.shape_cast %74 : vector<8xf32> to vector<8x1xf32>
    %76 = vector.broadcast %75 : vector<8x1xf32> to vector<8x8xf32>
    %77 = arith.subf %73, %76 : vector<8x8xf32>
    %78 = math.exp %77 : vector<8x8xf32>
    %cst_29 = arith.constant dense<0.000000e+00> : vector<8xf32>
    %79 = vector.multi_reduction <add>, %78, %cst_29 [1] : vector<8x8xf32> to vector<8xf32>
    %80 = vector.shape_cast %79 : vector<8xf32> to vector<8x1xf32>
    %81 = tpu.reciprocal %80 {approx = true} : vector<8x1xf32> -> vector<8x1xf32>
    %82 = vector.broadcast %81 : vector<8x1xf32> to vector<8x8xf32>
    %83 = arith.mulf %78, %82 : vector<8x8xf32>
    %84 = arith.truncf %83 : vector<8x8xf32> to vector<8x8xbf16>
    %85 = arith.truncf %66 : vector<8x16xf32> to vector<8x16xbf16>
    %cst_30 = arith.constant dense<0.000000e+00> : vector<8x16xf32>
    %86 = tpu.matmul %84, %85, %cst_30 {dimension_numbers = #tpu.dot_dimension_numbers<[1], [0], [0], [1], [0, 0, 1, 1], [], []>} : vector<8x8xbf16>, vector<8x16xbf16>, vector<8x16xf32> -> vector<8x16xf32>
    %87 = arith.truncf %86 : vector<8x16xf32> to vector<8x16xbf16>
    %88 = vector.extract_strided_slice %35 {offsets = [16, 0], sizes = [16, 128], strides = [1, 1]} : vector<128x128xbf16> to vector<16x128xbf16>
    %cst_31 = arith.constant dense<0.000000e+00> : vector<8x128xf32>
    %89 = tpu.matmul %87, %88, %cst_31 {dimension_numbers = #tpu.dot_dimension_numbers<[1], [0], [0], [1], [0, 0, 1, 1], [], []>} : vector<8x16xbf16>, vector<16x128xbf16>, vector<8x128xf32> -> vector<8x128xf32>
    %90 = arith.addf %63, %89 : vector<8x128xf32>
    %91 = vector.extract_strided_slice %29 {offsets = [0, 32], sizes = [8, 16], strides = [1, 1]} : vector<8x384xf32> to vector<8x16xf32>
    %92 = vector.extract_strided_slice %34 {offsets = [32, 0], sizes = [16, 8], strides = [1, 1]} : vector<128x8xf32> to vector<16x8xf32>
    %93 = vector.extract_strided_slice %29 {offsets = [0, 288], sizes = [8, 16], strides = [1, 1]} : vector<8x384xf32> to vector<8x16xf32>
    %94 = arith.truncf %91 : vector<8x16xf32> to vector<8x16xbf16>
    %95 = arith.truncf %92 : vector<16x8xf32> to vector<16x8xbf16>
    %cst_32 = arith.constant dense<0.000000e+00> : vector<8x8xf32>
    %96 = tpu.matmul %94, %95, %cst_32 {dimension_numbers = #tpu.dot_dimension_numbers<[1], [0], [0], [1], [0, 0, 1, 1], [], []>} : vector<8x16xbf16>, vector<16x8xbf16>, vector<8x8xf32> -> vector<8x8xf32>
    %cst_33 = arith.constant 2.500000e-01 : f32
    %97 = vector.broadcast %cst_33 : f32 to vector<8x8xf32>
    %98 = arith.mulf %96, %97 : vector<8x8xf32>
    %cst_34 = arith.constant 0xFF800000 : f32
    %99 = vector.broadcast %cst_34 : f32 to vector<8x8xf32>
    %100 = arith.select %32, %98, %99 : vector<8x8xi1>, vector<8x8xf32>
    %cst_35 = arith.constant dense<0xFF800000> : vector<8xf32>
    %101 = vector.multi_reduction <maximumf>, %100, %cst_35 [1] : vector<8x8xf32> to vector<8xf32>
    %102 = vector.shape_cast %101 : vector<8xf32> to vector<8x1xf32>
    %103 = vector.broadcast %102 : vector<8x1xf32> to vector<8x8xf32>
    %104 = arith.subf %100, %103 : vector<8x8xf32>
    %105 = math.exp %104 : vector<8x8xf32>
    %cst_36 = arith.constant dense<0.000000e+00> : vector<8xf32>
    %106 = vector.multi_reduction <add>, %105, %cst_36 [1] : vector<8x8xf32> to vector<8xf32>
    %107 = vector.shape_cast %106 : vector<8xf32> to vector<8x1xf32>
    %108 = tpu.reciprocal %107 {approx = true} : vector<8x1xf32> -> vector<8x1xf32>
    %109 = vector.broadcast %108 : vector<8x1xf32> to vector<8x8xf32>
    %110 = arith.mulf %105, %109 : vector<8x8xf32>
    %111 = arith.truncf %110 : vector<8x8xf32> to vector<8x8xbf16>
    %112 = arith.truncf %93 : vector<8x16xf32> to vector<8x16xbf16>
    %cst_37 = arith.constant dense<0.000000e+00> : vector<8x16xf32>
    %113 = tpu.matmul %111, %112, %cst_37 {dimension_numbers = #tpu.dot_dimension_numbers<[1], [0], [0], [1], [0, 0, 1, 1], [], []>} : vector<8x8xbf16>, vector<8x16xbf16>, vector<8x16xf32> -> vector<8x16xf32>
    %114 = arith.truncf %113 : vector<8x16xf32> to vector<8x16xbf16>
    %115 = vector.extract_strided_slice %35 {offsets = [32, 0], sizes = [16, 128], strides = [1, 1]} : vector<128x128xbf16> to vector<16x128xbf16>
    %cst_38 = arith.constant dense<0.000000e+00> : vector<8x128xf32>
    %116 = tpu.matmul %114, %115, %cst_38 {dimension_numbers = #tpu.dot_dimension_numbers<[1], [0], [0], [1], [0, 0, 1, 1], [], []>} : vector<8x16xbf16>, vector<16x128xbf16>, vector<8x128xf32> -> vector<8x128xf32>
    %117 = arith.addf %90, %116 : vector<8x128xf32>
    %118 = vector.extract_strided_slice %29 {offsets = [0, 48], sizes = [8, 16], strides = [1, 1]} : vector<8x384xf32> to vector<8x16xf32>
    %119 = vector.extract_strided_slice %34 {offsets = [48, 0], sizes = [16, 8], strides = [1, 1]} : vector<128x8xf32> to vector<16x8xf32>
    %120 = vector.extract_strided_slice %29 {offsets = [0, 304], sizes = [8, 16], strides = [1, 1]} : vector<8x384xf32> to vector<8x16xf32>
    %121 = arith.truncf %118 : vector<8x16xf32> to vector<8x16xbf16>
    %122 = arith.truncf %119 : vector<16x8xf32> to vector<16x8xbf16>
    %cst_39 = arith.constant dense<0.000000e+00> : vector<8x8xf32>
    %123 = tpu.matmul %121, %122, %cst_39 {dimension_numbers = #tpu.dot_dimension_numbers<[1], [0], [0], [1], [0, 0, 1, 1], [], []>} : vector<8x16xbf16>, vector<16x8xbf16>, vector<8x8xf32> -> vector<8x8xf32>
    %cst_40 = arith.constant 2.500000e-01 : f32
    %124 = vector.broadcast %cst_40 : f32 to vector<8x8xf32>
    %125 = arith.mulf %123, %124 : vector<8x8xf32>
    %cst_41 = arith.constant 0xFF800000 : f32
    %126 = vector.broadcast %cst_41 : f32 to vector<8x8xf32>
    %127 = arith.select %32, %125, %126 : vector<8x8xi1>, vector<8x8xf32>
    %cst_42 = arith.constant dense<0xFF800000> : vector<8xf32>
    %128 = vector.multi_reduction <maximumf>, %127, %cst_42 [1] : vector<8x8xf32> to vector<8xf32>
    %129 = vector.shape_cast %128 : vector<8xf32> to vector<8x1xf32>
    %130 = vector.broadcast %129 : vector<8x1xf32> to vector<8x8xf32>
    %131 = arith.subf %127, %130 : vector<8x8xf32>
    %132 = math.exp %131 : vector<8x8xf32>
    %cst_43 = arith.constant dense<0.000000e+00> : vector<8xf32>
    %133 = vector.multi_reduction <add>, %132, %cst_43 [1] : vector<8x8xf32> to vector<8xf32>
    %134 = vector.shape_cast %133 : vector<8xf32> to vector<8x1xf32>
    %135 = tpu.reciprocal %134 {approx = true} : vector<8x1xf32> -> vector<8x1xf32>
    %136 = vector.broadcast %135 : vector<8x1xf32> to vector<8x8xf32>
    %137 = arith.mulf %132, %136 : vector<8x8xf32>
    %138 = arith.truncf %137 : vector<8x8xf32> to vector<8x8xbf16>
    %139 = arith.truncf %120 : vector<8x16xf32> to vector<8x16xbf16>
    %cst_44 = arith.constant dense<0.000000e+00> : vector<8x16xf32>
    %140 = tpu.matmul %138, %139, %cst_44 {dimension_numbers = #tpu.dot_dimension_numbers<[1], [0], [0], [1], [0, 0, 1, 1], [], []>} : vector<8x8xbf16>, vector<8x16xbf16>, vector<8x16xf32> -> vector<8x16xf32>
    %141 = arith.truncf %140 : vector<8x16xf32> to vector<8x16xbf16>
    %142 = vector.extract_strided_slice %35 {offsets = [48, 0], sizes = [16, 128], strides = [1, 1]} : vector<128x128xbf16> to vector<16x128xbf16>
    %cst_45 = arith.constant dense<0.000000e+00> : vector<8x128xf32>
    %143 = tpu.matmul %141, %142, %cst_45 {dimension_numbers = #tpu.dot_dimension_numbers<[1], [0], [0], [1], [0, 0, 1, 1], [], []>} : vector<8x16xbf16>, vector<16x128xbf16>, vector<8x128xf32> -> vector<8x128xf32>
    %144 = arith.addf %117, %143 : vector<8x128xf32>
    %145 = vector.extract_strided_slice %29 {offsets = [0, 64], sizes = [8, 16], strides = [1, 1]} : vector<8x384xf32> to vector<8x16xf32>
    %146 = vector.extract_strided_slice %34 {offsets = [64, 0], sizes = [16, 8], strides = [1, 1]} : vector<128x8xf32> to vector<16x8xf32>
    %147 = vector.extract_strided_slice %29 {offsets = [0, 320], sizes = [8, 16], strides = [1, 1]} : vector<8x384xf32> to vector<8x16xf32>
    %148 = arith.truncf %145 : vector<8x16xf32> to vector<8x16xbf16>
    %149 = arith.truncf %146 : vector<16x8xf32> to vector<16x8xbf16>
    %cst_46 = arith.constant dense<0.000000e+00> : vector<8x8xf32>
    %150 = tpu.matmul %148, %149, %cst_46 {dimension_numbers = #tpu.dot_dimension_numbers<[1], [0], [0], [1], [0, 0, 1, 1], [], []>} : vector<8x16xbf16>, vector<16x8xbf16>, vector<8x8xf32> -> vector<8x8xf32>
    %cst_47 = arith.constant 2.500000e-01 : f32
    %151 = vector.broadcast %cst_47 : f32 to vector<8x8xf32>
    %152 = arith.mulf %150, %151 : vector<8x8xf32>
    %cst_48 = arith.constant 0xFF800000 : f32
    %153 = vector.broadcast %cst_48 : f32 to vector<8x8xf32>
    %154 = arith.select %32, %152, %153 : vector<8x8xi1>, vector<8x8xf32>
    %cst_49 = arith.constant dense<0xFF800000> : vector<8xf32>
    %155 = vector.multi_reduction <maximumf>, %154, %cst_49 [1] : vector<8x8xf32> to vector<8xf32>
    %156 = vector.shape_cast %155 : vector<8xf32> to vector<8x1xf32>
    %157 = vector.broadcast %156 : vector<8x1xf32> to vector<8x8xf32>
    %158 = arith.subf %154, %157 : vector<8x8xf32>
    %159 = math.exp %158 : vector<8x8xf32>
    %cst_50 = arith.constant dense<0.000000e+00> : vector<8xf32>
    %160 = vector.multi_reduction <add>, %159, %cst_50 [1] : vector<8x8xf32> to vector<8xf32>
    %161 = vector.shape_cast %160 : vector<8xf32> to vector<8x1xf32>
    %162 = tpu.reciprocal %161 {approx = true} : vector<8x1xf32> -> vector<8x1xf32>
    %163 = vector.broadcast %162 : vector<8x1xf32> to vector<8x8xf32>
    %164 = arith.mulf %159, %163 : vector<8x8xf32>
    %165 = arith.truncf %164 : vector<8x8xf32> to vector<8x8xbf16>
    %166 = arith.truncf %147 : vector<8x16xf32> to vector<8x16xbf16>
    %cst_51 = arith.constant dense<0.000000e+00> : vector<8x16xf32>
    %167 = tpu.matmul %165, %166, %cst_51 {dimension_numbers = #tpu.dot_dimension_numbers<[1], [0], [0], [1], [0, 0, 1, 1], [], []>} : vector<8x8xbf16>, vector<8x16xbf16>, vector<8x16xf32> -> vector<8x16xf32>
    %168 = arith.truncf %167 : vector<8x16xf32> to vector<8x16xbf16>
    %169 = vector.extract_strided_slice %35 {offsets = [64, 0], sizes = [16, 128], strides = [1, 1]} : vector<128x128xbf16> to vector<16x128xbf16>
    %cst_52 = arith.constant dense<0.000000e+00> : vector<8x128xf32>
    %170 = tpu.matmul %168, %169, %cst_52 {dimension_numbers = #tpu.dot_dimension_numbers<[1], [0], [0], [1], [0, 0, 1, 1], [], []>} : vector<8x16xbf16>, vector<16x128xbf16>, vector<8x128xf32> -> vector<8x128xf32>
    %171 = arith.addf %144, %170 : vector<8x128xf32>
    %172 = vector.extract_strided_slice %29 {offsets = [0, 80], sizes = [8, 16], strides = [1, 1]} : vector<8x384xf32> to vector<8x16xf32>
    %173 = vector.extract_strided_slice %34 {offsets = [80, 0], sizes = [16, 8], strides = [1, 1]} : vector<128x8xf32> to vector<16x8xf32>
    %174 = vector.extract_strided_slice %29 {offsets = [0, 336], sizes = [8, 16], strides = [1, 1]} : vector<8x384xf32> to vector<8x16xf32>
    %175 = arith.truncf %172 : vector<8x16xf32> to vector<8x16xbf16>
    %176 = arith.truncf %173 : vector<16x8xf32> to vector<16x8xbf16>
    %cst_53 = arith.constant dense<0.000000e+00> : vector<8x8xf32>
    %177 = tpu.matmul %175, %176, %cst_53 {dimension_numbers = #tpu.dot_dimension_numbers<[1], [0], [0], [1], [0, 0, 1, 1], [], []>} : vector<8x16xbf16>, vector<16x8xbf16>, vector<8x8xf32> -> vector<8x8xf32>
    %cst_54 = arith.constant 2.500000e-01 : f32
    %178 = vector.broadcast %cst_54 : f32 to vector<8x8xf32>
    %179 = arith.mulf %177, %178 : vector<8x8xf32>
    %cst_55 = arith.constant 0xFF800000 : f32
    %180 = vector.broadcast %cst_55 : f32 to vector<8x8xf32>
    %181 = arith.select %32, %179, %180 : vector<8x8xi1>, vector<8x8xf32>
    %cst_56 = arith.constant dense<0xFF800000> : vector<8xf32>
    %182 = vector.multi_reduction <maximumf>, %181, %cst_56 [1] : vector<8x8xf32> to vector<8xf32>
    %183 = vector.shape_cast %182 : vector<8xf32> to vector<8x1xf32>
    %184 = vector.broadcast %183 : vector<8x1xf32> to vector<8x8xf32>
    %185 = arith.subf %181, %184 : vector<8x8xf32>
    %186 = math.exp %185 : vector<8x8xf32>
    %cst_57 = arith.constant dense<0.000000e+00> : vector<8xf32>
    %187 = vector.multi_reduction <add>, %186, %cst_57 [1] : vector<8x8xf32> to vector<8xf32>
    %188 = vector.shape_cast %187 : vector<8xf32> to vector<8x1xf32>
    %189 = tpu.reciprocal %188 {approx = true} : vector<8x1xf32> -> vector<8x1xf32>
    %190 = vector.broadcast %189 : vector<8x1xf32> to vector<8x8xf32>
    %191 = arith.mulf %186, %190 : vector<8x8xf32>
    %192 = arith.truncf %191 : vector<8x8xf32> to vector<8x8xbf16>
    %193 = arith.truncf %174 : vector<8x16xf32> to vector<8x16xbf16>
    %cst_58 = arith.constant dense<0.000000e+00> : vector<8x16xf32>
    %194 = tpu.matmul %192, %193, %cst_58 {dimension_numbers = #tpu.dot_dimension_numbers<[1], [0], [0], [1], [0, 0, 1, 1], [], []>} : vector<8x8xbf16>, vector<8x16xbf16>, vector<8x16xf32> -> vector<8x16xf32>
    %195 = arith.truncf %194 : vector<8x16xf32> to vector<8x16xbf16>
    %196 = vector.extract_strided_slice %35 {offsets = [80, 0], sizes = [16, 128], strides = [1, 1]} : vector<128x128xbf16> to vector<16x128xbf16>
    %cst_59 = arith.constant dense<0.000000e+00> : vector<8x128xf32>
    %197 = tpu.matmul %195, %196, %cst_59 {dimension_numbers = #tpu.dot_dimension_numbers<[1], [0], [0], [1], [0, 0, 1, 1], [], []>} : vector<8x16xbf16>, vector<16x128xbf16>, vector<8x128xf32> -> vector<8x128xf32>
    %198 = arith.addf %171, %197 : vector<8x128xf32>
    %199 = vector.extract_strided_slice %29 {offsets = [0, 96], sizes = [8, 16], strides = [1, 1]} : vector<8x384xf32> to vector<8x16xf32>
    %200 = vector.extract_strided_slice %34 {offsets = [96, 0], sizes = [16, 8], strides = [1, 1]} : vector<128x8xf32> to vector<16x8xf32>
    %201 = vector.extract_strided_slice %29 {offsets = [0, 352], sizes = [8, 16], strides = [1, 1]} : vector<8x384xf32> to vector<8x16xf32>
    %202 = arith.truncf %199 : vector<8x16xf32> to vector<8x16xbf16>
    %203 = arith.truncf %200 : vector<16x8xf32> to vector<16x8xbf16>
    %cst_60 = arith.constant dense<0.000000e+00> : vector<8x8xf32>
    %204 = tpu.matmul %202, %203, %cst_60 {dimension_numbers = #tpu.dot_dimension_numbers<[1], [0], [0], [1], [0, 0, 1, 1], [], []>} : vector<8x16xbf16>, vector<16x8xbf16>, vector<8x8xf32> -> vector<8x8xf32>
    %cst_61 = arith.constant 2.500000e-01 : f32
    %205 = vector.broadcast %cst_61 : f32 to vector<8x8xf32>
    %206 = arith.mulf %204, %205 : vector<8x8xf32>
    %cst_62 = arith.constant 0xFF800000 : f32
    %207 = vector.broadcast %cst_62 : f32 to vector<8x8xf32>
    %208 = arith.select %32, %206, %207 : vector<8x8xi1>, vector<8x8xf32>
    %cst_63 = arith.constant dense<0xFF800000> : vector<8xf32>
    %209 = vector.multi_reduction <maximumf>, %208, %cst_63 [1] : vector<8x8xf32> to vector<8xf32>
    %210 = vector.shape_cast %209 : vector<8xf32> to vector<8x1xf32>
    %211 = vector.broadcast %210 : vector<8x1xf32> to vector<8x8xf32>
    %212 = arith.subf %208, %211 : vector<8x8xf32>
    %213 = math.exp %212 : vector<8x8xf32>
    %cst_64 = arith.constant dense<0.000000e+00> : vector<8xf32>
    %214 = vector.multi_reduction <add>, %213, %cst_64 [1] : vector<8x8xf32> to vector<8xf32>
    %215 = vector.shape_cast %214 : vector<8xf32> to vector<8x1xf32>
    %216 = tpu.reciprocal %215 {approx = true} : vector<8x1xf32> -> vector<8x1xf32>
    %217 = vector.broadcast %216 : vector<8x1xf32> to vector<8x8xf32>
    %218 = arith.mulf %213, %217 : vector<8x8xf32>
    %219 = arith.truncf %218 : vector<8x8xf32> to vector<8x8xbf16>
    %220 = arith.truncf %201 : vector<8x16xf32> to vector<8x16xbf16>
    %cst_65 = arith.constant dense<0.000000e+00> : vector<8x16xf32>
    %221 = tpu.matmul %219, %220, %cst_65 {dimension_numbers = #tpu.dot_dimension_numbers<[1], [0], [0], [1], [0, 0, 1, 1], [], []>} : vector<8x8xbf16>, vector<8x16xbf16>, vector<8x16xf32> -> vector<8x16xf32>
    %222 = arith.truncf %221 : vector<8x16xf32> to vector<8x16xbf16>
    %223 = vector.extract_strided_slice %35 {offsets = [96, 0], sizes = [16, 128], strides = [1, 1]} : vector<128x128xbf16> to vector<16x128xbf16>
    %cst_66 = arith.constant dense<0.000000e+00> : vector<8x128xf32>
    %224 = tpu.matmul %222, %223, %cst_66 {dimension_numbers = #tpu.dot_dimension_numbers<[1], [0], [0], [1], [0, 0, 1, 1], [], []>} : vector<8x16xbf16>, vector<16x128xbf16>, vector<8x128xf32> -> vector<8x128xf32>
    %225 = arith.addf %198, %224 : vector<8x128xf32>
    %226 = vector.extract_strided_slice %29 {offsets = [0, 112], sizes = [8, 16], strides = [1, 1]} : vector<8x384xf32> to vector<8x16xf32>
    %227 = vector.extract_strided_slice %34 {offsets = [112, 0], sizes = [16, 8], strides = [1, 1]} : vector<128x8xf32> to vector<16x8xf32>
    %228 = vector.extract_strided_slice %29 {offsets = [0, 368], sizes = [8, 16], strides = [1, 1]} : vector<8x384xf32> to vector<8x16xf32>
    %229 = arith.truncf %226 : vector<8x16xf32> to vector<8x16xbf16>
    %230 = arith.truncf %227 : vector<16x8xf32> to vector<16x8xbf16>
    %cst_67 = arith.constant dense<0.000000e+00> : vector<8x8xf32>
    %231 = tpu.matmul %229, %230, %cst_67 {dimension_numbers = #tpu.dot_dimension_numbers<[1], [0], [0], [1], [0, 0, 1, 1], [], []>} : vector<8x16xbf16>, vector<16x8xbf16>, vector<8x8xf32> -> vector<8x8xf32>
    %cst_68 = arith.constant 2.500000e-01 : f32
    %232 = vector.broadcast %cst_68 : f32 to vector<8x8xf32>
    %233 = arith.mulf %231, %232 : vector<8x8xf32>
    %cst_69 = arith.constant 0xFF800000 : f32
    %234 = vector.broadcast %cst_69 : f32 to vector<8x8xf32>
    %235 = arith.select %32, %233, %234 : vector<8x8xi1>, vector<8x8xf32>
    %cst_70 = arith.constant dense<0xFF800000> : vector<8xf32>
    %236 = vector.multi_reduction <maximumf>, %235, %cst_70 [1] : vector<8x8xf32> to vector<8xf32>
    %237 = vector.shape_cast %236 : vector<8xf32> to vector<8x1xf32>
    %238 = vector.broadcast %237 : vector<8x1xf32> to vector<8x8xf32>
    %239 = arith.subf %235, %238 : vector<8x8xf32>
    %240 = math.exp %239 : vector<8x8xf32>
    %cst_71 = arith.constant dense<0.000000e+00> : vector<8xf32>
    %241 = vector.multi_reduction <add>, %240, %cst_71 [1] : vector<8x8xf32> to vector<8xf32>
    %242 = vector.shape_cast %241 : vector<8xf32> to vector<8x1xf32>
    %243 = tpu.reciprocal %242 {approx = true} : vector<8x1xf32> -> vector<8x1xf32>
    %244 = vector.broadcast %243 : vector<8x1xf32> to vector<8x8xf32>
    %245 = arith.mulf %240, %244 : vector<8x8xf32>
    %246 = arith.truncf %245 : vector<8x8xf32> to vector<8x8xbf16>
    %247 = arith.truncf %228 : vector<8x16xf32> to vector<8x16xbf16>
    %cst_72 = arith.constant dense<0.000000e+00> : vector<8x16xf32>
    %248 = tpu.matmul %246, %247, %cst_72 {dimension_numbers = #tpu.dot_dimension_numbers<[1], [0], [0], [1], [0, 0, 1, 1], [], []>} : vector<8x8xbf16>, vector<8x16xbf16>, vector<8x16xf32> -> vector<8x16xf32>
    %249 = arith.truncf %248 : vector<8x16xf32> to vector<8x16xbf16>
    %250 = vector.extract_strided_slice %35 {offsets = [112, 0], sizes = [16, 128], strides = [1, 1]} : vector<128x128xbf16> to vector<16x128xbf16>
    %cst_73 = arith.constant dense<0.000000e+00> : vector<8x128xf32>
    %251 = tpu.matmul %249, %250, %cst_73 {dimension_numbers = #tpu.dot_dimension_numbers<[1], [0], [0], [1], [0, 0, 1, 1], [], []>} : vector<8x16xbf16>, vector<16x128xbf16>, vector<8x128xf32> -> vector<8x128xf32>
    %252 = arith.addf %225, %251 : vector<8x128xf32>
    %253 = arith.addf %1, %252 : vector<8x128xf32>
    %c0_74 = arith.constant 0 : index
    %c0_75 = arith.constant 0 : index
    %254 = vector.load %arg5[%c0_74, %c0_75] : memref<1x128xf32, #tpu.memory_space<vmem>>, vector<1x128xf32>
    %255 = vector.broadcast %254 : vector<1x128xf32> to vector<8x128xf32>
    %256 = arith.addf %253, %255 : vector<8x128xf32>
    %c0_76 = arith.constant 0 : index
    %c0_77 = arith.constant 0 : index
    %c0_78 = arith.constant 0 : index
    %257 = vector.load %arg8[%c0_76, %c0_77, %c0_78] : memref<1x8x128xf32, #tpu.memory_space<vmem>>, vector<1x8x128xf32>
    %258 = vector.shape_cast %257 : vector<1x8x128xf32> to vector<8x128xf32>
    %259 = vector.shape_cast %256 : vector<8x128xf32> to vector<1x8x128xf32>
    tpu.vector_store %arg8[%c0_76, %c0_77, %c0_78], %259 {strides = array<i32>} : memref<1x8x128xf32, #tpu.memory_space<vmem>>, vector<1x8x128xf32>,
    return
  }
  func.func @transform_0(%arg0: i32) -> (i32, i32, i32) {
    %c0_i32 = arith.constant 0 : i32
    %c0_i32_0 = arith.constant 0 : i32
    %c0_i32_1 = arith.constant 0 : i32
    return %arg0, %c0_i32, %c0_i32_0 : i32, i32, i32
  }
  func.func @transform_1(%arg0: i32) -> (i32, i32) {
    %c0_i32 = arith.constant 0 : i32
    %c0_i32_0 = arith.constant 0 : i32
    %c0_i32_1 = arith.constant 0 : i32
    return %c0_i32, %c0_i32_0 : i32, i32
  }
  func.func @transform_2(%arg0: i32) -> (i32, i32) {
    %c0_i32 = arith.constant 0 : i32
    %c0_i32_0 = arith.constant 0 : i32
    %c0_i32_1 = arith.constant 0 : i32
    return %c0_i32, %c0_i32_0 : i32, i32
  }
  func.func @transform_3(%arg0: i32) -> (i32, i32) {
    %c0_i32 = arith.constant 0 : i32
    %c0_i32_0 = arith.constant 0 : i32
    %c0_i32_1 = arith.constant 0 : i32
    return %c0_i32, %c0_i32_0 : i32, i32
  }
  func.func @transform_4(%arg0: i32) -> (i32, i32) {
    %c0_i32 = arith.constant 0 : i32
    %c0_i32_0 = arith.constant 0 : i32
    %c0_i32_1 = arith.constant 0 : i32
    return %c0_i32, %c0_i32_0 : i32, i32
  }
  func.func @transform_5(%arg0: i32) -> (i32, i32) {
    %c0_i32 = arith.constant 0 : i32
    %c0_i32_0 = arith.constant 0 : i32
    %c0_i32_1 = arith.constant 0 : i32
    return %c0_i32, %c0_i32_0 : i32, i32
  }
  func.func @transform_6(%arg0: i32) -> (i32, i32) {
    %c0_i32 = arith.constant 0 : i32
    %c0_i32_0 = arith.constant 0 : i32
    %c0_i32_1 = arith.constant 0 : i32
    return %c0_i32, %c0_i32_0 : i32, i32
  }
  func.func @transform_7(%arg0: i32) -> (i32, i32, i32) {
    %c0_i32 = arith.constant 0 : i32
    %c0_i32_0 = arith.constant 0 : i32
    %c0_i32_1 = arith.constant 0 : i32
    return %arg0, %c0_i32, %c0_i32_0 : i32, i32, i32
  }
}

module attributes {stable_mosaic.version = 11 : i64} {
  func.func @_ffn_block_kernel(%arg0: i32, %arg1: memref<16x128xf32, #tpu.memory_space<vmem>>, %arg2: memref<128x2048xbf16, #tpu.memory_space<vmem>>, %arg3: memref<1x2048xf32, #tpu.memory_space<vmem>>, %arg4: memref<2048x128xbf16, #tpu.memory_space<vmem>>, %arg5: memref<1x128xf32, #tpu.memory_space<vmem>>, %arg6: memref<1x128xf32, #tpu.memory_space<vmem>>, %arg7: memref<1x128xf32, #tpu.memory_space<vmem>>, %arg8: memref<16x128xf32, #tpu.memory_space<vmem>>) attributes {dimension_semantics = [#tpu.dimension_semantics<parallel>], iteration_bounds = array<i64: 1>, scalar_prefetch = 0 : i64, scratch_operands = 0 : i64, tpu.core_type = #tpu.core_type<tc>, window_params = [{transform_indices = @transform_0, window_bounds = array<i64: 16, 128>}, {pipeline_mode = #tpu.pipeline_mode<synchronous>, transform_indices = @transform_1, window_bounds = array<i64: 128, 2048>}, {pipeline_mode = #tpu.pipeline_mode<synchronous>, transform_indices = @transform_2, window_bounds = array<i64: 1, 2048>}, {pipeline_mode = #tpu.pipeline_mode<synchronous>, transform_indices = @transform_3, window_bounds = array<i64: 2048, 128>}, {pipeline_mode = #tpu.pipeline_mode<synchronous>, transform_indices = @transform_4, window_bounds = array<i64: 1, 128>}, {pipeline_mode = #tpu.pipeline_mode<synchronous>, transform_indices = @transform_5, window_bounds = array<i64: 1, 128>}, {pipeline_mode = #tpu.pipeline_mode<synchronous>, transform_indices = @transform_6, window_bounds = array<i64: 1, 128>}, {transform_indices = @transform_7, window_bounds = array<i64: 16, 128>}]} {
    %c0 = arith.constant 0 : index
    %c0_0 = arith.constant 0 : index
    %0 = vector.load %arg1[%c0, %c0_0] : memref<16x128xf32, #tpu.memory_space<vmem>>, vector<16x128xf32>
    %c0_1 = arith.constant 0 : index
    %c0_2 = arith.constant 0 : index
    %1 = vector.load %arg6[%c0_1, %c0_2] : memref<1x128xf32, #tpu.memory_space<vmem>>, vector<1x128xf32>
    %c0_3 = arith.constant 0 : index
    %c0_4 = arith.constant 0 : index
    %2 = vector.load %arg7[%c0_3, %c0_4] : memref<1x128xf32, #tpu.memory_space<vmem>>, vector<1x128xf32>
    %cst = arith.constant dense<0.000000e+00> : vector<16xf32>
    %3 = vector.multi_reduction <add>, %0, %cst [1] : vector<16x128xf32> to vector<16xf32>
    %4 = vector.shape_cast %3 : vector<16xf32> to vector<16x1xf32>
    %cst_5 = arith.constant 1.280000e+02 : f32
    %5 = vector.broadcast %cst_5 : f32 to vector<16x1xf32>
    %6 = arith.divf %4, %5 : vector<16x1xf32>
    %7 = vector.broadcast %6 : vector<16x1xf32> to vector<16x128xf32>
    %8 = arith.subf %0, %7 : vector<16x128xf32>
    %9 = arith.mulf %8, %8 : vector<16x128xf32>
    %cst_6 = arith.constant dense<0.000000e+00> : vector<16xf32>
    %10 = vector.multi_reduction <add>, %9, %cst_6 [1] : vector<16x128xf32> to vector<16xf32>
    %11 = vector.shape_cast %10 : vector<16xf32> to vector<16x1xf32>
    %cst_7 = arith.constant 1.280000e+02 : f32
    %12 = vector.broadcast %cst_7 : f32 to vector<16x1xf32>
    %13 = arith.divf %11, %12 : vector<16x1xf32>
    %cst_8 = arith.constant 9.99999974E-6 : f32
    %14 = vector.broadcast %cst_8 : f32 to vector<16x1xf32>
    %15 = arith.addf %13, %14 : vector<16x1xf32>
    %16 = math.rsqrt %15 : vector<16x1xf32>
    %17 = vector.broadcast %16 : vector<16x1xf32> to vector<16x128xf32>
    %18 = arith.mulf %8, %17 : vector<16x128xf32>
    %19 = vector.broadcast %1 : vector<1x128xf32> to vector<16x128xf32>
    %20 = arith.mulf %18, %19 : vector<16x128xf32>
    %21 = vector.broadcast %2 : vector<1x128xf32> to vector<16x128xf32>
    %22 = arith.addf %20, %21 : vector<16x128xf32>
    %23 = arith.truncf %22 : vector<16x128xf32> to vector<16x128xbf16>
    %c0_9 = arith.constant 0 : index
    %c0_10 = arith.constant 0 : index
    %24 = vector.load %arg2[%c0_9, %c0_10] : memref<128x2048xbf16, #tpu.memory_space<vmem>>, vector<128x2048xbf16>
    %cst_11 = arith.constant dense<0.000000e+00> : vector<16x2048xf32>
    %25 = tpu.matmul %23, %24, %cst_11 {dimension_numbers = #tpu.dot_dimension_numbers<[1], [0], [0], [1], [0, 0, 1, 1], [], []>} : vector<16x128xbf16>, vector<128x2048xbf16>, vector<16x2048xf32> -> vector<16x2048xf32>
    %c0_12 = arith.constant 0 : index
    %c0_13 = arith.constant 0 : index
    %26 = vector.load %arg3[%c0_12, %c0_13] : memref<1x2048xf32, #tpu.memory_space<vmem>>, vector<1x2048xf32>
    %27 = vector.broadcast %26 : vector<1x2048xf32> to vector<16x2048xf32>
    %28 = arith.addf %25, %27 : vector<16x2048xf32>
    %cst_14 = arith.constant 0.000000e+00 : f32
    %29 = vector.broadcast %cst_14 : f32 to vector<16x2048xf32>
    %30 = arith.maximumf %28, %29 : vector<16x2048xf32>
    %31 = arith.truncf %30 : vector<16x2048xf32> to vector<16x2048xbf16>
    %c0_15 = arith.constant 0 : index
    %c0_16 = arith.constant 0 : index
    %32 = vector.load %arg4[%c0_15, %c0_16] : memref<2048x128xbf16, #tpu.memory_space<vmem>>, vector<2048x128xbf16>
    %cst_17 = arith.constant dense<0.000000e+00> : vector<16x128xf32>
    %33 = tpu.matmul %31, %32, %cst_17 {dimension_numbers = #tpu.dot_dimension_numbers<[1], [0], [0], [1], [0, 0, 1, 1], [], []>} : vector<16x2048xbf16>, vector<2048x128xbf16>, vector<16x128xf32> -> vector<16x128xf32>
    %c0_18 = arith.constant 0 : index
    %c0_19 = arith.constant 0 : index
    %34 = vector.load %arg5[%c0_18, %c0_19] : memref<1x128xf32, #tpu.memory_space<vmem>>, vector<1x128xf32>
    %35 = vector.broadcast %34 : vector<1x128xf32> to vector<16x128xf32>
    %36 = arith.addf %33, %35 : vector<16x128xf32>
    %37 = arith.addf %0, %36 : vector<16x128xf32>
    %c0_20 = arith.constant 0 : index
    %c0_21 = arith.constant 0 : index
    %38 = vector.load %arg8[%c0_20, %c0_21] : memref<16x128xf32, #tpu.memory_space<vmem>>, vector<16x128xf32>
    tpu.vector_store %arg8[%c0_20, %c0_21], %37 {strides = array<i32>} : memref<16x128xf32, #tpu.memory_space<vmem>>, vector<16x128xf32>,
    return
  }
  func.func @transform_0(%arg0: i32) -> (i32, i32) {
    %c0_i32 = arith.constant 0 : i32
    %c0_i32_0 = arith.constant 0 : i32
    return %arg0, %c0_i32 : i32, i32
  }
  func.func @transform_1(%arg0: i32) -> (i32, i32) {
    %c0_i32 = arith.constant 0 : i32
    %c0_i32_0 = arith.constant 0 : i32
    %c0_i32_1 = arith.constant 0 : i32
    return %c0_i32, %c0_i32_0 : i32, i32
  }
  func.func @transform_2(%arg0: i32) -> (i32, i32) {
    %c0_i32 = arith.constant 0 : i32
    %c0_i32_0 = arith.constant 0 : i32
    %c0_i32_1 = arith.constant 0 : i32
    return %c0_i32, %c0_i32_0 : i32, i32
  }
  func.func @transform_3(%arg0: i32) -> (i32, i32) {
    %c0_i32 = arith.constant 0 : i32
    %c0_i32_0 = arith.constant 0 : i32
    %c0_i32_1 = arith.constant 0 : i32
    return %c0_i32, %c0_i32_0 : i32, i32
  }
  func.func @transform_4(%arg0: i32) -> (i32, i32) {
    %c0_i32 = arith.constant 0 : i32
    %c0_i32_0 = arith.constant 0 : i32
    %c0_i32_1 = arith.constant 0 : i32
    return %c0_i32, %c0_i32_0 : i32, i32
  }
  func.func @transform_5(%arg0: i32) -> (i32, i32) {
    %c0_i32 = arith.constant 0 : i32
    %c0_i32_0 = arith.constant 0 : i32
    %c0_i32_1 = arith.constant 0 : i32
    return %c0_i32, %c0_i32_0 : i32, i32
  }
  func.func @transform_6(%arg0: i32) -> (i32, i32) {
    %c0_i32 = arith.constant 0 : i32
    %c0_i32_0 = arith.constant 0 : i32
    %c0_i32_1 = arith.constant 0 : i32
    return %c0_i32, %c0_i32_0 : i32, i32
  }
  func.func @transform_7(%arg0: i32) -> (i32, i32) {
    %c0_i32 = arith.constant 0 : i32
    %c0_i32_0 = arith.constant 0 : i32
    return %arg0, %c0_i32 : i32, i32
  }
}

module attributes {stable_mosaic.version = 11 : i64} {
  func.func @_attn_block_kernel(%arg0: i32, %arg1: memref<1x8x128xf32, #tpu.memory_space<vmem>>, %arg2: memref<128x384xbf16, #tpu.memory_space<vmem>>, %arg3: memref<1x384xf32, #tpu.memory_space<vmem>>, %arg4: memref<128x128xbf16, #tpu.memory_space<vmem>>, %arg5: memref<1x128xf32, #tpu.memory_space<vmem>>, %arg6: memref<1x128xf32, #tpu.memory_space<vmem>>, %arg7: memref<1x128xf32, #tpu.memory_space<vmem>>, %arg8: memref<1x8x128xf32, #tpu.memory_space<vmem>>) attributes {dimension_semantics = [#tpu.dimension_semantics<parallel>], iteration_bounds = array<i64: 2>, scalar_prefetch = 0 : i64, scratch_operands = 0 : i64, tpu.core_type = #tpu.core_type<tc>, window_params = [{transform_indices = @transform_0, window_bounds = array<i64: 1, 8, 128>}, {pipeline_mode = #tpu.pipeline_mode<synchronous>, transform_indices = @transform_1, window_bounds = array<i64: 128, 384>}, {pipeline_mode = #tpu.pipeline_mode<synchronous>, transform_indices = @transform_2, window_bounds = array<i64: 1, 384>}, {pipeline_mode = #tpu.pipeline_mode<synchronous>, transform_indices = @transform_3, window_bounds = array<i64: 128, 128>}, {pipeline_mode = #tpu.pipeline_mode<synchronous>, transform_indices = @transform_4, window_bounds = array<i64: 1, 128>}, {pipeline_mode = #tpu.pipeline_mode<synchronous>, transform_indices = @transform_5, window_bounds = array<i64: 1, 128>}, {pipeline_mode = #tpu.pipeline_mode<synchronous>, transform_indices = @transform_6, window_bounds = array<i64: 1, 128>}, {transform_indices = @transform_7, window_bounds = array<i64: 1, 8, 128>}]} {
    %c0 = arith.constant 0 : index
    %c0_0 = arith.constant 0 : index
    %c0_1 = arith.constant 0 : index
    %0 = vector.load %arg1[%c0, %c0_0, %c0_1] : memref<1x8x128xf32, #tpu.memory_space<vmem>>, vector<1x8x128xf32>
    %1 = vector.shape_cast %0 : vector<1x8x128xf32> to vector<8x128xf32>
    %c0_2 = arith.constant 0 : index
    %c0_3 = arith.constant 0 : index
    %2 = vector.load %arg6[%c0_2, %c0_3] : memref<1x128xf32, #tpu.memory_space<vmem>>, vector<1x128xf32>
    %c0_4 = arith.constant 0 : index
    %c0_5 = arith.constant 0 : index
    %3 = vector.load %arg7[%c0_4, %c0_5] : memref<1x128xf32, #tpu.memory_space<vmem>>, vector<1x128xf32>
    %cst = arith.constant dense<0.000000e+00> : vector<8xf32>
    %4 = vector.multi_reduction <add>, %1, %cst [1] : vector<8x128xf32> to vector<8xf32>
    %5 = vector.shape_cast %4 : vector<8xf32> to vector<8x1xf32>
    %cst_6 = arith.constant 1.280000e+02 : f32
    %6 = vector.broadcast %cst_6 : f32 to vector<8x1xf32>
    %7 = arith.divf %5, %6 : vector<8x1xf32>
    %8 = vector.broadcast %7 : vector<8x1xf32> to vector<8x128xf32>
    %9 = arith.subf %1, %8 : vector<8x128xf32>
    %10 = arith.mulf %9, %9 : vector<8x128xf32>
    %cst_7 = arith.constant dense<0.000000e+00> : vector<8xf32>
    %11 = vector.multi_reduction <add>, %10, %cst_7 [1] : vector<8x128xf32> to vector<8xf32>
    %12 = vector.shape_cast %11 : vector<8xf32> to vector<8x1xf32>
    %cst_8 = arith.constant 1.280000e+02 : f32
    %13 = vector.broadcast %cst_8 : f32 to vector<8x1xf32>
    %14 = arith.divf %12, %13 : vector<8x1xf32>
    %cst_9 = arith.constant 9.99999974E-6 : f32
    %15 = vector.broadcast %cst_9 : f32 to vector<8x1xf32>
    %16 = arith.addf %14, %15 : vector<8x1xf32>
    %17 = math.rsqrt %16 : vector<8x1xf32>
    %18 = vector.broadcast %17 : vector<8x1xf32> to vector<8x128xf32>
    %19 = arith.mulf %9, %18 : vector<8x128xf32>
    %20 = vector.broadcast %2 : vector<1x128xf32> to vector<8x128xf32>
    %21 = arith.mulf %19, %20 : vector<8x128xf32>
    %22 = vector.broadcast %3 : vector<1x128xf32> to vector<8x128xf32>
    %23 = arith.addf %21, %22 : vector<8x128xf32>
    %24 = arith.truncf %23 : vector<8x128xf32> to vector<8x128xbf16>
    %c0_10 = arith.constant 0 : index
    %c0_11 = arith.constant 0 : index
    %25 = vector.load %arg2[%c0_10, %c0_11] : memref<128x384xbf16, #tpu.memory_space<vmem>>, vector<128x384xbf16>
    %cst_12 = arith.constant dense<0.000000e+00> : vector<8x384xf32>
    %26 = tpu.matmul %24, %25, %cst_12 {dimension_numbers = #tpu.dot_dimension_numbers<[1], [0], [0], [1], [0, 0, 1, 1], [], []>} : vector<8x128xbf16>, vector<128x384xbf16>, vector<8x384xf32> -> vector<8x384xf32>
    %c0_13 = arith.constant 0 : index
    %c0_14 = arith.constant 0 : index
    %27 = vector.load %arg3[%c0_13, %c0_14] : memref<1x384xf32, #tpu.memory_space<vmem>>, vector<1x384xf32>
    %28 = vector.broadcast %27 : vector<1x384xf32> to vector<8x384xf32>
    %29 = arith.addf %26, %28 : vector<8x384xf32>
    %30 = tpu.iota {dimensions = array<i32: 0>} : vector<8x8xi32>
    %31 = tpu.iota {dimensions = array<i32: 1>} : vector<8x8xi32>
    %32 = arith.cmpi sle, %31, %30 : vector<8x8xi32>
    %33 = vector.extract_strided_slice %29 {offsets = [0, 128], sizes = [8, 128], strides = [1, 1]} : vector<8x384xf32> to vector<8x128xf32>
    %34 = tpu.transpose %33, [1, 0] : vector<8x128xf32> -> vector<128x8xf32>
    %c0_15 = arith.constant 0 : index
    %c0_16 = arith.constant 0 : index
    %35 = vector.load %arg4[%c0_15, %c0_16] : memref<128x128xbf16, #tpu.memory_space<vmem>>, vector<128x128xbf16>
    %cst_17 = arith.constant 0.000000e+00 : f32
    %36 = vector.broadcast %cst_17 : f32 to vector<8x128xf32>
    %37 = vector.extract_strided_slice %29 {offsets = [0, 0], sizes = [8, 16], strides = [1, 1]} : vector<8x384xf32> to vector<8x16xf32>
    %38 = vector.extract_strided_slice %34 {offsets = [0, 0], sizes = [16, 8], strides = [1, 1]} : vector<128x8xf32> to vector<16x8xf32>
    %39 = vector.extract_strided_slice %29 {offsets = [0, 256], sizes = [8, 16], strides = [1, 1]} : vector<8x384xf32> to vector<8x16xf32>
    %40 = arith.truncf %37 : vector<8x16xf32> to vector<8x16xbf16>
    %41 = arith.truncf %38 : vector<16x8xf32> to vector<16x8xbf16>
    %cst_18 = arith.constant dense<0.000000e+00> : vector<8x8xf32>
    %42 = tpu.matmul %40, %41, %cst_18 {dimension_numbers = #tpu.dot_dimension_numbers<[1], [0], [0], [1], [0, 0, 1, 1], [], []>} : vector<8x16xbf16>, vector<16x8xbf16>, vector<8x8xf32> -> vector<8x8xf32>
    %cst_19 = arith.constant 2.500000e-01 : f32
    %43 = vector.broadcast %cst_19 : f32 to vector<8x8xf32>
    %44 = arith.mulf %42, %43 : vector<8x8xf32>
    %cst_20 = arith.constant 0xFF800000 : f32
    %45 = vector.broadcast %cst_20 : f32 to vector<8x8xf32>
    %46 = arith.select %32, %44, %45 : vector<8x8xi1>, vector<8x8xf32>
    %cst_21 = arith.constant dense<0xFF800000> : vector<8xf32>
    %47 = vector.multi_reduction <maximumf>, %46, %cst_21 [1] : vector<8x8xf32> to vector<8xf32>
    %48 = vector.shape_cast %47 : vector<8xf32> to vector<8x1xf32>
    %49 = vector.broadcast %48 : vector<8x1xf32> to vector<8x8xf32>
    %50 = arith.subf %46, %49 : vector<8x8xf32>
    %51 = math.exp %50 : vector<8x8xf32>
    %cst_22 = arith.constant dense<0.000000e+00> : vector<8xf32>
    %52 = vector.multi_reduction <add>, %51, %cst_22 [1] : vector<8x8xf32> to vector<8xf32>
    %53 = vector.shape_cast %52 : vector<8xf32> to vector<8x1xf32>
    %54 = tpu.reciprocal %53 {approx = true} : vector<8x1xf32> -> vector<8x1xf32>
    %55 = vector.broadcast %54 : vector<8x1xf32> to vector<8x8xf32>
    %56 = arith.mulf %51, %55 : vector<8x8xf32>
    %57 = arith.truncf %56 : vector<8x8xf32> to vector<8x8xbf16>
    %58 = arith.truncf %39 : vector<8x16xf32> to vector<8x16xbf16>
    %cst_23 = arith.constant dense<0.000000e+00> : vector<8x16xf32>
    %59 = tpu.matmul %57, %58, %cst_23 {dimension_numbers = #tpu.dot_dimension_numbers<[1], [0], [0], [1], [0, 0, 1, 1], [], []>} : vector<8x8xbf16>, vector<8x16xbf16>, vector<8x16xf32> -> vector<8x16xf32>
    %60 = arith.truncf %59 : vector<8x16xf32> to vector<8x16xbf16>
    %61 = vector.extract_strided_slice %35 {offsets = [0, 0], sizes = [16, 128], strides = [1, 1]} : vector<128x128xbf16> to vector<16x128xbf16>
    %cst_24 = arith.constant dense<0.000000e+00> : vector<8x128xf32>
    %62 = tpu.matmul %60, %61, %cst_24 {dimension_numbers = #tpu.dot_dimension_numbers<[1], [0], [0], [1], [0, 0, 1, 1], [], []>} : vector<8x16xbf16>, vector<16x128xbf16>, vector<8x128xf32> -> vector<8x128xf32>
    %63 = arith.addf %36, %62 : vector<8x128xf32>
    %64 = vector.extract_strided_slice %29 {offsets = [0, 16], sizes = [8, 16], strides = [1, 1]} : vector<8x384xf32> to vector<8x16xf32>
    %65 = vector.extract_strided_slice %34 {offsets = [16, 0], sizes = [16, 8], strides = [1, 1]} : vector<128x8xf32> to vector<16x8xf32>
    %66 = vector.extract_strided_slice %29 {offsets = [0, 272], sizes = [8, 16], strides = [1, 1]} : vector<8x384xf32> to vector<8x16xf32>
    %67 = arith.truncf %64 : vector<8x16xf32> to vector<8x16xbf16>
    %68 = arith.truncf %65 : vector<16x8xf32> to vector<16x8xbf16>
    %cst_25 = arith.constant dense<0.000000e+00> : vector<8x8xf32>
    %69 = tpu.matmul %67, %68, %cst_25 {dimension_numbers = #tpu.dot_dimension_numbers<[1], [0], [0], [1], [0, 0, 1, 1], [], []>} : vector<8x16xbf16>, vector<16x8xbf16>, vector<8x8xf32> -> vector<8x8xf32>
    %cst_26 = arith.constant 2.500000e-01 : f32
    %70 = vector.broadcast %cst_26 : f32 to vector<8x8xf32>
    %71 = arith.mulf %69, %70 : vector<8x8xf32>
    %cst_27 = arith.constant 0xFF800000 : f32
    %72 = vector.broadcast %cst_27 : f32 to vector<8x8xf32>
    %73 = arith.select %32, %71, %72 : vector<8x8xi1>, vector<8x8xf32>
    %cst_28 = arith.constant dense<0xFF800000> : vector<8xf32>
    %74 = vector.multi_reduction <maximumf>, %73, %cst_28 [1] : vector<8x8xf32> to vector<8xf32>
    %75 = vector.shape_cast %74 : vector<8xf32> to vector<8x1xf32>
    %76 = vector.broadcast %75 : vector<8x1xf32> to vector<8x8xf32>
    %77 = arith.subf %73, %76 : vector<8x8xf32>
    %78 = math.exp %77 : vector<8x8xf32>
    %cst_29 = arith.constant dense<0.000000e+00> : vector<8xf32>
    %79 = vector.multi_reduction <add>, %78, %cst_29 [1] : vector<8x8xf32> to vector<8xf32>
    %80 = vector.shape_cast %79 : vector<8xf32> to vector<8x1xf32>
    %81 = tpu.reciprocal %80 {approx = true} : vector<8x1xf32> -> vector<8x1xf32>
    %82 = vector.broadcast %81 : vector<8x1xf32> to vector<8x8xf32>
    %83 = arith.mulf %78, %82 : vector<8x8xf32>
    %84 = arith.truncf %83 : vector<8x8xf32> to vector<8x8xbf16>
    %85 = arith.truncf %66 : vector<8x16xf32> to vector<8x16xbf16>
    %cst_30 = arith.constant dense<0.000000e+00> : vector<8x16xf32>
    %86 = tpu.matmul %84, %85, %cst_30 {dimension_numbers = #tpu.dot_dimension_numbers<[1], [0], [0], [1], [0, 0, 1, 1], [], []>} : vector<8x8xbf16>, vector<8x16xbf16>, vector<8x16xf32> -> vector<8x16xf32>
    %87 = arith.truncf %86 : vector<8x16xf32> to vector<8x16xbf16>
    %88 = vector.extract_strided_slice %35 {offsets = [16, 0], sizes = [16, 128], strides = [1, 1]} : vector<128x128xbf16> to vector<16x128xbf16>
    %cst_31 = arith.constant dense<0.000000e+00> : vector<8x128xf32>
    %89 = tpu.matmul %87, %88, %cst_31 {dimension_numbers = #tpu.dot_dimension_numbers<[1], [0], [0], [1], [0, 0, 1, 1], [], []>} : vector<8x16xbf16>, vector<16x128xbf16>, vector<8x128xf32> -> vector<8x128xf32>
    %90 = arith.addf %63, %89 : vector<8x128xf32>
    %91 = vector.extract_strided_slice %29 {offsets = [0, 32], sizes = [8, 16], strides = [1, 1]} : vector<8x384xf32> to vector<8x16xf32>
    %92 = vector.extract_strided_slice %34 {offsets = [32, 0], sizes = [16, 8], strides = [1, 1]} : vector<128x8xf32> to vector<16x8xf32>
    %93 = vector.extract_strided_slice %29 {offsets = [0, 288], sizes = [8, 16], strides = [1, 1]} : vector<8x384xf32> to vector<8x16xf32>
    %94 = arith.truncf %91 : vector<8x16xf32> to vector<8x16xbf16>
    %95 = arith.truncf %92 : vector<16x8xf32> to vector<16x8xbf16>
    %cst_32 = arith.constant dense<0.000000e+00> : vector<8x8xf32>
    %96 = tpu.matmul %94, %95, %cst_32 {dimension_numbers = #tpu.dot_dimension_numbers<[1], [0], [0], [1], [0, 0, 1, 1], [], []>} : vector<8x16xbf16>, vector<16x8xbf16>, vector<8x8xf32> -> vector<8x8xf32>
    %cst_33 = arith.constant 2.500000e-01 : f32
    %97 = vector.broadcast %cst_33 : f32 to vector<8x8xf32>
    %98 = arith.mulf %96, %97 : vector<8x8xf32>
    %cst_34 = arith.constant 0xFF800000 : f32
    %99 = vector.broadcast %cst_34 : f32 to vector<8x8xf32>
    %100 = arith.select %32, %98, %99 : vector<8x8xi1>, vector<8x8xf32>
    %cst_35 = arith.constant dense<0xFF800000> : vector<8xf32>
    %101 = vector.multi_reduction <maximumf>, %100, %cst_35 [1] : vector<8x8xf32> to vector<8xf32>
    %102 = vector.shape_cast %101 : vector<8xf32> to vector<8x1xf32>
    %103 = vector.broadcast %102 : vector<8x1xf32> to vector<8x8xf32>
    %104 = arith.subf %100, %103 : vector<8x8xf32>
    %105 = math.exp %104 : vector<8x8xf32>
    %cst_36 = arith.constant dense<0.000000e+00> : vector<8xf32>
    %106 = vector.multi_reduction <add>, %105, %cst_36 [1] : vector<8x8xf32> to vector<8xf32>
    %107 = vector.shape_cast %106 : vector<8xf32> to vector<8x1xf32>
    %108 = tpu.reciprocal %107 {approx = true} : vector<8x1xf32> -> vector<8x1xf32>
    %109 = vector.broadcast %108 : vector<8x1xf32> to vector<8x8xf32>
    %110 = arith.mulf %105, %109 : vector<8x8xf32>
    %111 = arith.truncf %110 : vector<8x8xf32> to vector<8x8xbf16>
    %112 = arith.truncf %93 : vector<8x16xf32> to vector<8x16xbf16>
    %cst_37 = arith.constant dense<0.000000e+00> : vector<8x16xf32>
    %113 = tpu.matmul %111, %112, %cst_37 {dimension_numbers = #tpu.dot_dimension_numbers<[1], [0], [0], [1], [0, 0, 1, 1], [], []>} : vector<8x8xbf16>, vector<8x16xbf16>, vector<8x16xf32> -> vector<8x16xf32>
    %114 = arith.truncf %113 : vector<8x16xf32> to vector<8x16xbf16>
    %115 = vector.extract_strided_slice %35 {offsets = [32, 0], sizes = [16, 128], strides = [1, 1]} : vector<128x128xbf16> to vector<16x128xbf16>
    %cst_38 = arith.constant dense<0.000000e+00> : vector<8x128xf32>
    %116 = tpu.matmul %114, %115, %cst_38 {dimension_numbers = #tpu.dot_dimension_numbers<[1], [0], [0], [1], [0, 0, 1, 1], [], []>} : vector<8x16xbf16>, vector<16x128xbf16>, vector<8x128xf32> -> vector<8x128xf32>
    %117 = arith.addf %90, %116 : vector<8x128xf32>
    %118 = vector.extract_strided_slice %29 {offsets = [0, 48], sizes = [8, 16], strides = [1, 1]} : vector<8x384xf32> to vector<8x16xf32>
    %119 = vector.extract_strided_slice %34 {offsets = [48, 0], sizes = [16, 8], strides = [1, 1]} : vector<128x8xf32> to vector<16x8xf32>
    %120 = vector.extract_strided_slice %29 {offsets = [0, 304], sizes = [8, 16], strides = [1, 1]} : vector<8x384xf32> to vector<8x16xf32>
    %121 = arith.truncf %118 : vector<8x16xf32> to vector<8x16xbf16>
    %122 = arith.truncf %119 : vector<16x8xf32> to vector<16x8xbf16>
    %cst_39 = arith.constant dense<0.000000e+00> : vector<8x8xf32>
    %123 = tpu.matmul %121, %122, %cst_39 {dimension_numbers = #tpu.dot_dimension_numbers<[1], [0], [0], [1], [0, 0, 1, 1], [], []>} : vector<8x16xbf16>, vector<16x8xbf16>, vector<8x8xf32> -> vector<8x8xf32>
    %cst_40 = arith.constant 2.500000e-01 : f32
    %124 = vector.broadcast %cst_40 : f32 to vector<8x8xf32>
    %125 = arith.mulf %123, %124 : vector<8x8xf32>
    %cst_41 = arith.constant 0xFF800000 : f32
    %126 = vector.broadcast %cst_41 : f32 to vector<8x8xf32>
    %127 = arith.select %32, %125, %126 : vector<8x8xi1>, vector<8x8xf32>
    %cst_42 = arith.constant dense<0xFF800000> : vector<8xf32>
    %128 = vector.multi_reduction <maximumf>, %127, %cst_42 [1] : vector<8x8xf32> to vector<8xf32>
    %129 = vector.shape_cast %128 : vector<8xf32> to vector<8x1xf32>
    %130 = vector.broadcast %129 : vector<8x1xf32> to vector<8x8xf32>
    %131 = arith.subf %127, %130 : vector<8x8xf32>
    %132 = math.exp %131 : vector<8x8xf32>
    %cst_43 = arith.constant dense<0.000000e+00> : vector<8xf32>
    %133 = vector.multi_reduction <add>, %132, %cst_43 [1] : vector<8x8xf32> to vector<8xf32>
    %134 = vector.shape_cast %133 : vector<8xf32> to vector<8x1xf32>
    %135 = tpu.reciprocal %134 {approx = true} : vector<8x1xf32> -> vector<8x1xf32>
    %136 = vector.broadcast %135 : vector<8x1xf32> to vector<8x8xf32>
    %137 = arith.mulf %132, %136 : vector<8x8xf32>
    %138 = arith.truncf %137 : vector<8x8xf32> to vector<8x8xbf16>
    %139 = arith.truncf %120 : vector<8x16xf32> to vector<8x16xbf16>
    %cst_44 = arith.constant dense<0.000000e+00> : vector<8x16xf32>
    %140 = tpu.matmul %138, %139, %cst_44 {dimension_numbers = #tpu.dot_dimension_numbers<[1], [0], [0], [1], [0, 0, 1, 1], [], []>} : vector<8x8xbf16>, vector<8x16xbf16>, vector<8x16xf32> -> vector<8x16xf32>
    %141 = arith.truncf %140 : vector<8x16xf32> to vector<8x16xbf16>
    %142 = vector.extract_strided_slice %35 {offsets = [48, 0], sizes = [16, 128], strides = [1, 1]} : vector<128x128xbf16> to vector<16x128xbf16>
    %cst_45 = arith.constant dense<0.000000e+00> : vector<8x128xf32>
    %143 = tpu.matmul %141, %142, %cst_45 {dimension_numbers = #tpu.dot_dimension_numbers<[1], [0], [0], [1], [0, 0, 1, 1], [], []>} : vector<8x16xbf16>, vector<16x128xbf16>, vector<8x128xf32> -> vector<8x128xf32>
    %144 = arith.addf %117, %143 : vector<8x128xf32>
    %145 = vector.extract_strided_slice %29 {offsets = [0, 64], sizes = [8, 16], strides = [1, 1]} : vector<8x384xf32> to vector<8x16xf32>
    %146 = vector.extract_strided_slice %34 {offsets = [64, 0], sizes = [16, 8], strides = [1, 1]} : vector<128x8xf32> to vector<16x8xf32>
    %147 = vector.extract_strided_slice %29 {offsets = [0, 320], sizes = [8, 16], strides = [1, 1]} : vector<8x384xf32> to vector<8x16xf32>
    %148 = arith.truncf %145 : vector<8x16xf32> to vector<8x16xbf16>
    %149 = arith.truncf %146 : vector<16x8xf32> to vector<16x8xbf16>
    %cst_46 = arith.constant dense<0.000000e+00> : vector<8x8xf32>
    %150 = tpu.matmul %148, %149, %cst_46 {dimension_numbers = #tpu.dot_dimension_numbers<[1], [0], [0], [1], [0, 0, 1, 1], [], []>} : vector<8x16xbf16>, vector<16x8xbf16>, vector<8x8xf32> -> vector<8x8xf32>
    %cst_47 = arith.constant 2.500000e-01 : f32
    %151 = vector.broadcast %cst_47 : f32 to vector<8x8xf32>
    %152 = arith.mulf %150, %151 : vector<8x8xf32>
    %cst_48 = arith.constant 0xFF800000 : f32
    %153 = vector.broadcast %cst_48 : f32 to vector<8x8xf32>
    %154 = arith.select %32, %152, %153 : vector<8x8xi1>, vector<8x8xf32>
    %cst_49 = arith.constant dense<0xFF800000> : vector<8xf32>
    %155 = vector.multi_reduction <maximumf>, %154, %cst_49 [1] : vector<8x8xf32> to vector<8xf32>
    %156 = vector.shape_cast %155 : vector<8xf32> to vector<8x1xf32>
    %157 = vector.broadcast %156 : vector<8x1xf32> to vector<8x8xf32>
    %158 = arith.subf %154, %157 : vector<8x8xf32>
    %159 = math.exp %158 : vector<8x8xf32>
    %cst_50 = arith.constant dense<0.000000e+00> : vector<8xf32>
    %160 = vector.multi_reduction <add>, %159, %cst_50 [1] : vector<8x8xf32> to vector<8xf32>
    %161 = vector.shape_cast %160 : vector<8xf32> to vector<8x1xf32>
    %162 = tpu.reciprocal %161 {approx = true} : vector<8x1xf32> -> vector<8x1xf32>
    %163 = vector.broadcast %162 : vector<8x1xf32> to vector<8x8xf32>
    %164 = arith.mulf %159, %163 : vector<8x8xf32>
    %165 = arith.truncf %164 : vector<8x8xf32> to vector<8x8xbf16>
    %166 = arith.truncf %147 : vector<8x16xf32> to vector<8x16xbf16>
    %cst_51 = arith.constant dense<0.000000e+00> : vector<8x16xf32>
    %167 = tpu.matmul %165, %166, %cst_51 {dimension_numbers = #tpu.dot_dimension_numbers<[1], [0], [0], [1], [0, 0, 1, 1], [], []>} : vector<8x8xbf16>, vector<8x16xbf16>, vector<8x16xf32> -> vector<8x16xf32>
    %168 = arith.truncf %167 : vector<8x16xf32> to vector<8x16xbf16>
    %169 = vector.extract_strided_slice %35 {offsets = [64, 0], sizes = [16, 128], strides = [1, 1]} : vector<128x128xbf16> to vector<16x128xbf16>
    %cst_52 = arith.constant dense<0.000000e+00> : vector<8x128xf32>
    %170 = tpu.matmul %168, %169, %cst_52 {dimension_numbers = #tpu.dot_dimension_numbers<[1], [0], [0], [1], [0, 0, 1, 1], [], []>} : vector<8x16xbf16>, vector<16x128xbf16>, vector<8x128xf32> -> vector<8x128xf32>
    %171 = arith.addf %144, %170 : vector<8x128xf32>
    %172 = vector.extract_strided_slice %29 {offsets = [0, 80], sizes = [8, 16], strides = [1, 1]} : vector<8x384xf32> to vector<8x16xf32>
    %173 = vector.extract_strided_slice %34 {offsets = [80, 0], sizes = [16, 8], strides = [1, 1]} : vector<128x8xf32> to vector<16x8xf32>
    %174 = vector.extract_strided_slice %29 {offsets = [0, 336], sizes = [8, 16], strides = [1, 1]} : vector<8x384xf32> to vector<8x16xf32>
    %175 = arith.truncf %172 : vector<8x16xf32> to vector<8x16xbf16>
    %176 = arith.truncf %173 : vector<16x8xf32> to vector<16x8xbf16>
    %cst_53 = arith.constant dense<0.000000e+00> : vector<8x8xf32>
    %177 = tpu.matmul %175, %176, %cst_53 {dimension_numbers = #tpu.dot_dimension_numbers<[1], [0], [0], [1], [0, 0, 1, 1], [], []>} : vector<8x16xbf16>, vector<16x8xbf16>, vector<8x8xf32> -> vector<8x8xf32>
    %cst_54 = arith.constant 2.500000e-01 : f32
    %178 = vector.broadcast %cst_54 : f32 to vector<8x8xf32>
    %179 = arith.mulf %177, %178 : vector<8x8xf32>
    %cst_55 = arith.constant 0xFF800000 : f32
    %180 = vector.broadcast %cst_55 : f32 to vector<8x8xf32>
    %181 = arith.select %32, %179, %180 : vector<8x8xi1>, vector<8x8xf32>
    %cst_56 = arith.constant dense<0xFF800000> : vector<8xf32>
    %182 = vector.multi_reduction <maximumf>, %181, %cst_56 [1] : vector<8x8xf32> to vector<8xf32>
    %183 = vector.shape_cast %182 : vector<8xf32> to vector<8x1xf32>
    %184 = vector.broadcast %183 : vector<8x1xf32> to vector<8x8xf32>
    %185 = arith.subf %181, %184 : vector<8x8xf32>
    %186 = math.exp %185 : vector<8x8xf32>
    %cst_57 = arith.constant dense<0.000000e+00> : vector<8xf32>
    %187 = vector.multi_reduction <add>, %186, %cst_57 [1] : vector<8x8xf32> to vector<8xf32>
    %188 = vector.shape_cast %187 : vector<8xf32> to vector<8x1xf32>
    %189 = tpu.reciprocal %188 {approx = true} : vector<8x1xf32> -> vector<8x1xf32>
    %190 = vector.broadcast %189 : vector<8x1xf32> to vector<8x8xf32>
    %191 = arith.mulf %186, %190 : vector<8x8xf32>
    %192 = arith.truncf %191 : vector<8x8xf32> to vector<8x8xbf16>
    %193 = arith.truncf %174 : vector<8x16xf32> to vector<8x16xbf16>
    %cst_58 = arith.constant dense<0.000000e+00> : vector<8x16xf32>
    %194 = tpu.matmul %192, %193, %cst_58 {dimension_numbers = #tpu.dot_dimension_numbers<[1], [0], [0], [1], [0, 0, 1, 1], [], []>} : vector<8x8xbf16>, vector<8x16xbf16>, vector<8x16xf32> -> vector<8x16xf32>
    %195 = arith.truncf %194 : vector<8x16xf32> to vector<8x16xbf16>
    %196 = vector.extract_strided_slice %35 {offsets = [80, 0], sizes = [16, 128], strides = [1, 1]} : vector<128x128xbf16> to vector<16x128xbf16>
    %cst_59 = arith.constant dense<0.000000e+00> : vector<8x128xf32>
    %197 = tpu.matmul %195, %196, %cst_59 {dimension_numbers = #tpu.dot_dimension_numbers<[1], [0], [0], [1], [0, 0, 1, 1], [], []>} : vector<8x16xbf16>, vector<16x128xbf16>, vector<8x128xf32> -> vector<8x128xf32>
    %198 = arith.addf %171, %197 : vector<8x128xf32>
    %199 = vector.extract_strided_slice %29 {offsets = [0, 96], sizes = [8, 16], strides = [1, 1]} : vector<8x384xf32> to vector<8x16xf32>
    %200 = vector.extract_strided_slice %34 {offsets = [96, 0], sizes = [16, 8], strides = [1, 1]} : vector<128x8xf32> to vector<16x8xf32>
    %201 = vector.extract_strided_slice %29 {offsets = [0, 352], sizes = [8, 16], strides = [1, 1]} : vector<8x384xf32> to vector<8x16xf32>
    %202 = arith.truncf %199 : vector<8x16xf32> to vector<8x16xbf16>
    %203 = arith.truncf %200 : vector<16x8xf32> to vector<16x8xbf16>
    %cst_60 = arith.constant dense<0.000000e+00> : vector<8x8xf32>
    %204 = tpu.matmul %202, %203, %cst_60 {dimension_numbers = #tpu.dot_dimension_numbers<[1], [0], [0], [1], [0, 0, 1, 1], [], []>} : vector<8x16xbf16>, vector<16x8xbf16>, vector<8x8xf32> -> vector<8x8xf32>
    %cst_61 = arith.constant 2.500000e-01 : f32
    %205 = vector.broadcast %cst_61 : f32 to vector<8x8xf32>
    %206 = arith.mulf %204, %205 : vector<8x8xf32>
    %cst_62 = arith.constant 0xFF800000 : f32
    %207 = vector.broadcast %cst_62 : f32 to vector<8x8xf32>
    %208 = arith.select %32, %206, %207 : vector<8x8xi1>, vector<8x8xf32>
    %cst_63 = arith.constant dense<0xFF800000> : vector<8xf32>
    %209 = vector.multi_reduction <maximumf>, %208, %cst_63 [1] : vector<8x8xf32> to vector<8xf32>
    %210 = vector.shape_cast %209 : vector<8xf32> to vector<8x1xf32>
    %211 = vector.broadcast %210 : vector<8x1xf32> to vector<8x8xf32>
    %212 = arith.subf %208, %211 : vector<8x8xf32>
    %213 = math.exp %212 : vector<8x8xf32>
    %cst_64 = arith.constant dense<0.000000e+00> : vector<8xf32>
    %214 = vector.multi_reduction <add>, %213, %cst_64 [1] : vector<8x8xf32> to vector<8xf32>
    %215 = vector.shape_cast %214 : vector<8xf32> to vector<8x1xf32>
    %216 = tpu.reciprocal %215 {approx = true} : vector<8x1xf32> -> vector<8x1xf32>
    %217 = vector.broadcast %216 : vector<8x1xf32> to vector<8x8xf32>
    %218 = arith.mulf %213, %217 : vector<8x8xf32>
    %219 = arith.truncf %218 : vector<8x8xf32> to vector<8x8xbf16>
    %220 = arith.truncf %201 : vector<8x16xf32> to vector<8x16xbf16>
    %cst_65 = arith.constant dense<0.000000e+00> : vector<8x16xf32>
    %221 = tpu.matmul %219, %220, %cst_65 {dimension_numbers = #tpu.dot_dimension_numbers<[1], [0], [0], [1], [0, 0, 1, 1], [], []>} : vector<8x8xbf16>, vector<8x16xbf16>, vector<8x16xf32> -> vector<8x16xf32>
    %222 = arith.truncf %221 : vector<8x16xf32> to vector<8x16xbf16>
    %223 = vector.extract_strided_slice %35 {offsets = [96, 0], sizes = [16, 128], strides = [1, 1]} : vector<128x128xbf16> to vector<16x128xbf16>
    %cst_66 = arith.constant dense<0.000000e+00> : vector<8x128xf32>
    %224 = tpu.matmul %222, %223, %cst_66 {dimension_numbers = #tpu.dot_dimension_numbers<[1], [0], [0], [1], [0, 0, 1, 1], [], []>} : vector<8x16xbf16>, vector<16x128xbf16>, vector<8x128xf32> -> vector<8x128xf32>
    %225 = arith.addf %198, %224 : vector<8x128xf32>
    %226 = vector.extract_strided_slice %29 {offsets = [0, 112], sizes = [8, 16], strides = [1, 1]} : vector<8x384xf32> to vector<8x16xf32>
    %227 = vector.extract_strided_slice %34 {offsets = [112, 0], sizes = [16, 8], strides = [1, 1]} : vector<128x8xf32> to vector<16x8xf32>
    %228 = vector.extract_strided_slice %29 {offsets = [0, 368], sizes = [8, 16], strides = [1, 1]} : vector<8x384xf32> to vector<8x16xf32>
    %229 = arith.truncf %226 : vector<8x16xf32> to vector<8x16xbf16>
    %230 = arith.truncf %227 : vector<16x8xf32> to vector<16x8xbf16>
    %cst_67 = arith.constant dense<0.000000e+00> : vector<8x8xf32>
    %231 = tpu.matmul %229, %230, %cst_67 {dimension_numbers = #tpu.dot_dimension_numbers<[1], [0], [0], [1], [0, 0, 1, 1], [], []>} : vector<8x16xbf16>, vector<16x8xbf16>, vector<8x8xf32> -> vector<8x8xf32>
    %cst_68 = arith.constant 2.500000e-01 : f32
    %232 = vector.broadcast %cst_68 : f32 to vector<8x8xf32>
    %233 = arith.mulf %231, %232 : vector<8x8xf32>
    %cst_69 = arith.constant 0xFF800000 : f32
    %234 = vector.broadcast %cst_69 : f32 to vector<8x8xf32>
    %235 = arith.select %32, %233, %234 : vector<8x8xi1>, vector<8x8xf32>
    %cst_70 = arith.constant dense<0xFF800000> : vector<8xf32>
    %236 = vector.multi_reduction <maximumf>, %235, %cst_70 [1] : vector<8x8xf32> to vector<8xf32>
    %237 = vector.shape_cast %236 : vector<8xf32> to vector<8x1xf32>
    %238 = vector.broadcast %237 : vector<8x1xf32> to vector<8x8xf32>
    %239 = arith.subf %235, %238 : vector<8x8xf32>
    %240 = math.exp %239 : vector<8x8xf32>
    %cst_71 = arith.constant dense<0.000000e+00> : vector<8xf32>
    %241 = vector.multi_reduction <add>, %240, %cst_71 [1] : vector<8x8xf32> to vector<8xf32>
    %242 = vector.shape_cast %241 : vector<8xf32> to vector<8x1xf32>
    %243 = tpu.reciprocal %242 {approx = true} : vector<8x1xf32> -> vector<8x1xf32>
    %244 = vector.broadcast %243 : vector<8x1xf32> to vector<8x8xf32>
    %245 = arith.mulf %240, %244 : vector<8x8xf32>
    %246 = arith.truncf %245 : vector<8x8xf32> to vector<8x8xbf16>
    %247 = arith.truncf %228 : vector<8x16xf32> to vector<8x16xbf16>
    %cst_72 = arith.constant dense<0.000000e+00> : vector<8x16xf32>
    %248 = tpu.matmul %246, %247, %cst_72 {dimension_numbers = #tpu.dot_dimension_numbers<[1], [0], [0], [1], [0, 0, 1, 1], [], []>} : vector<8x8xbf16>, vector<8x16xbf16>, vector<8x16xf32> -> vector<8x16xf32>
    %249 = arith.truncf %248 : vector<8x16xf32> to vector<8x16xbf16>
    %250 = vector.extract_strided_slice %35 {offsets = [112, 0], sizes = [16, 128], strides = [1, 1]} : vector<128x128xbf16> to vector<16x128xbf16>
    %cst_73 = arith.constant dense<0.000000e+00> : vector<8x128xf32>
    %251 = tpu.matmul %249, %250, %cst_73 {dimension_numbers = #tpu.dot_dimension_numbers<[1], [0], [0], [1], [0, 0, 1, 1], [], []>} : vector<8x16xbf16>, vector<16x128xbf16>, vector<8x128xf32> -> vector<8x128xf32>
    %252 = arith.addf %225, %251 : vector<8x128xf32>
    %253 = arith.addf %1, %252 : vector<8x128xf32>
    %c0_74 = arith.constant 0 : index
    %c0_75 = arith.constant 0 : index
    %254 = vector.load %arg5[%c0_74, %c0_75] : memref<1x128xf32, #tpu.memory_space<vmem>>, vector<1x128xf32>
    %255 = vector.broadcast %254 : vector<1x128xf32> to vector<8x128xf32>
    %256 = arith.addf %253, %255 : vector<8x128xf32>
    %c0_76 = arith.constant 0 : index
    %c0_77 = arith.constant 0 : index
    %c0_78 = arith.constant 0 : index
    %257 = vector.load %arg8[%c0_76, %c0_77, %c0_78] : memref<1x8x128xf32, #tpu.memory_space<vmem>>, vector<1x8x128xf32>
    %258 = vector.shape_cast %257 : vector<1x8x128xf32> to vector<8x128xf32>
    %259 = vector.shape_cast %256 : vector<8x128xf32> to vector<1x8x128xf32>
    tpu.vector_store %arg8[%c0_76, %c0_77, %c0_78], %259 {strides = array<i32>} : memref<1x8x128xf32, #tpu.memory_space<vmem>>, vector<1x8x128xf32>,
    return
  }
  func.func @transform_0(%arg0: i32) -> (i32, i32, i32) {
    %c0_i32 = arith.constant 0 : i32
    %c0_i32_0 = arith.constant 0 : i32
    %c0_i32_1 = arith.constant 0 : i32
    return %arg0, %c0_i32, %c0_i32_0 : i32, i32, i32
  }
  func.func @transform_1(%arg0: i32) -> (i32, i32) {
    %c0_i32 = arith.constant 0 : i32
    %c0_i32_0 = arith.constant 0 : i32
    %c0_i32_1 = arith.constant 0 : i32
    return %c0_i32, %c0_i32_0 : i32, i32
  }
  func.func @transform_2(%arg0: i32) -> (i32, i32) {
    %c0_i32 = arith.constant 0 : i32
    %c0_i32_0 = arith.constant 0 : i32
    %c0_i32_1 = arith.constant 0 : i32
    return %c0_i32, %c0_i32_0 : i32, i32
  }
  func.func @transform_3(%arg0: i32) -> (i32, i32) {
    %c0_i32 = arith.constant 0 : i32
    %c0_i32_0 = arith.constant 0 : i32
    %c0_i32_1 = arith.constant 0 : i32
    return %c0_i32, %c0_i32_0 : i32, i32
  }
  func.func @transform_4(%arg0: i32) -> (i32, i32) {
    %c0_i32 = arith.constant 0 : i32
    %c0_i32_0 = arith.constant 0 : i32
    %c0_i32_1 = arith.constant 0 : i32
    return %c0_i32, %c0_i32_0 : i32, i32
  }
  func.func @transform_5(%arg0: i32) -> (i32, i32) {
    %c0_i32 = arith.constant 0 : i32
    %c0_i32_0 = arith.constant 0 : i32
    %c0_i32_1 = arith.constant 0 : i32
    return %c0_i32, %c0_i32_0 : i32, i32
  }
  func.func @transform_6(%arg0: i32) -> (i32, i32) {
    %c0_i32 = arith.constant 0 : i32
    %c0_i32_0 = arith.constant 0 : i32
    %c0_i32_1 = arith.constant 0 : i32
    return %c0_i32, %c0_i32_0 : i32, i32
  }
  func.func @transform_7(%arg0: i32) -> (i32, i32, i32) {
    %c0_i32 = arith.constant 0 : i32
    %c0_i32_0 = arith.constant 0 : i32
    %c0_i32_1 = arith.constant 0 : i32
    return %arg0, %c0_i32, %c0_i32_0 : i32, i32, i32
  }
}

module attributes {stable_mosaic.version = 11 : i64} {
  func.func @_decoder_kernel(%arg0: i32, %arg1: memref<16x128xf32, #tpu.memory_space<vmem>>, %arg2: memref<128x4xbf16, #tpu.memory_space<vmem>>, %arg3: memref<1x4xf32, #tpu.memory_space<vmem>>, %arg4: memref<16x4xf32, #tpu.memory_space<vmem>>) attributes {dimension_semantics = [#tpu.dimension_semantics<parallel>], iteration_bounds = array<i64: 1>, scalar_prefetch = 0 : i64, scratch_operands = 0 : i64, tpu.core_type = #tpu.core_type<tc>, window_params = [{transform_indices = @transform_0, window_bounds = array<i64: 16, 128>}, {pipeline_mode = #tpu.pipeline_mode<synchronous>, transform_indices = @transform_1, window_bounds = array<i64: 128, 4>}, {pipeline_mode = #tpu.pipeline_mode<synchronous>, transform_indices = @transform_2, window_bounds = array<i64: 1, 4>}, {transform_indices = @transform_3, window_bounds = array<i64: 16, 4>}]} {
    %c0 = arith.constant 0 : index
    %c0_0 = arith.constant 0 : index
    %0 = vector.load %arg1[%c0, %c0_0] : memref<16x128xf32, #tpu.memory_space<vmem>>, vector<16x128xf32>
    %1 = arith.truncf %0 : vector<16x128xf32> to vector<16x128xbf16>
    %c0_1 = arith.constant 0 : index
    %c0_2 = arith.constant 0 : index
    %2 = vector.load %arg2[%c0_1, %c0_2] : memref<128x4xbf16, #tpu.memory_space<vmem>>, vector<128x4xbf16>
    %cst = arith.constant dense<0.000000e+00> : vector<16x4xf32>
    %3 = tpu.matmul %1, %2, %cst {dimension_numbers = #tpu.dot_dimension_numbers<[1], [0], [0], [1], [0, 0, 1, 1], [], []>} : vector<16x128xbf16>, vector<128x4xbf16>, vector<16x4xf32> -> vector<16x4xf32>
    %c0_3 = arith.constant 0 : index
    %c0_4 = arith.constant 0 : index
    %4 = vector.load %arg3[%c0_3, %c0_4] : memref<1x4xf32, #tpu.memory_space<vmem>>, vector<1x4xf32>
    %5 = vector.broadcast %4 : vector<1x4xf32> to vector<16x4xf32>
    %6 = arith.addf %3, %5 : vector<16x4xf32>
    %cst_5 = arith.constant 0.000000e+00 : f32
    %7 = vector.broadcast %cst_5 : f32 to vector<16x4xf32>
    %8 = arith.maximumf %6, %7 : vector<16x4xf32>
    %c0_6 = arith.constant 0 : index
    %c0_7 = arith.constant 0 : index
    %9 = vector.load %arg4[%c0_6, %c0_7] : memref<16x4xf32, #tpu.memory_space<vmem>>, vector<16x4xf32>
    tpu.vector_store %arg4[%c0_6, %c0_7], %8 {strides = array<i32>} : memref<16x4xf32, #tpu.memory_space<vmem>>, vector<16x4xf32>,
    return
  }
  func.func @transform_0(%arg0: i32) -> (i32, i32) {
    %c0_i32 = arith.constant 0 : i32
    %c0_i32_0 = arith.constant 0 : i32
    return %arg0, %c0_i32 : i32, i32
  }
  func.func @transform_1(%arg0: i32) -> (i32, i32) {
    %c0_i32 = arith.constant 0 : i32
    %c0_i32_0 = arith.constant 0 : i32
    %c0_i32_1 = arith.constant 0 : i32
    return %c0_i32, %c0_i32_0 : i32, i32
  }
  func.func @transform_2(%arg0: i32) -> (i32, i32) {
    %c0_i32 = arith.constant 0 : i32
    %c0_i32_0 = arith.constant 0 : i32
    %c0_i32_1 = arith.constant 0 : i32
    return %c0_i32, %c0_i32_0 : i32, i32
  }
  func.func @transform_3(%arg0: i32) -> (i32, i32) {
    %c0_i32 = arith.constant 0 : i32
    %c0_i32_0 = arith.constant 0 : i32
    return %arg0, %c0_i32 : i32, i32
  }
}

</mosaic_0001>

<bundles_post_ra>
// kernel: transformer_forward.12
= control target key start
LH: loop header
LB: loop body
LE: loop exit
PB: predicated region body
PF: predicated region fallthrough
CT: control target
= control target key end

     0   :  { %9 = vsyncpa [#allocation3], 0  ;;  %s727_s0 = inlined_call_operand.hbm [shape: f32[2,8,16], index: 0, kind: input, shape index: {}]   ;;  %s728_s1 = inlined_call_operand.vmem [shape: bf16[16,128], index: 1, kind: input, shape index: {}]   ;;  %s729_s2 = inlined_call_operand.hbm [shape: f32[1,128], index: 2, kind: input, shape index: {}]   ;;  %s730_s3 = inlined_call_operand.vmem [shape: f32[2,1,128], index: 3, kind: input, shape index: {}]   ;;  %s731_s4 = inlined_call_operand.vmem [shape: f32[2,8,128], index: 4, kind: output, shape index: {}]  }
   0x1   :  { %11 = vsyncpa [#allocation3 + $0x1], 0 }
   0x2   :  { %12 = vsyncpa [#allocation5], 0  ;;  %s595_s15 = smov 0   ;;  %s597_s16 = smov 0  }
   0x3   :  { %s599_s17 = smov 0   ;;  %s601_s18 = smov 0  }
   0x4 LB: > { %s614_s19 = sadd.s32 4294967295, %s564_s18   ;;  %p38_p0 = scmp.ne.s32.totalorder %s556_s16, %s552_s15  ;;  %s564_s18 = sphi %s601_s18, %s747_s18   ;;  %s560_s17 = sphi %s599_s17, %s746_s17   ;;  %s556_s16 = sphi %s597_s16, %s745_s16   ;;  %s552_s15 = sphi %s595_s15, %s744_s15  }
   0x5   : > { %p732_p1 = scmp.eq.s32.totalorder %s614_s19, 0  ;;  %p396_p2 = scmp.ge.s32.totalorder %s564_s18, 1 }
   0x6   : > { %p143_p3 = scmp.lt.s32.totalorder %s564_s18, 3  ;;  %s566_s22 = smov [#allocation4]  }
   0x7   : > { %p622_p4 = por %p732_p1, %p38_p0  ;;  %s159_s23 = sshll.u32 %s566_s22, 4  ;;  %s160_s23 = int_to_ptr.vmem [resolvable:$true] %s159_s23 }
   0x8   : > { %p626_p5 = pnand %p396_p2, %p143_p3  ;;  %s633_s24 = sadd.s32 1, %s564_s18  }
   0x9   : > { %s735_s20 = scalar_select %p622_p4, 1, 0 }
   0xa   : > { %s736_s21 = scalar_select %p626_p5, 1, 0 }
   0xb   : > { %p425_p6 = pneg %p626_p5  ;;  %s22_s26 = ssub.s32 %s564_s18, %s633_s24 }
   0xc   : > { %p643_p8 = scmp.eq.s32.totalorder %s22_s26, 0  ;;  %s25_s28 = sadd.s32 1, %s560_s17 }
   0xd   : > { %p637_p7 = pnand %p425_p6, %p732_p1  ;;  %p32_p9 = scmp.ne.s32.totalorder %s560_s17, %s556_s16 }
   0xe   : > { %s483_s29 = scalar_lea.vmem %s160_s23, 16  ;;  %s490_s30 = scalar_lea.vmem %s160_s23, 32 }
   0xf   : > { %p474_p10 = pneg %p637_p7  ;;  %p484_p11 = scmp.ne.s32.totalorder %s160_s23, %s483_s29 }
  0x10   : > { %p491_p0 = scmp.lt.s32.totalorder %s160_s23, %s160_s23  ;;  %p492_p2 = scmp.lt.s32.totalorder %s490_s30, %s483_s29 }
  0x11   : > { %p486_p12 = pnand %p484_p11, %p474_p10 }
  0x12   : > { %p493_p3 = por %p492_p2, %p491_p0 }
  0x13   : > { %p487_p13 = pneg %p486_p12 }
  0x15   : > { %p494_p6 = pnand %p493_p3, %p487_p13 }
  0x17   : > { %497 = shalt.err (!%p494_p6)
}
  0x18   : > { %428 = dma.hbm_to_vmem [thread:$0]  (!%p637_p7), %s729_s2, 16, %s160_s23, [#allocation5]  }
  0x19   : > { %s660_s7 = scalar_select %p643_p8, %s560_s17, %s25_s28  }
  0x1a   : > { %p33_p10 = scmp.eq.s32.totalorder %s564_s18, 0  ;;  %p434_p11 = scmp.lt.s32.totalorder %s564_s18, 2 }
  0x1b   : > { %s170_s8 = sand.u32 1, %s560_s17   ;;  %s400_s9 = sshll.u32 %s564_s18, 7 }
  0x1c   : > { %p34_p12 = por %p33_p10, %p32_p9  ;;  %s399_s10 = sshll.u32 %s170_s8, 3 }
  0x1d   : > { %s672_s13 = scalar_lea.hbm %s727_s0, %s400_s9  ;;  %s174_s15 = scalar_lea.vmem [#allocation2], %s399_s10 }
  0x1e   : > { %p674_p13 = pnand %p434_p11, %p34_p12  ;;  %s181_s22 = sshll.u32 %s174_s15, 4  ;;  %s182_s22 = int_to_ptr.vmem [resolvable:$true] %s181_s22 }
  0x1f   : > { %s171_s18 = scalar_lea.sflag [#allocation3], %s170_s8  ;;  %s498_s23 = scalar_lea.hbm %s672_s13, 128 }
  0x20   : > { %p499_p7 = scmp.ne.s32.totalorder %s672_s13, %s498_s23  ;;  %p500_p8 = pneg %p674_p13 }
  0x21   : > { %s503_s27 = scalar_lea.hbm %s727_s0, 256  ;;  %p504_p2 = scmp.lt.s32.totalorder %s672_s13, %s727_s0 }
  0x22   : > { %p501_p9 = pnand %p500_p8, %p499_p7  ;;  %p505_p3 = scmp.lt.s32.totalorder %s503_s27, %s498_s23 }
  0x24   : > { %p502_p0 = pneg %p501_p9  ;;  %p506_p6 = por %p505_p3, %p504_p2 }
  0x26   : > { %p507_p10 = pnand %p506_p6, %p502_p0 }
  0x28   : > { %510 = shalt.err (!%p507_p10)
}
  0x29   : > { %s511_s30 = scalar_lea.vmem %s182_s22, 128  ;;  %s567_s5 = smov [#allocation2]  }
  0x2a   : > { %p512_p11 = scmp.ne.s32.totalorder %s182_s22, %s511_s30  ;;  %s516_s6 = sshll.u32 %s567_s5, 4  ;;  %s517_s6 = int_to_ptr.vmem [resolvable:$false] %s516_s6 }
  0x2b   : > { %s518_s8 = scalar_lea.vmem %s517_s6, 256  ;;  %p519_p7 = scmp.lt.s32.totalorder %s182_s22, %s517_s6 }
  0x2c   : > { %p514_p12 = pnand %p512_p11, %p500_p8  ;;  %p520_p9 = scmp.lt.s32.totalorder %s518_s8, %s511_s30 }
  0x2e   : > { %p515_p1 = pneg %p514_p12  ;;  %p521_p4 = por %p520_p9, %p519_p7 }
  0x30   : > { %p522_p5 = pnand %p521_p4, %p515_p1 }
  0x32   : > { %525 = shalt.err (!%p522_p5)
}
  0x33   : > { %432 = dma.hbm_to_vmem [thread:$0]  (!%p674_p13), %s672_s13, 128, %s182_s22, %s171_s18  }
  0x34   : > { %p740_p0 = scmp.ne.s32.totalorder %s736_s21, 0 }
  0x35   : > { %s198_s9 = sand.u32 (!%p740_p0), 1, %s556_s16   ;;  %p741_p8 = scmp.ne.s32.totalorder (!%p740_p0), %s735_s20, 0 }
  0x36   : > { %196 = sbr.rel (%p740_p0) target bundleno = 267 (0x10b), region = 36  ;;  %s402_s10 = sshll.u32 (!%p740_p0), %s198_s9, 3 }
  0x37   : > { %s199_s11 = scalar_lea.sflag (!%p740_p0), [#allocation3], %s198_s9  ;;  %s202_s12 = scalar_lea.vmem (!%p740_p0), [#allocation2], %s402_s10 }
  0x3b   : > { %543 = dma.done.wait (%p741_p8), %s199_s11, 128  }
  0x3c   : > { %545 = vsyncadd (%p741_p8), %s199_s11, 4294967168  ;;  %p742_p1 = scmp.eq.s32.totalorder %s614_s19, 0 }
  0x3e   : > { %547 = dma.done.wait (%p742_p1), [#allocation5], 16   ;;  %p743_p4 = pmov %p742_p1 }
  0x3f   : > { %v568_v0 = vmov 0.0   ;;  %vm569_vm0 = vmmov 0   ;;  %v471_v1 = vld [vmem:[%s728_s1] sm:$0xff]   ;;  %vm258_vm1 = vcmask 130048   ;;  %p233_p5 = scmp.lt.s32.totalorder %s614_s19, 1 }
  0x40   : > { %549 = vsyncadd (%p743_p4), [#allocation5], 4294967280  ;;  %413 = vmatprep.subr.bf16.mxu0 %v568_v0  ;;  %415 = vmatprep.mubr.msk.bf16.mxu0 %vm569_vm0, %v568_v0  ;;  %v241_v2 = vld [vmem:[%s202_s12] sm:$0xff]  ;;  %v405_v4 = vld [vmem:[#allocation4] ss:$0 sm:$0xff] }
  0x41   : > { %414 = vmatpush3.bf16.msra.mxu0 %v471_v1  ;;  %v242_v3 = vpack.c.bf16 %v241_v2, %v241_v2  ;;  %s749_s19 = smov (!%p233_p5, %s614_s19), 1 }
  0x42   : > { %s235_s15 = scalar_lea.vmem %s730_s3, %s749_s19  ;;  %s404_s22 = sshll.u32 %s749_s19, 3 }
  0x43   : > { %v408_v6 = vld [vmem:[%s235_s15] ss:$0 sm:$0xff]  ;;  %s239_s25 = scalar_lea.vmem %s731_s4, %s404_s22 }
  0x44   : > { %416 = vmatmul.mubr.msk.bf16.vlgmr.msra.gmra.mxu0 %vm258_vm1, %v242_v3 }
 0x104   : > { %v296_v5 = vpop.f32.mrf.mxu0 }
 0x105   : > { %v297_v7 = vadd.f32 %v405_v4, %v296_v5 }
 0x106   : > { %v417_v8 = vpop.f32.mrf.mxu0 }
 0x107   : > { %v309_v9 = vadd.f32 %v408_v6, %v297_v7 }
 0x108   : > { %v299_v10 = vpop.f32.mrf.mxu0 }
 0x109   : > { %310 = vst [vmem:[%s239_s25] sm:$0xff] %v309_v9 }
 0x10a   : > { %v418_v11 = vpop.f32.mrf.mxu0 }
 0x10b PF: > { %p15_p13 = scmp.ge.s32.totalorder %s633_s24, 4   ;;  %s744_s15 = smov %s556_s16 }
 0x10c   : > { %s745_s16 = smov %s560_s17  ;;  %s746_s17 = smov %s660_s7 }
 0x10d   : > { %s747_s18 = smov %s633_s24  ;;  %17 = sbr.rel (!%p15_p13) target bundleno = 4 (0x4), region = 83 }
 0x112   :  { %330 = vsyncpa [#allocation3], 1 }
 0x113   :  { %332 = vsyncpa [#allocation3 + $0x1], 1 }
 0x114   :  { %333 = vsyncpa [#allocation5], 1 }

// kernel: transformer_forward.13
= control target key start
LH: loop header
LB: loop body
LE: loop exit
PB: predicated region body
PF: predicated region fallthrough
CT: control target
= control target key end

     0   :  { %12 = vsyncpa [#allocation3], 0  ;;  %s3021_s0 = inlined_call_operand.vmem [shape: f32[2,8,128], index: 0, kind: input, shape index: {}]   ;;  %s3022_s1 = inlined_call_operand.vmem [shape: bf16[128,384], index: 1, kind: input, shape index: {}]   ;;  %s3023_s2 = inlined_call_operand.vmem [shape: f32[1,384], index: 2, kind: input, shape index: {}]   ;;  %s3024_s3 = inlined_call_operand.vmem [shape: bf16[128,128], index: 3, kind: input, shape index: {}]   ;;  %s3025_s4 = inlined_call_operand.hbm [shape: f32[1,128], index: 4, kind: input, shape index: {}]   ;;  %s3026_s5 = inlined_call_operand.hbm [shape: f32[1,128], index: 5, kind: input, shape index: {}]   ;;  %s3027_s6 = inlined_call_operand.hbm [shape: f32[1,128], index: 6, kind: input, shape index: {}]   ;;  %s3028_s7 = inlined_call_operand.vmem [shape: f32[2,8,128], index: 7, kind: output, shape index: {}]  }
   0x1   :  { %13 = vsyncpa [#allocation5], 0  ;;  %s2587_s24 = smov 0  }
   0x2 LB: > { %s2593_s25 = sadd.s32 4294967295, %s2532_s24   ;;  %p2023_p0 = scmp.ge.s32.totalorder %s2532_s24, 1  ;;  %s2532_s24 = sphi %s2587_s24, %s19_s24  }
   0x3   : > { %p202_p1 = scmp.lt.s32.totalorder %s2532_s24, 3  ;;  %p3029_p2 = scmp.eq.s32.totalorder %s2593_s25, 0 }
   0x4   : > { %s2534_s27 = smov [#allocation4]   ;;  %s2535_s29 = smov [#allocation2]  }
   0x5   : > { %p2598_p3 = pnand %p2023_p0, %p202_p1  ;;  %s235_s28 = sshll.u32 %s2534_s27, 4  ;;  %s236_s28 = int_to_ptr.vmem [resolvable:$true] %s235_s28 }
   0x6   : > { %s224_s30 = sshll.u32 %s2535_s29, 4  ;;  %s2536_s8 = smov [#allocation6]   ;;  %s225_s30 = int_to_ptr.vmem [resolvable:$true] %s224_s30 }
   0x7   : > { %p2328_p4 = pneg %p2598_p3  ;;  %s246_s9 = sshll.u32 %s2536_s8, 4  ;;  %s2610_s9 = int_to_ptr.vmem [resolvable:$true] %s246_s9 }
   0x8   : > { %s2451_s11 = scalar_lea.vmem %s236_s28, 16  ;;  %s2458_s12 = scalar_lea.vmem %s236_s28, 32 }
   0x9   : > { %p2606_p5 = pnand %p3029_p2, %p2328_p4  ;;  %p2452_p7 = scmp.ne.s32.totalorder %s236_s28, %s2451_s11 }
   0xa   : > { %p2459_p10 = scmp.lt.s32.totalorder %s236_s28, %s236_s28  ;;  %p2460_p11 = scmp.lt.s32.totalorder %s2458_s12, %s2451_s11 }
   0xb   : > { %p2442_p6 = pneg %p2606_p5 }
   0xc   : > { %p2461_p12 = por %p2460_p11, %p2459_p10 }
   0xd   : > { %p2454_p8 = pnand %p2452_p7, %p2442_p6 }
   0xf   : > { %p2455_p9 = pneg %p2454_p8 }
  0x11   : > { %p2462_p13 = pnand %p2461_p12, %p2455_p9 }
  0x13   : > { %2465 = shalt.err (!%p2462_p13)
}
  0x14   : > { %2334 = dma.hbm_to_vmem [thread:$0]  (!%p2606_p5), %s3026_s5, 16, %s236_s28, [#allocation5]  }
  0x15   : > { %s2477_s15 = scalar_lea.vmem %s225_s30, 16  ;;  %s2484_s16 = scalar_lea.vmem %s225_s30, 32 }
  0x16   : > { %p2478_p0 = scmp.ne.s32.totalorder %s225_s30, %s2477_s15  ;;  %p2485_p7 = scmp.lt.s32.totalorder %s225_s30, %s225_s30 }
  0x17   : > { %p2486_p8 = scmp.lt.s32.totalorder %s2484_s16, %s2477_s15 }
  0x18   : > { %p2480_p1 = pnand %p2478_p0, %p2442_p6 }
  0x19   : > { %p2487_p2 = por %p2486_p8, %p2485_p7 }
  0x1a   : > { %p2481_p4 = pneg %p2480_p1 }
  0x1c   : > { %p2488_p10 = pnand %p2487_p2, %p2481_p4 }
  0x1e   : > { %2491 = shalt.err (!%p2488_p10)
}
  0x1f   : > { %2331 = dma.hbm_to_vmem [thread:$0]  (!%p2606_p5), %s3025_s4, 16, %s225_s30, [#allocation3]  }
  0x20   : > { %s2503_s19 = scalar_lea.vmem %s2610_s9, 16  ;;  %s2510_s20 = scalar_lea.vmem %s2610_s9, 32 }
  0x21   : > { %p2504_p9 = scmp.ne.s32.totalorder %s2610_s9, %s2503_s19  ;;  %p2511_p2 = scmp.lt.s32.totalorder %s2610_s9, %s2610_s9 }
  0x22   : > { %p2512_p13 = scmp.lt.s32.totalorder %s2510_s20, %s2503_s19 }
  0x23   : > { %p2506_p11 = pnand %p2504_p9, %p2442_p6 }
  0x24   : > { %p2513_p0 = por %p2512_p13, %p2511_p2 }
  0x25   : > { %p2507_p12 = pneg %p2506_p11 }
  0x27   : > { %p2514_p1 = pnand %p2513_p0, %p2507_p12 }
  0x29   : > { %2517 = shalt.err (!%p2514_p1)
}
  0x2a   : > { %2337 = dma.hbm_to_vmem [thread:$0]  (!%p2606_p5), %s3027_s6, 16, %s2610_s9, [#allocation5]  }
  0x2b   : > { %266 = sbr.rel (%p2598_p3) target bundleno = 4955 (0x135b), region = 48  ;;  %p3032_p6 = scmp.eq.s32.totalorder (!%p2598_p3), %s2593_s25, 0 }
  0x30   : > { %2523 = dma.done.wait (%p3032_p6), [#allocation3], 16   ;;  %p3033_p4 = pmov %p3032_p6 }
  0x32   : > { %2525 = vsyncadd (%p3033_p4), [#allocation3], 4294967280  ;;  %p3034_p7 = pmov %p3033_p4 }
  0x33   : > { %p3035_p8 = pmov %p3033_p4 }
  0x34   : > { %2527 = dma.done.wait (%p3034_p7), [#allocation5], 32  }
  0x35   : > { %2529 = vsyncadd (%p3035_p8), [#allocation5], 4294967264  ;;  %p304_p10 = scmp.lt.s32.totalorder %s2593_s25, 1  ;;  %v2365_v1 = vld [vmem:[%s3022_s1 + $0xac] ss:$12 sps:$4 sm:$0xff]   ;;  %v2537_v3 = vmov 0.0   ;;  %v377_v41 = vlaneseq }
  0x36   : > { %v2367_v2 = vld [vmem:[%s3022_s1 + $0xa8] ss:$12 sps:$4 sm:$0xff]   ;;  %2152 = vmatprep.subr.bf16.mxu1 %v2537_v3  ;;  %v2368_v4 = vld [vmem:[%s3022_s1 + $0xb0] ss:$12 sps:$4 sm:$0xff]   ;;  %520 = vmatprep.subr.bf16.mxu0 %v2365_v1  ;;  %v2372_v7 = vld [vmem:[%s3022_s1 + $0x98] ss:$12 sps:$4 sm:$0xff]  }
  0x37   : > { %s3039_s25 = smov (!%p304_p10, %s2593_s25), 1  ;;  %v2369_v5 = vld [vmem:[%s3022_s1 + $0x94] ss:$12 sps:$4 sm:$0xff]   ;;  %521 = vmatpush1.bf16.msra.mxu0 %v2367_v2  ;;  %2153 = vmatpush3.bf16.msra.mxu1 %v2368_v4  ;;  %v2371_v6 = vld [vmem:[%s3022_s1 + $0x90] ss:$12 sps:$4 sm:$0xff]   ;;  %v2538_v22 = vmov 0  }
  0x38   : > { %s2032_s23 = sshll.u32 %s3039_s25, 3  ;;  %522 = vmatprep.subr.bf16.mxu0 %v2369_v5  ;;  %2154 = vmatprep.subr.bf16.mxu1 %v2537_v3  ;;  %v2373_v12 = vld [vmem:[%s3022_s1 + $0x7c] ss:$12 sps:$4 sm:$0xff]   ;;  %v2375_v13 = vld [vmem:[%s3022_s1 + $0x78] ss:$12 sps:$4 sm:$0xff]   ;;  %vm2539_vm0 = vmmov 0  }
  0x39   : > { %s2664_s28 = scalar_lea.vmem %s3021_s0, %s2032_s23  ;;  %v2376_v14 = vld [vmem:[%s3022_s1 + $0x80] ss:$12 sps:$4 sm:$0xff]   ;;  %v2377_v15 = vld [vmem:[%s3022_s1 + $0x64] ss:$12 sps:$4 sm:$0xff]   ;;  %v2380_v17 = vld [vmem:[%s3022_s1 + $0x68] ss:$12 sps:$4 sm:$0xff]   ;;  %552 = vmatprep.mubr.bf16.mxu0 %v2538_v22  ;;  %2168 = vmatprep.mubr.msk.bf16.mxu1 %vm2539_vm0, %v2537_v3 }
  0x3a   : > { %v313_v0 = vld [vmem:[%s2664_s28] sm:$0xff]  ;;  %v2381_v18 = vld [vmem:[%s3022_s1 + $0x4c] ss:$12 sps:$4 sm:$0xff]   ;;  %v2383_v19 = vld [vmem:[%s3022_s1 + $0x48] ss:$12 sps:$4 sm:$0xff]   ;;  %v2756_v42 = vshrl.u32 %v377_v41, 7 }
  0x3b   : > { %316 = vadd.xlane.f32.xlu0 %v313_v0  ;;  %523 = vmatpush1.bf16.msra.mxu0 %v2371_v6  ;;  %v2379_v16 = vld [vmem:[%s3022_s1 + $0x60] ss:$12 sps:$4 sm:$0xff]   ;;  %v2384_v20 = vld [vmem:[%s3022_s1 + $0x50] ss:$12 sps:$4 sm:$0xff]   ;;  %v2388_v24 = vld [vmem:[%s3022_s1 + $0x38] ss:$12 sps:$4 sm:$0xff]  }
  0x3c   : > { %2155 = vmatpush3.bf16.msra.mxu1 %v2372_v7  ;;  %524 = vmatprep.subr.bf16.mxu0 %v2373_v12  ;;  %v2385_v21 = vld [vmem:[%s3022_s1 + $0x34] ss:$12 sps:$4 sm:$0xff]   ;;  %v2387_v23 = vld [vmem:[%s3022_s1 + $0x30] ss:$12 sps:$4 sm:$0xff]   ;;  %v2391_v26 = vld [vmem:[%s3022_s1 + $0x18] ss:$12 sps:$4 sm:$0xff]  }
  0x3d   : > { %2156 = vmatprep.subr.bf16.mxu1 %v2537_v3  ;;  %v2389_v25 = vld [vmem:[%s3022_s1 + $0x1c] ss:$12 sps:$4 sm:$0xff]   ;;  %v2392_v27 = vld [vmem:[%s3022_s1 + $0x20] ss:$12 sps:$4 sm:$0xff]   ;;  %v2393_v28 = vld [vmem:[%s3022_s1 + $0x4] ss:$12 sps:$4 sm:$0xff]  }
  0x3e   : > { %v2395_v29 = vld [vmem:[%s3022_s1] ss:$12 sps:$4 sm:$0xff]   ;;  %v2396_v30 = vld [vmem:[%s3022_s1 + $0x8] ss:$12 sps:$4 sm:$0xff]   ;;  %v2035_v37 = vld [vmem:[#allocation6] ss:$0 sm:$0xff] }
  0x3f   : > { %525 = vmatpush1.bf16.msra.mxu0 %v2375_v13  ;;  %v2034_v35 = vld [vmem:[#allocation4] ss:$0 sm:$0xff]  ;;  %v379_v43 = vsub.s32 0, %v2756_v42  ;;  %v387_v44 = vsub.s32 2, %v2756_v42  ;;  %vm719_vm1 = vcmask 1043456   ;;  %s2540_s18 = smov 112  }
  0x40   : > { %2157 = vmatpush3.bf16.msra.mxu1 %v2376_v14  ;;  %526 = vmatprep.subr.bf16.mxu0 %v2377_v15  ;;  %v375_v45 = vld [vmem:[%s3023_s2] sm:$0x7]  ;;  %v383_v61 = vsub.s32 1, %v2756_v42  ;;  %s2541_s19 = smov 96   ;;  %vm656_vm2 = vcmask 130048   ;;  %vm702_vm4 = vcmask 64512  }
  0x41   : > { %2158 = vmatprep.subr.bf16.mxu1 %v2537_v3  ;;  %v380_v46 = vrot.slane %v375_v45, %v379_v43  ;;  %v388_v47 = vrot.slane %v375_v45, %v387_v44  ;;  %s2542_s27 = smov 80   ;;  %s2543_s8 = smov 64  }
  0x42   : > { %v384_v62 = vrot.slane %v375_v45, %v383_v61  ;;  %s2544_s11 = smov 48   ;;  %s2545_s14 = smov 32  }
  0x43   : > { %527 = vmatpush1.bf16.msra.mxu0 %v2379_v16  ;;  %s2546_s17 = smov 16  }
  0x44   : > { %2159 = vmatpush3.bf16.msra.mxu1 %v2380_v17  ;;  %528 = vmatprep.subr.bf16.mxu0 %v2381_v18 }
  0x45   : > { %2160 = vmatprep.subr.bf16.mxu1 %v2537_v3 }
  0x47   : > { %529 = vmatpush1.bf16.msra.mxu0 %v2383_v19 }
  0x48   : > { %2161 = vmatpush3.bf16.msra.mxu1 %v2384_v20  ;;  %530 = vmatprep.subr.bf16.mxu0 %v2385_v21 }
  0x49   : > { %2162 = vmatprep.subr.bf16.mxu1 %v2537_v3 }
  0x4b   : > { %531 = vmatpush1.bf16.msra.mxu0 %v2387_v23 }
  0x4c   : > { %2163 = vmatpush3.bf16.msra.mxu1 %v2388_v24  ;;  %532 = vmatprep.subr.bf16.mxu0 %v2389_v25  ;;  %v604_v25 = vand.u32 127, %v377_v41 }
  0x4d   : > { %2164 = vmatprep.subr.bf16.mxu1 %v2537_v3 }
  0x4e   : > { %vm2820_vm3 = vcmp.le.s32.totalorder %v604_v25, %v2756_v42 }
  0x4f   : > { %533 = vmatpush1.bf16.msra.mxu0 %v2391_v26 }
  0x50   : > { %2165 = vmatpush3.bf16.msra.mxu1 %v2392_v27  ;;  %534 = vmatprep.subr.bf16.mxu0 %v2393_v28 }
  0x51   : > { %2166 = vmatprep.subr.bf16.mxu1 %v2537_v3 }
  0x53   : > { %535 = vmatpush1.bf16.msra.mxu0 %v2395_v29 }
  0x54   : > { %2167 = vmatpush3.bf16.msra.mxu1 %v2396_v30  ;;  %2172 = vmatprep.subr.bf16.mxu0 %v2537_v3 }
  0x55   : > { %2178 = vmatprep.subr.bf16.mxu1 %v2537_v3 }
  0xc4   : > { %v317_v8 = vpop.xlane.xlu0 %316 }
  0xc5   : > { %v319_v9 = vmul.f32 0.0078125, %v317_v8 }
  0xc7   : > { %v320_v10 = vsub.f32 %v313_v0, %v319_v9 }
  0xc9   : > { %v321_v11 = vmul.f32 %v320_v10, %v320_v10 }
  0xcb   : > { %322 = vadd.xlane.f32.xlu0 %v321_v11 }
 0x154   : > { %v323_v31 = vpop.xlane.xlu0 %322 }
 0x155   : > { %v324_v32 = vmul.f32 0.0078125, %v323_v31 }
 0x157   : > { %v325_v33 = vadd.f32 1e-05, %v324_v32 }
 0x159   : > { %2405 = vrsqrt.f32 %v325_v33 }
 0x166   : > { %v2406_v34 = vpop.eup %2405 }
 0x167   : > { %v327_v36 = vmul.f32 %v2406_v34, %v320_v10 }
 0x169   : > { %v334_v38 = vmul.f32 %v2034_v35, %v327_v36 }
 0x16b   : > { %v341_v39 = vadd.f32 %v2035_v37, %v334_v38 }
 0x16d   : > { %v342_v40 = vpack.c.bf16 %v341_v39, %v341_v39 }
 0x16f   : > { %553 = vmatmul.mubr.bf16.vlgmr.msra.gmra.mxu0 %v342_v40  ;;  %2169 = vmatmul.mubr.bf16.vlgmr.msra.gmra.mxu1 %v342_v40 }
 0x170   : > { %2174 = vmatprep.mubr.msk.bf16.mxu0 %vm2539_vm0, %v2537_v3  ;;  %2180 = vmatprep.mubr.msk.bf16.mxu1 %vm2539_vm0, %v2537_v3 }
 0x22f   : > { %v554_v48 = vpop.f32.mrf.mxu0  ;;  %v595_v49 = vpop.f32.mrf.mxu1 }
 0x230   : > { %v555_v50 = vadd.f32 %v554_v48, %v380_v46  ;;  %v596_v51 = vadd.f32 %v595_v49, %v388_v47 }
 0x231   : > { %v556_v52 = vpop.f32.mrf.mxu0  ;;  %v2170_v53 = vpop.f32.mrf.mxu1 }
 0x232   : > { %v2763_v54 = vpack.c.bf16 %v555_v50, %v555_v50  ;;  %v2765_v55 = vpack.c.bf16 %v596_v51, %v596_v51  ;;  %v557_v63 = vadd.f32 %v556_v52, %v384_v62 }
 0x233   : > { %v558_v56 = vpop.f32.mrf.mxu0  ;;  %v598_v57 = vpop.f32.mrf.mxu1 }
 0x234   : > { %766 = vrot.lane.b32.xlu1 %v2763_v54, %s2540_s18  ;;  %v721_v58 = vsel %vm719_vm1, %v2765_v55, 0 }
 0x235   : > { %v559_v59 = vpop.f32.mrf.mxu0  ;;  %v2171_v60 = vpop.f32.mrf.mxu1  ;;  %2179 = vmatpush3.bf16.msra.mxu1 %v721_v58 }
 0x236   : > { %2190 = vmatprep.subr.bf16.mxu1 %v2537_v3 }
 0x25d   : > { %606 = vxpose.xlu1.b32.start.end [1/1] (short) %v557_v63, 128  ;;  %v2397_v63 = vld [vmem:[%s3024_s3] sm:$0xff]  }
 0x2a6   : > { %v767_v0 = vpop.permute.xlu1 %766 }
 0x2b7   : > { %974 = vrot.lane.b32.xlu1 %v2763_v54, %s2541_s19 }
 0x2d9   : > { %v622_v1 = vpop.trf.xlu1 }
 0x2dd   : > { %v623_v2 = vpop.trf.xlu1 }
 0x2de   : > { %v655_v4 = vpack.c.bf16 %v623_v2, %v622_v1 }
 0x2e0   : > { %2173 = vmatpush3.bf16.msra.mxu0 %v655_v4 }
 0x2e1   : > { %v624_v5 = vpop.trf.xlu1  ;;  %2184 = vmatprep.subr.bf16.mxu0 %v2537_v3 }
 0x2e3   : > { %2175 = vmatmul.mubr.msk.bf16.vlgmr.msra.gmra.mxu0 %vm656_vm2, %v2763_v54 }
 0x2e4   : > { %2186 = vmatprep.mubr.msk.bf16.mxu0 %vm2539_vm0, %v2537_v3 }
 0x2e5   : > { %v625_v6 = vpop.trf.xlu1 }
 0x2e6   : > { %v764_v7 = vpack.c.bf16 %v625_v6, %v624_v5 }
 0x2e8   : > { %2185 = vmatpush3.bf16.msra.mxu0 %v764_v7 }
 0x2e9   : > { %v2780_v8 = vpop.trf.xlu1  ;;  %2196 = vmatprep.subr.bf16.mxu0 %v2537_v3 }
 0x2eb   : > { %2187 = vmatmul.mubr.msk.bf16.vlgmr.msra.gmra.mxu0 %vm656_vm2, %v767_v0  ;;  %v2398_v0 = vld [vmem:[%s3024_s3 + $0x8] sm:$0xff]  }
 0x2ec   : > { %2198 = vmatprep.mubr.msk.bf16.mxu0 %vm2539_vm0, %v2537_v3  ;;  %2197 = vmatpush3.bf16.msra.mxu0 %v2398_v0 }
 0x2ed   : > { %v2786_v9 = vpop.trf.xlu1  ;;  %2208 = vmatprep.subr.bf16.mxu0 %v2537_v3 }
 0x2f1   : > { %v2788_v10 = vpop.trf.xlu1 }
 0x2f5   : > { %v2790_v11 = vpop.trf.xlu1 }
 0x2f6   : > { %v1132_v12 = vpack.c.bf16 %v2790_v11, %v2788_v10 }
 0x2f9   : > { %v2794_v13 = vpop.trf.xlu1 }
 0x2fd   : > { %v2796_v14 = vpop.trf.xlu1 }
 0x2fe   : > { %v1291_v15 = vpack.c.bf16 %v2796_v14, %v2794_v13 }
 0x301   : > { %v2800_v16 = vpop.trf.xlu1 }
 0x305   : > { %v2802_v17 = vpop.trf.xlu1 }
 0x306   : > { %v1450_v18 = vpack.c.bf16 %v2802_v17, %v2800_v16 }
 0x309   : > { %v2806_v19 = vpop.trf.xlu1 }
 0x30d   : > { %v2808_v20 = vpop.trf.xlu1 }
 0x30e   : > { %v1609_v21 = vpack.c.bf16 %v2808_v20, %v2806_v19 }
 0x311   : > { %v2812_v22 = vpop.trf.xlu1 }
 0x315   : > { %v2814_v23 = vpop.trf.xlu1 }
 0x316   : > { %v1768_v24 = vpack.c.bf16 %v2814_v23, %v2812_v22 }
 0x3a3   : > { %v694_v26 = vpop.f32.mrf.mxu0 }
 0x3a4   : > { %v700_v28 = vmul.f32 0.25, %v694_v26  ;;  %v973_v26 = vpack.c.bf16 %v2786_v9, %v2780_v8 }
 0x3a5   : > { %v2176_v29 = vpop.f32.mrf.mxu0 }
 0x3a6   : > { %v701_v30 = vsel %vm2820_vm3, %v700_v28, -inf }
 0x3a7   : > { %v697_v31 = vpop.f32.mrf.mxu0  ;;  %v703_v32 = vsel %vm702_vm4, %v701_v30, -inf }
 0x3a8   : > { %704 = vmax.xlane.f32.xlu0 %v703_v32  ;;  %v975_v31 = vpop.permute.xlu1 %974 }
 0x3a9   : > { %v2177_v33 = vpop.f32.mrf.mxu0 }
 0x3ab   : > { %v805_v34 = vpop.f32.mrf.mxu0 }
 0x3ac   : > { %v811_v35 = vmul.f32 0.25, %v805_v34 }
 0x3ad   : > { %v2188_v36 = vpop.f32.mrf.mxu0 }
 0x3ae   : > { %v812_v37 = vsel %vm2820_vm3, %v811_v35, -inf }
 0x3af   : > { %v808_v38 = vpop.f32.mrf.mxu0  ;;  %v813_v39 = vsel %vm702_vm4, %v812_v37, -inf }
 0x3b0   : > { %814 = vmax.xlane.f32.xlu0 %v813_v39 }
 0x3b1   : > { %v2189_v40 = vpop.f32.mrf.mxu0 }
 0x431   : > { %v705_v41 = vpop.xlane.xlu0 %704 }
 0x432   : > { %v706_v42 = vsub.f32 %v701_v30, %v705_v41 }
 0x434   : > { %v707_v43 = vmul.f32 1.442695, %v706_v42 }
 0x436   : > { %2407 = vpow2.f32 %v707_v43 }
 0x439   : > { %v815_v44 = vpop.xlane.xlu0 %814 }
 0x43a   : > { %v816_v45 = vsub.f32 %v812_v37, %v815_v44 }
 0x43c   : > { %v817_v46 = vmul.f32 1.442695, %v816_v45 }
 0x43e   : > { %2409 = vpow2.f32 %v817_v46 }
 0x443   : > { %v2408_v47 = vpop.eup %2407 }
 0x444   : > { %v709_v48 = vsel %vm702_vm4, %v2408_v47, 0.0 }
 0x445   : > { %710 = vadd.xlane.f32.xlu0 %v709_v48 }
 0x44b   : > { %v2410_v49 = vpop.eup %2409 }
 0x44c   : > { %v819_v50 = vsel %vm702_vm4, %v2410_v49, 0.0 }
 0x44d   : > { %820 = vadd.xlane.f32.xlu0 %v819_v50 }
 0x463   : > { %826 = vrot.lane.b32.xlu0 %v2765_v55, %s2540_s18 }
 0x4ce   : > { %v711_v51 = vpop.xlane.xlu0 %710 }
 0x4cf   : > { %2411 = vrcp.f32 %v711_v51 }
 0x4d6   : > { %v821_v52 = vpop.xlane.xlu0 %820 }
 0x4d7   : > { %2413 = vrcp.f32 %v821_v52 }
 0x4da   : > { %v827_v57 = vpop.permute.xlu0 %826 }
 0x4db   : > { %v832_v59 = vsel %vm719_vm1, %v827_v57, 0 }
 0x4dc   : > { %v2412_v53 = vpop.eup %2411 }
 0x4dd   : > { %v713_v56 = vmul.f32 %v2412_v53, %v2408_v47 }
 0x4df   : > { %v714_v58 = vpack.c.bf16 %v713_v56, %v713_v56 }
 0x4e1   : > { %2181 = vmatmul.mubr.msk.bf16.vlgmr.msra.gmra.mxu1 %vm702_vm4, %v714_v58 }
 0x4e2   : > { %2191 = vmatpush3.bf16.msra.mxu1 %v832_v59  ;;  %2192 = vmatprep.mubr.msk.bf16.mxu1 %vm2539_vm0, %v2537_v3 }
 0x4e3   : > { %2202 = vmatprep.subr.bf16.mxu1 %v2537_v3 }
 0x4e4   : > { %v2414_v60 = vpop.eup %2413 }
 0x4e5   : > { %v823_v61 = vmul.f32 %v2414_v60, %v2410_v49  ;;  %v2399_v60 = vld [vmem:[%s3024_s3 + $0x10] sm:$0xff]  }
 0x4e7   : > { %v824_v62 = vpack.c.bf16 %v823_v61, %v823_v61 }
 0x4e9   : > { %2193 = vmatmul.mubr.msk.bf16.vlgmr.msra.gmra.mxu1 %vm702_vm4, %v824_v62 }
 0x4ea   : > { %2204 = vmatprep.mubr.msk.bf16.mxu1 %vm2539_vm0, %v2537_v3  ;;  %2203 = vmatpush3.bf16.msra.mxu1 %v2397_v63 }
 0x4eb   : > { %2214 = vmatprep.subr.bf16.mxu1 %v2537_v3 }
 0x5a1   : > { %v757_v1 = vpop.f32.mrf.mxu1 }
 0x5a2   : > { %v763_v2 = vpack.c.bf16 %v757_v1, %v757_v1 }
 0x5a3   : > { %v2182_v4 = vpop.f32.mrf.mxu1 }
 0x5a4   : > { %2205 = vmatmul.mubr.msk.bf16.vlgmr.msra.gmra.mxu1 %vm656_vm2, %v763_v2 }
 0x5a5   : > { %v760_v5 = vpop.f32.mrf.mxu1  ;;  %2216 = vmatprep.mubr.msk.bf16.mxu1 %vm2539_vm0, %v2537_v3 }
 0x5a7   : > { %v2183_v6 = vpop.f32.mrf.mxu1 }
 0x5a9   : > { %v868_v7 = vpop.f32.mrf.mxu1 }
 0x5aa   : > { %v874_v25 = vpack.c.bf16 %v868_v7, %v868_v7 }
 0x5ab   : > { %v2194_v28 = vpop.f32.mrf.mxu1 }
 0x5ac   : > { %2199 = vmatmul.mubr.msk.bf16.vlgmr.msra.gmra.mxu0 %vm656_vm2, %v874_v25 }
 0x5ad   : > { %2209 = vmatpush3.bf16.msra.mxu0 %v973_v26  ;;  %v871_v29 = vpop.f32.mrf.mxu1  ;;  %2210 = vmatprep.mubr.msk.bf16.mxu0 %vm2539_vm0, %v2537_v3 }
 0x5ae   : > { %2220 = vmatprep.subr.bf16.mxu0 %v2537_v3 }
 0x5af   : > { %v2195_v30 = vpop.f32.mrf.mxu1 }
 0x5b4   : > { %2211 = vmatmul.mubr.msk.bf16.vlgmr.msra.gmra.mxu0 %vm656_vm2, %v975_v31 }
 0x5b5   : > { %2222 = vmatprep.mubr.msk.bf16.mxu0 %vm2539_vm0, %v2537_v3  ;;  %2221 = vmatpush3.bf16.msra.mxu0 %v2399_v60 }
 0x5b6   : > { %2232 = vmatprep.subr.bf16.mxu0 %v2537_v3 }
 0x664   : > { %v967_v32 = vpop.f32.mrf.mxu1 }
 0x666   : > { %v2206_v33 = vpop.f32.mrf.mxu1 }
 0x668   : > { %v970_v8 = vpop.f32.mrf.mxu1 }
 0x66a   : > { %v2207_v9 = vpop.f32.mrf.mxu1 }
 0x66c   : > { %v918_v34 = vpop.f32.mrf.mxu0 }
 0x66d   : > { %v2862_v35 = vadd.f32 %v967_v32, %v918_v34 }
 0x66e   : > { %v2200_v36 = vpop.f32.mrf.mxu0 }
 0x670   : > { %v921_v37 = vpop.f32.mrf.mxu0 }
 0x672   : > { %v2201_v38 = vpop.f32.mrf.mxu0 }
 0x674   : > { %v1013_v39 = vpop.f32.mrf.mxu0 }
 0x675   : > { %v1019_v40 = vmul.f32 0.25, %v1013_v39 }
 0x676   : > { %v2212_v41 = vpop.f32.mrf.mxu0 }
 0x677   : > { %v1020_v42 = vsel %vm2820_vm3, %v1019_v40, -inf  ;;  %v2400_v40 = vld [vmem:[%s3024_s3 + $0x18] sm:$0xff]  }
 0x678   : > { %v1016_v43 = vpop.f32.mrf.mxu0  ;;  %v1021_v44 = vsel %vm702_vm4, %v1020_v42, -inf }
 0x679   : > { %1022 = vmax.xlane.f32.xlu0 %v1021_v44 }
 0x67a   : > { %v2213_v45 = vpop.f32.mrf.mxu0 }
 0x702   : > { %v1023_v46 = vpop.xlane.xlu0 %1022 }
 0x703   : > { %v1024_v47 = vsub.f32 %v1020_v42, %v1023_v46 }
 0x705   : > { %v1025_v48 = vmul.f32 1.442695, %v1024_v47 }
 0x707   : > { %2415 = vpow2.f32 %v1025_v48 }
 0x714   : > { %v2416_v49 = vpop.eup %2415 }
 0x715   : > { %v1027_v50 = vsel %vm702_vm4, %v2416_v49, 0.0 }
 0x716   : > { %1028 = vadd.xlane.f32.xlu0 %v1027_v50 }
 0x72c   : > { %1033 = vrot.lane.b32.xlu0 %v2765_v55, %s2541_s19 }
 0x730   : > { %1133 = vrot.lane.b32.xlu0 %v2763_v54, %s2542_s27 }
 0x79f   : > { %v1029_v51 = vpop.xlane.xlu0 %1028 }
 0x7a0   : > { %2417 = vrcp.f32 %v1029_v51 }
 0x7a3   : > { %v1034_v52 = vpop.permute.xlu0 %1033 }
 0x7a4   : > { %v1039_v53 = vsel %vm719_vm1, %v1034_v52, 0 }
 0x7a5   : > { %2215 = vmatpush3.bf16.msra.mxu1 %v1039_v53 }
 0x7a6   : > { %2226 = vmatprep.subr.bf16.mxu1 %v2537_v3 }
 0x7a7   : > { %v1134_v59 = vpop.permute.xlu0 %1133 }
 0x7ad   : > { %v2418_v56 = vpop.eup %2417 }
 0x7ae   : > { %v1031_v57 = vmul.f32 %v2418_v56, %v2416_v49 }
 0x7b0   : > { %v1032_v58 = vpack.c.bf16 %v1031_v57, %v1031_v57 }
 0x7b2   : > { %2217 = vmatmul.mubr.msk.bf16.vlgmr.msra.gmra.mxu1 %vm702_vm4, %v1032_v58 }
 0x7b3   : > { %2227 = vmatpush3.bf16.msra.mxu1 %v1132_v12  ;;  %2228 = vmatprep.mubr.msk.bf16.mxu1 %vm2539_vm0, %v2537_v3 }
 0x7b4   : > { %2238 = vmatprep.subr.bf16.mxu1 %v2537_v3 }
 0x7ba   : > { %2229 = vmatmul.mubr.msk.bf16.vlgmr.msra.gmra.mxu1 %vm656_vm2, %v1134_v59 }
 0x7bb   : > { %2240 = vmatprep.mubr.msk.bf16.mxu1 %vm2539_vm0, %v2537_v3  ;;  %2239 = vmatpush3.bf16.msra.mxu1 %v2400_v40 }
 0x7bc   : > { %2250 = vmatprep.subr.bf16.mxu1 %v2537_v3 }
 0x872   : > { %v1075_v10 = vpop.f32.mrf.mxu1 }
 0x873   : > { %v1081_v11 = vpack.c.bf16 %v1075_v10, %v1075_v10 }
 0x874   : > { %v2218_v12 = vpop.f32.mrf.mxu1 }
 0x875   : > { %2223 = vmatmul.mubr.msk.bf16.vlgmr.msra.gmra.mxu0 %vm656_vm2, %v1081_v11 }
 0x876   : > { %v1078_v61 = vpop.f32.mrf.mxu1  ;;  %2234 = vmatprep.mubr.msk.bf16.mxu0 %vm2539_vm0, %v2537_v3 }
 0x878   : > { %v2219_v62 = vpop.f32.mrf.mxu1 }
 0x87a   : > { %v1172_v63 = vpop.f32.mrf.mxu1 }
 0x87b   : > { %v1178_v0 = vmul.f32 0.25, %v1172_v63 }
 0x87c   : > { %v2230_v1 = vpop.f32.mrf.mxu1 }
 0x87d   : > { %v1179_v2 = vsel %vm2820_vm3, %v1178_v0, -inf }
 0x87e   : > { %v1175_v4 = vpop.f32.mrf.mxu1  ;;  %v1180_v5 = vsel %vm702_vm4, %v1179_v2, -inf }
 0x87f   : > { %1181 = vmax.xlane.f32.xlu0 %v1180_v5 }
 0x880   : > { %v2231_v6 = vpop.f32.mrf.mxu1 }
 0x895   : > { %1192 = vrot.lane.b32.xlu0 %v2765_v55, %s2542_s27  ;;  %s311_s27 = scalar_lea.vmem %s3028_s7, %s2032_s23 }
 0x899   : > { %1292 = vrot.lane.b32.xlu0 %v2763_v54, %s2543_s8 }
 0x908   : > { %v1182_v7 = vpop.xlane.xlu0 %1181 }
 0x909   : > { %v1183_v25 = vsub.f32 %v1179_v2, %v1182_v7  ;;  %v2401_v2 = vld [vmem:[%s3024_s3 + $0x20] sm:$0xff]  }
 0x90b   : > { %v1184_v26 = vmul.f32 1.442695, %v1183_v25 }
 0x90c   : > { %v1193_v28 = vpop.permute.xlu0 %1192 }
 0x90d   : > { %2419 = vpow2.f32 %v1184_v26  ;;  %v1198_v29 = vsel %vm719_vm1, %v1193_v28, 0 }
 0x90e   : > { %2233 = vmatpush3.bf16.msra.mxu0 %v1198_v29 }
 0x90f   : > { %2244 = vmatprep.subr.bf16.mxu0 %v2537_v3 }
 0x91a   : > { %v2420_v30 = vpop.eup %2419 }
 0x91b   : > { %v1186_v31 = vsel %vm702_vm4, %v2420_v30, 0.0 }
 0x91c   : > { %1187 = vadd.xlane.f32.xlu1 %v1186_v31 }
 0x935   : > { %v1125_v32 = vpop.f32.mrf.mxu0 }
 0x936   : > { %v1131_v33 = vadd.f32 %v1125_v32, %v2862_v35  ;;  %v1293_v35 = vpop.permute.xlu0 %1292 }
 0x937   : > { %v2224_v8 = vpop.f32.mrf.mxu0 }
 0x939   : > { %v1128_v9 = vpop.f32.mrf.mxu0 }
 0x93b   : > { %v2225_v34 = vpop.f32.mrf.mxu0 }
 0x9a5   : > { %v1188_v36 = vpop.xlane.xlu1 %1187 }
 0x9a6   : > { %2421 = vrcp.f32 %v1188_v36 }
 0x9b3   : > { %v2422_v37 = vpop.eup %2421 }
 0x9b4   : > { %v1190_v38 = vmul.f32 %v2422_v37, %v2420_v30 }
 0x9b6   : > { %v1191_v39 = vpack.c.bf16 %v1190_v38, %v1190_v38 }
 0x9b8   : > { %2235 = vmatmul.mubr.msk.bf16.vlgmr.msra.gmra.mxu0 %vm702_vm4, %v1191_v39 }
 0x9b9   : > { %2245 = vmatpush3.bf16.msra.mxu0 %v1291_v15  ;;  %2246 = vmatprep.mubr.msk.bf16.mxu0 %vm2539_vm0, %v2537_v3 }
 0x9ba   : > { %2256 = vmatprep.subr.bf16.mxu0 %v2537_v3 }
 0x9c0   : > { %2247 = vmatmul.mubr.msk.bf16.vlgmr.msra.gmra.mxu0 %vm656_vm2, %v1293_v35 }
 0x9c1   : > { %2258 = vmatprep.mubr.msk.bf16.mxu0 %vm2539_vm0, %v2537_v3  ;;  %2257 = vmatpush3.bf16.msra.mxu0 %v2401_v2 }
 0x9c2   : > { %2268 = vmatprep.subr.bf16.mxu0 %v2537_v3 }
 0xa78   : > { %v1234_v13 = vpop.f32.mrf.mxu0 }
 0xa79   : > { %v1240_v14 = vpack.c.bf16 %v1234_v13, %v1234_v13 }
 0xa7a   : > { %v2236_v15 = vpop.f32.mrf.mxu0 }
 0xa7b   : > { %2241 = vmatmul.mubr.msk.bf16.vlgmr.msra.gmra.mxu1 %vm656_vm2, %v1240_v14 }
 0xa7c   : > { %v1237_v41 = vpop.f32.mrf.mxu0  ;;  %2252 = vmatprep.mubr.msk.bf16.mxu1 %vm2539_vm0, %v2537_v3 }
 0xa7e   : > { %v2237_v42 = vpop.f32.mrf.mxu0 }
 0xa80   : > { %v1331_v43 = vpop.f32.mrf.mxu0 }
 0xa81   : > { %v1337_v44 = vmul.f32 0.25, %v1331_v43  ;;  %v2402_v43 = vld [vmem:[%s3024_s3 + $0x28] sm:$0xff]  }
 0xa82   : > { %v2248_v45 = vpop.f32.mrf.mxu0 }
 0xa83   : > { %v1338_v46 = vsel %vm2820_vm3, %v1337_v44, -inf }
 0xa84   : > { %v1334_v47 = vpop.f32.mrf.mxu0  ;;  %v1339_v48 = vsel %vm702_vm4, %v1338_v46, -inf }
 0xa85   : > { %1340 = vmax.xlane.f32.xlu0 %v1339_v48 }
 0xa86   : > { %v2249_v49 = vpop.f32.mrf.mxu0 }
 0xb0e   : > { %v1341_v50 = vpop.xlane.xlu0 %1340 }
 0xb0f   : > { %v1342_v51 = vsub.f32 %v1338_v46, %v1341_v50 }
 0xb11   : > { %v1343_v52 = vmul.f32 1.442695, %v1342_v51 }
 0xb13   : > { %2423 = vpow2.f32 %v1343_v52 }
 0xb20   : > { %v2424_v53 = vpop.eup %2423 }
 0xb21   : > { %v1345_v56 = vsel %vm702_vm4, %v2424_v53, 0.0 }
 0xb22   : > { %1346 = vadd.xlane.f32.xlu1 %v1345_v56 }
 0xb33   : > { %1351 = vrot.lane.b32.xlu1 %v2765_v55, %s2543_s8 }
 0xb37   : > { %1451 = vrot.lane.b32.xlu1 %v2763_v54, %s2544_s11 }
 0xb3b   : > { %v1284_v57 = vpop.f32.mrf.mxu1 }
 0xb3c   : > { %v1290_v58 = vadd.f32 %v1284_v57, %v1131_v33 }
 0xb3d   : > { %v2242_v59 = vpop.f32.mrf.mxu1 }
 0xb3f   : > { %v1287_v60 = vpop.f32.mrf.mxu1 }
 0xb41   : > { %v2243_v10 = vpop.f32.mrf.mxu1 }
 0xbab   : > { %v1347_v11 = vpop.xlane.xlu1 %1346 }
 0xbac   : > { %2425 = vrcp.f32 %v1347_v11 }
 0xbaf   : > { %v1352_v12 = vpop.permute.xlu1 %1351 }
 0xbb0   : > { %v1357_v61 = vsel %vm719_vm1, %v1352_v12, 0 }
 0xbb1   : > { %2251 = vmatpush3.bf16.msra.mxu1 %v1357_v61 }
 0xbb2   : > { %2262 = vmatprep.subr.bf16.mxu1 %v2537_v3 }
 0xbb3   : > { %v1452_v1 = vpop.permute.xlu1 %1451 }
 0xbb9   : > { %v2426_v62 = vpop.eup %2425 }
 0xbba   : > { %v1349_v63 = vmul.f32 %v2426_v62, %v2424_v53 }
 0xbbc   : > { %v1350_v0 = vpack.c.bf16 %v1349_v63, %v1349_v63 }
 0xbbe   : > { %2253 = vmatmul.mubr.msk.bf16.vlgmr.msra.gmra.mxu1 %vm702_vm4, %v1350_v0 }
 0xbbf   : > { %2263 = vmatpush3.bf16.msra.mxu1 %v1450_v18  ;;  %2264 = vmatprep.mubr.msk.bf16.mxu1 %vm2539_vm0, %v2537_v3 }
 0xbc0   : > { %2274 = vmatprep.subr.bf16.mxu1 %v2537_v3 }
 0xbc6   : > { %2265 = vmatmul.mubr.msk.bf16.vlgmr.msra.gmra.mxu1 %vm656_vm2, %v1452_v1 }
 0xbc7   : > { %2276 = vmatprep.mubr.msk.bf16.mxu1 %vm2539_vm0, %v2537_v3  ;;  %2275 = vmatpush3.bf16.msra.mxu1 %v2402_v43 }
 0xbc8   : > { %2286 = vmatprep.subr.bf16.mxu1 %v2537_v3 }
 0xc7e   : > { %v1393_v16 = vpop.f32.mrf.mxu1 }
 0xc7f   : > { %v1399_v17 = vpack.c.bf16 %v1393_v16, %v1393_v16 }
 0xc80   : > { %v2254_v18 = vpop.f32.mrf.mxu1 }
 0xc81   : > { %2259 = vmatmul.mubr.msk.bf16.vlgmr.msra.gmra.mxu0 %vm656_vm2, %v1399_v17  ;;  %v2403_v17 = vld [vmem:[%s3024_s3 + $0x30] sm:$0xff]  }
 0xc82   : > { %v1396_v4 = vpop.f32.mrf.mxu1  ;;  %2270 = vmatprep.mubr.msk.bf16.mxu0 %vm2539_vm0, %v2537_v3 }
 0xc84   : > { %v2255_v5 = vpop.f32.mrf.mxu1 }
 0xc86   : > { %v1490_v6 = vpop.f32.mrf.mxu1 }
 0xc87   : > { %v1496_v7 = vmul.f32 0.25, %v1490_v6 }
 0xc88   : > { %v2266_v25 = vpop.f32.mrf.mxu1 }
 0xc89   : > { %v1497_v26 = vsel %vm2820_vm3, %v1496_v7, -inf }
 0xc8a   : > { %v1493_v28 = vpop.f32.mrf.mxu1  ;;  %v1498_v29 = vsel %vm702_vm4, %v1497_v26, -inf }
 0xc8b   : > { %1499 = vmax.xlane.f32.xlu0 %v1498_v29 }
 0xc8c   : > { %v2267_v30 = vpop.f32.mrf.mxu1 }
 0xca1   : > { %1510 = vrot.lane.b32.xlu0 %v2765_v55, %s2544_s11 }
 0xca5   : > { %1610 = vrot.lane.b32.xlu0 %v2763_v54, %s2545_s14 }
 0xd14   : > { %v1500_v31 = vpop.xlane.xlu0 %1499 }
 0xd15   : > { %v1501_v32 = vsub.f32 %v1497_v26, %v1500_v31 }
 0xd17   : > { %v1502_v33 = vmul.f32 1.442695, %v1501_v32 }
 0xd18   : > { %v1511_v8 = vpop.permute.xlu0 %1510 }
 0xd19   : > { %2427 = vpow2.f32 %v1502_v33  ;;  %v1516_v9 = vsel %vm719_vm1, %v1511_v8, 0 }
 0xd1a   : > { %2269 = vmatpush3.bf16.msra.mxu0 %v1516_v9 }
 0xd1b   : > { %2280 = vmatprep.subr.bf16.mxu0 %v2537_v3 }
 0xd1c   : > { %v1611_v42 = vpop.permute.xlu0 %1610 }
 0xd26   : > { %v2428_v34 = vpop.eup %2427 }
 0xd27   : > { %v1504_v36 = vsel %vm702_vm4, %v2428_v34, 0.0 }
 0xd28   : > { %1505 = vadd.xlane.f32.xlu1 %v1504_v36 }
 0xd41   : > { %v1443_v37 = vpop.f32.mrf.mxu0 }
 0xd42   : > { %v1449_v38 = vadd.f32 %v1443_v37, %v1290_v58 }
 0xd43   : > { %v2260_v39 = vpop.f32.mrf.mxu0 }
 0xd45   : > { %v1446_v35 = vpop.f32.mrf.mxu0 }
 0xd47   : > { %v2261_v40 = vpop.f32.mrf.mxu0 }
 0xdb1   : > { %v1506_v13 = vpop.xlane.xlu1 %1505 }
 0xdb2   : > { %2429 = vrcp.f32 %v1506_v13  ;;  %v2404_v13 = vld [vmem:[%s3024_s3 + $0x38] sm:$0xff]  }
 0xdbf   : > { %v2430_v14 = vpop.eup %2429 }
 0xdc0   : > { %v1508_v15 = vmul.f32 %v2430_v14, %v2428_v34 }
 0xdc2   : > { %v1509_v41 = vpack.c.bf16 %v1508_v15, %v1508_v15 }
 0xdc4   : > { %2271 = vmatmul.mubr.msk.bf16.vlgmr.msra.gmra.mxu0 %vm702_vm4, %v1509_v41 }
 0xdc5   : > { %2281 = vmatpush3.bf16.msra.mxu0 %v1609_v21  ;;  %2282 = vmatprep.mubr.msk.bf16.mxu0 %vm2539_vm0, %v2537_v3 }
 0xdc6   : > { %2292 = vmatprep.subr.bf16.mxu0 %v2537_v3 }
 0xdcc   : > { %2283 = vmatmul.mubr.msk.bf16.vlgmr.msra.gmra.mxu0 %vm656_vm2, %v1611_v42 }
 0xdcd   : > { %2294 = vmatprep.mubr.msk.bf16.mxu0 %vm2539_vm0, %v2537_v3  ;;  %2293 = vmatpush3.bf16.msra.mxu0 %v2403_v17 }
 0xdce   : > { %2304 = vmatprep.subr.bf16.mxu0 %v2537_v3 }
 0xe84   : > { %v1552_v19 = vpop.f32.mrf.mxu0 }
 0xe85   : > { %v1558_v20 = vpack.c.bf16 %v1552_v19, %v1552_v19 }
 0xe86   : > { %v2272_v21 = vpop.f32.mrf.mxu0 }
 0xe87   : > { %2277 = vmatmul.mubr.msk.bf16.vlgmr.msra.gmra.mxu1 %vm656_vm2, %v1558_v20  ;;  %v2092_v21 = vld [vmem:[#allocation2] ss:$0 sm:$0xff] }
 0xe88   : > { %v1555_v44 = vpop.f32.mrf.mxu0  ;;  %2288 = vmatprep.mubr.msk.bf16.mxu1 %vm2539_vm0, %v2537_v3 }
 0xe8a   : > { %v2273_v45 = vpop.f32.mrf.mxu0 }
 0xe8b   : > { %v2439_v45 = vld [vmem:[%s2664_s28] sm:$0xff] }
 0xe8c   : > { %v1649_v46 = vpop.f32.mrf.mxu0 }
 0xe8d   : > { %v1655_v47 = vmul.f32 0.25, %v1649_v46 }
 0xe8e   : > { %v2284_v48 = vpop.f32.mrf.mxu0 }
 0xe8f   : > { %v1656_v49 = vsel %vm2820_vm3, %v1655_v47, -inf }
 0xe90   : > { %v1652_v50 = vpop.f32.mrf.mxu0  ;;  %v1657_v51 = vsel %vm702_vm4, %v1656_v49, -inf }
 0xe91   : > { %1658 = vmax.xlane.f32.xlu0 %v1657_v51 }
 0xe92   : > { %v2285_v52 = vpop.f32.mrf.mxu0 }
 0xf1a   : > { %v1659_v53 = vpop.xlane.xlu0 %1658 }
 0xf1b   : > { %v1660_v56 = vsub.f32 %v1656_v49, %v1659_v53 }
 0xf1d   : > { %v1661_v57 = vmul.f32 1.442695, %v1660_v56 }
 0xf1f   : > { %2431 = vpow2.f32 %v1661_v57 }
 0xf2c   : > { %v2432_v58 = vpop.eup %2431 }
 0xf2d   : > { %v1663_v59 = vsel %vm702_vm4, %v2432_v58, 0.0 }
 0xf2e   : > { %1664 = vadd.xlane.f32.xlu1 %v1663_v59 }
 0xf3f   : > { %1669 = vrot.lane.b32.xlu1 %v2765_v55, %s2545_s14 }
 0xf43   : > { %1769 = vrot.lane.b32.xlu1 %v2763_v54, %s2546_s17 }
 0xf47   : > { %v1602_v60 = vpop.f32.mrf.mxu1 }
 0xf48   : > { %v1608_v10 = vadd.f32 %v1602_v60, %v1449_v38 }
 0xf49   : > { %v2278_v11 = vpop.f32.mrf.mxu1 }
 0xf4b   : > { %v1605_v12 = vpop.f32.mrf.mxu1 }
 0xf4d   : > { %v2279_v61 = vpop.f32.mrf.mxu1 }
 0xfb7   : > { %v1665_v62 = vpop.xlane.xlu1 %1664 }
 0xfb8   : > { %2433 = vrcp.f32 %v1665_v62 }
 0xfbb   : > { %v1670_v63 = vpop.permute.xlu1 %1669 }
 0xfbc   : > { %v1675_v0 = vsel %vm719_vm1, %v1670_v63, 0 }
 0xfbd   : > { %2287 = vmatpush3.bf16.msra.mxu1 %v1675_v0 }
 0xfbe   : > { %2298 = vmatprep.subr.bf16.mxu1 %v2537_v3 }
 0xfbf   : > { %v1770_v54 = vpop.permute.xlu1 %1769 }
 0xfc5   : > { %v2434_v1 = vpop.eup %2433 }
 0xfc6   : > { %v1667_v2 = vmul.f32 %v2434_v1, %v2432_v58 }
 0xfc8   : > { %v1668_v16 = vpack.c.bf16 %v1667_v2, %v1667_v2 }
 0xfca   : > { %2289 = vmatmul.mubr.msk.bf16.vlgmr.msra.gmra.mxu1 %vm702_vm4, %v1668_v16 }
 0xfcb   : > { %2299 = vmatpush3.bf16.msra.mxu1 %v1768_v24  ;;  %2300 = vmatprep.mubr.msk.bf16.mxu1 %vm2539_vm0, %v2537_v3 }
 0xfcc   : > { %2310 = vmatprep.subr.bf16.mxu1 %v2537_v3 }
 0xfd2   : > { %2301 = vmatmul.mubr.msk.bf16.vlgmr.msra.gmra.mxu1 %vm656_vm2, %v1770_v54 }
 0xfd3   : > { %2312 = vmatprep.mubr.msk.bf16.mxu1 %vm2539_vm0, %v2537_v3  ;;  %2311 = vmatpush3.bf16.msra.mxu1 %v2404_v13 }
0x108a   : > { %v1711_v22 = vpop.f32.mrf.mxu1 }
0x108b   : > { %v1717_v23 = vpack.c.bf16 %v1711_v22, %v1711_v22 }
0x108c   : > { %v2290_v24 = vpop.f32.mrf.mxu1 }
0x108d   : > { %2295 = vmatmul.mubr.msk.bf16.vlgmr.msra.gmra.mxu0 %vm656_vm2, %v1717_v23 }
0x108e   : > { %v1714_v18 = vpop.f32.mrf.mxu1  ;;  %2306 = vmatprep.mubr.msk.bf16.mxu0 %vm2539_vm0, %v2537_v3 }
0x1090   : > { %v2291_v4 = vpop.f32.mrf.mxu1 }
0x1092   : > { %v1808_v5 = vpop.f32.mrf.mxu1 }
0x1093   : > { %v1814_v6 = vmul.f32 0.25, %v1808_v5 }
0x1094   : > { %v2302_v7 = vpop.f32.mrf.mxu1 }
0x1095   : > { %v1815_v25 = vsel %vm2820_vm3, %v1814_v6, -inf }
0x1096   : > { %v1811_v26 = vpop.f32.mrf.mxu1  ;;  %v1816_v28 = vsel %vm702_vm4, %v1815_v25, -inf }
0x1097   : > { %1817 = vmax.xlane.f32.xlu0 %v1816_v28 }
0x1098   : > { %v2303_v29 = vpop.f32.mrf.mxu1 }
0x10ad   : > { %1828 = vrot.lane.b32.xlu0 %v2765_v55, %s2546_s17 }
0x1120   : > { %v1818_v30 = vpop.xlane.xlu0 %1817 }
0x1121   : > { %v1819_v31 = vsub.f32 %v1815_v25, %v1818_v30 }
0x1123   : > { %v1820_v32 = vmul.f32 1.442695, %v1819_v31 }
0x1124   : > { %v1829_v33 = vpop.permute.xlu0 %1828 }
0x1125   : > { %2435 = vpow2.f32 %v1820_v32  ;;  %v1834_v3 = vsel %vm719_vm1, %v1829_v33, 0 }
0x1126   : > { %2305 = vmatpush3.bf16.msra.mxu0 %v1834_v3 }
0x1132   : > { %v2436_v8 = vpop.eup %2435 }
0x1133   : > { %v1822_v27 = vsel %vm702_vm4, %v2436_v8, 0.0 }
0x1134   : > { %1823 = vadd.xlane.f32.xlu1 %v1822_v27 }
0x114d   : > { %v1761_v9 = vpop.f32.mrf.mxu0 }
0x114e   : > { %v1767_v34 = vadd.f32 %v1761_v9, %v1608_v10 }
0x114f   : > { %v2296_v36 = vpop.f32.mrf.mxu0 }
0x1151   : > { %v1764_v37 = vpop.f32.mrf.mxu0 }
0x1153   : > { %v2297_v38 = vpop.f32.mrf.mxu0 }
0x11bd   : > { %v1824_v39 = vpop.xlane.xlu1 %1823 }
0x11be   : > { %2437 = vrcp.f32 %v1824_v39 }
0x11cb   : > { %v2438_v55 = vpop.eup %2437 }
0x11cc   : > { %v1826_v35 = vmul.f32 %v2438_v55, %v2436_v8 }
0x11ce   : > { %v1827_v40 = vpack.c.bf16 %v1826_v35, %v1826_v35 }
0x11d0   : > { %2307 = vmatmul.mubr.msk.bf16.vlgmr.msra.gmra.mxu0 %vm702_vm4, %v1827_v40 }
0x1290   : > { %v1870_v14 = vpop.f32.mrf.mxu0 }
0x1291   : > { %v1876_v15 = vpack.c.bf16 %v1870_v14, %v1870_v14 }
0x1292   : > { %v2308_v41 = vpop.f32.mrf.mxu0 }
0x1293   : > { %2313 = vmatmul.mubr.msk.bf16.vlgmr.msra.gmra.mxu1 %vm656_vm2, %v1876_v15 }
0x1294   : > { %v1873_v42 = vpop.f32.mrf.mxu0 }
0x1296   : > { %v2309_v43 = vpop.f32.mrf.mxu0 }
0x1353   : > { %v1920_v19 = vpop.f32.mrf.mxu1 }
0x1354   : > { %v1926_v20 = vadd.f32 %v1920_v19, %v1767_v34 }
0x1355   : > { %v2314_v44 = vpop.f32.mrf.mxu1 }
0x1356   : > { %v1927_v46 = vadd.f32 %v2439_v45, %v1926_v20 }
0x1357   : > { %v1923_v47 = vpop.f32.mrf.mxu1 }
0x1358   : > { %v1935_v48 = vadd.f32 %v2092_v21, %v1927_v46 }
0x1359   : > { %v2315_v49 = vpop.f32.mrf.mxu1 }
0x135a   : > { %1936 = vst [vmem:[%s311_s27] sm:$0xff] %v1935_v48 }
0x135b PF: > { %s19_s24 = sadd.s32 1, %s2532_s24  }
0x135c   : > { %p16_p3 = scmp.ge.s32.totalorder %s19_s24, 4  }
0x135e   :  { %18 = sbr.rel (!%p16_p3) target bundleno = 2 (0x2), region = 91 }
0x1363   :  { %1956 = vsyncpa [#allocation3], 1 }
0x1364   :  { %1958 = vsyncpa [#allocation3 + $0x1], 1 }
0x1365   :  { %1959 = vsyncpa [#allocation5], 1 }

// kernel: transformer_forward.23
= control target key start
LH: loop header
LB: loop body
LE: loop exit
PB: predicated region body
PF: predicated region fallthrough
CT: control target
= control target key end

     0   :  { %v187_v0 = vmov 0.0   ;;  %vm188_vm0 = vmmov 0   ;;  %vm132_vm1 = vcmask 31744   ;;  %s248_s1 = inlined_call_operand.vmem [shape: bf16[128,4], index: 1, kind: input, shape index: {}]   ;;  %s249_s0 = inlined_call_operand.vmem [shape: f32[16,128], index: 0, kind: input, shape index: {}]   ;;  %s250_s2 = inlined_call_operand.vmem [shape: f32[1,4], index: 2, kind: input, shape index: {}]   ;;  %s251_s3 = inlined_call_operand.vmem [shape: f32[16,4], index: 3, kind: output, shape index: {}]  }
   0x1   :  { %157 = vmatprep.subr.bf16.mxu0 %v187_v0  ;;  %v179_v1 = vld [vmem:[%s248_s1 + $0x38] sm:$0xff]   ;;  %173 = vmatprep.mubr.msk.bf16.mxu0 %vm188_vm0, %v187_v0  ;;  %v180_v2 = vld [vmem:[%s248_s1 + $0x30] sm:$0xff]   ;;  %v181_v3 = vld [vmem:[%s248_s1 + $0x28] sm:$0xff]  }
   0x2   :  { %158 = vmatpush3.bf16.msra.mxu0 %v179_v1  ;;  %v182_v4 = vld [vmem:[%s248_s1 + $0x20] sm:$0xff]   ;;  %v183_v5 = vld [vmem:[%s248_s1 + $0x18] sm:$0xff]   ;;  %v184_v6 = vld [vmem:[%s248_s1 + $0x10] sm:$0xff]  }
   0x3   :  { %159 = vmatprep.subr.bf16.mxu0 %v187_v0  ;;  %v185_v7 = vld [vmem:[%s248_s1 + $0x8] sm:$0xff]   ;;  %v186_v8 = vld [vmem:[%s248_s1] sm:$0xff]  }
   0x4   :  { %v15_v9 = vld [vmem:[%s249_s0] sm:$0xff]  ;;  %v16_v10 = vld [vmem:[%s249_s0 + $0x8] sm:$0xff] }
   0x5   :  { %v17_v11 = vpack.c.bf16 %v16_v10, %v15_v9  ;;  %v139_v12 = vld [vmem:[%s250_s2] ss:$0 sm:$0xff] }
   0x6   :  { %160 = vmatpush3.bf16.msra.mxu0 %v180_v2 }
   0x7   :  { %161 = vmatprep.subr.bf16.mxu0 %v187_v0 }
   0xa   :  { %162 = vmatpush3.bf16.msra.mxu0 %v181_v3 }
   0xb   :  { %163 = vmatprep.subr.bf16.mxu0 %v187_v0 }
   0xe   :  { %164 = vmatpush3.bf16.msra.mxu0 %v182_v4 }
   0xf   :  { %165 = vmatprep.subr.bf16.mxu0 %v187_v0 }
  0x12   :  { %166 = vmatpush3.bf16.msra.mxu0 %v183_v5 }
  0x13   :  { %167 = vmatprep.subr.bf16.mxu0 %v187_v0 }
  0x16   :  { %168 = vmatpush3.bf16.msra.mxu0 %v184_v6 }
  0x17   :  { %169 = vmatprep.subr.bf16.mxu0 %v187_v0 }
  0x1a   :  { %170 = vmatpush3.bf16.msra.mxu0 %v185_v7 }
  0x1b   :  { %171 = vmatprep.subr.bf16.mxu0 %v187_v0 }
  0x1e   :  { %172 = vmatpush3.bf16.msra.mxu0 %v186_v8 }
  0x21   :  { %174 = vmatmul.mubr.bf16.vlgmr.msra.gmra.mxu0 %v17_v11 }
  0xe1   :  { %v123_v13 = vpop.f32.mrf.mxu0 }
  0xe2   :  { %v124_v14 = vadd.f32 %v139_v12, %v123_v13 }
  0xe3   :  { %v175_v15 = vpop.f32.mrf.mxu0 }
  0xe4   :  { %v130_v16 = vmax.f32 %v124_v14, 0.0 }
  0xe5   :  { %v126_v17 = vpop.f32.mrf.mxu0 }
  0xe6   :  { %133 = vst.msk [vmem:[%s251_s3] sm:$0xff] %vm132_vm1, %v130_v16  ;;  %v127_v18 = vadd.f32 %v139_v12, %v126_v17 }
  0xe7   :  { %v176_v19 = vpop.f32.mrf.mxu0 }
  0xe8   :  { %v131_v20 = vmax.f32 %v127_v18, 0.0 }
  0xea   :  { %134 = vst.msk [vmem:[%s251_s3 + $0x8] sm:$0xff] %vm132_vm1, %v131_v20 }

// kernel: transformer_forward.15
= control target key start
LH: loop header
LB: loop body
LE: loop exit
PB: predicated region body
PF: predicated region fallthrough
CT: control target
= control target key end

     0   :  { %s2392_s24 = smov 0   ;;  %s2774_s0 = inlined_call_operand.vmem [shape: f32[2,8,128], index: 0, kind: input, shape index: {}]   ;;  %s2775_s1 = inlined_call_operand.vmem [shape: bf16[128,384], index: 1, kind: input, shape index: {}]   ;;  %s2776_s2 = inlined_call_operand.vmem [shape: f32[1,384], index: 2, kind: input, shape index: {}]   ;;  %s2777_s3 = inlined_call_operand.vmem [shape: bf16[128,128], index: 3, kind: input, shape index: {}]   ;;  %s2778_s4 = inlined_call_operand.vmem [shape: f32[1,128], index: 4, kind: input, shape index: {}]   ;;  %s2779_s5 = inlined_call_operand.vmem [shape: f32[1,128], index: 5, kind: input, shape index: {}]   ;;  %s2780_s6 = inlined_call_operand.vmem [shape: f32[1,128], index: 6, kind: input, shape index: {}]   ;;  %s2781_s7 = inlined_call_operand.vmem [shape: f32[2,8,128], index: 7, kind: output, shape index: {}]  }
   0x1 LB: > { %s1952_s25 = sadd.s32 4294967295, %s2340_s24   ;;  %p1956_p0 = scmp.ge.s32.totalorder %s2340_s24, 1  ;;  %s2340_s24 = sphi %s2392_s24, %s17_s24  }
   0x2   : > { %p236_p1 = scmp.lt.s32.totalorder %s2340_s24, 3 }
   0x4   : > { %p237_p2 = pnand %p1956_p0, %p236_p1 }
   0x5   : > { %p266_p3 = scmp.lt.s32.totalorder (!%p237_p2), %s1952_s25, 1  ;;  %s2345_s23 = smov (!%p237_p2), 112  }
   0x6   : > { %240 = sbr.rel (%p237_p2) target bundleno = 4911 (0x132f), region = 48  ;;  %s2346_s27 = smov (!%p237_p2), 96  }
   0x7   : > { %s2347_s10 = smov (!%p237_p2), 80   ;;  %s2348_s13 = smov (!%p237_p2), 64  }
   0x8   : > { %s2349_s16 = smov (!%p237_p2), 48   ;;  %s2350_s19 = smov (!%p237_p2), 32  }
   0x9   : > { %s2351_s22 = smov (!%p237_p2), 16  }
   0xb   : > { %s2785_s25 = smov (!%p266_p3, %s1952_s25), 1  ;;  %v2259_v1 = vld [vmem:[%s2775_s1 + $0xac] ss:$12 sps:$4 sm:$0xff]   ;;  %v2261_v2 = vld [vmem:[%s2775_s1 + $0xa8] ss:$12 sps:$4 sm:$0xff]   ;;  %v2342_v3 = vmov 0.0   ;;  %v339_v41 = vlaneseq }
   0xc   : > { %s1957_s26 = sshll.u32 %s2785_s25, 3  ;;  %2077 = vmatprep.subr.bf16.mxu1 %v2342_v3  ;;  %v2262_v4 = vld [vmem:[%s2775_s1 + $0xb0] ss:$12 sps:$4 sm:$0xff]   ;;  %v2263_v5 = vld [vmem:[%s2775_s1 + $0x94] ss:$12 sps:$4 sm:$0xff]   ;;  %482 = vmatprep.subr.bf16.mxu0 %v2259_v1  ;;  %v2343_v22 = vmov 0  }
   0xd   : > { %s2408_s29 = scalar_lea.vmem %s2774_s0, %s1957_s26  ;;  %483 = vmatpush1.bf16.msra.mxu0 %v2261_v2  ;;  %2078 = vmatpush3.bf16.msra.mxu1 %v2262_v4  ;;  %v2265_v6 = vld [vmem:[%s2775_s1 + $0x90] ss:$12 sps:$4 sm:$0xff]   ;;  %v2266_v7 = vld [vmem:[%s2775_s1 + $0x98] ss:$12 sps:$4 sm:$0xff]   ;;  %v2270_v14 = vld [vmem:[%s2775_s1 + $0x80] ss:$12 sps:$4 sm:$0xff]   ;;  %s273_s12 = scalar_lea.vmem %s2781_s7, %s1957_s26 }
   0xe   : > { %v275_v0 = vld [vmem:[%s2408_s29] sm:$0xff]  ;;  %484 = vmatprep.subr.bf16.mxu0 %v2263_v5  ;;  %2079 = vmatprep.subr.bf16.mxu1 %v2342_v3  ;;  %v2267_v12 = vld [vmem:[%s2775_s1 + $0x7c] ss:$12 sps:$4 sm:$0xff]   ;;  %v2275_v18 = vld [vmem:[%s2775_s1 + $0x4c] ss:$12 sps:$4 sm:$0xff]   ;;  %vm2344_vm0 = vmmov 0  }
   0xf   : > { %278 = vadd.xlane.f32.xlu0 %v275_v0  ;;  %v2269_v13 = vld [vmem:[%s2775_s1 + $0x78] ss:$12 sps:$4 sm:$0xff]   ;;  %v2273_v16 = vld [vmem:[%s2775_s1 + $0x60] ss:$12 sps:$4 sm:$0xff]   ;;  %v2274_v17 = vld [vmem:[%s2775_s1 + $0x68] ss:$12 sps:$4 sm:$0xff]   ;;  %514 = vmatprep.mubr.bf16.mxu0 %v2343_v22 }
  0x10   : > { %v2271_v15 = vld [vmem:[%s2775_s1 + $0x64] ss:$12 sps:$4 sm:$0xff]   ;;  %v2277_v19 = vld [vmem:[%s2775_s1 + $0x48] ss:$12 sps:$4 sm:$0xff]   ;;  %2093 = vmatprep.mubr.msk.bf16.mxu1 %vm2344_vm0, %v2342_v3  ;;  %v2286_v27 = vld [vmem:[%s2775_s1 + $0x20] ss:$12 sps:$4 sm:$0xff]  }
  0x11   : > { %485 = vmatpush1.bf16.msra.mxu0 %v2265_v6  ;;  %2080 = vmatpush3.bf16.msra.mxu1 %v2266_v7  ;;  %v2278_v20 = vld [vmem:[%s2775_s1 + $0x50] ss:$12 sps:$4 sm:$0xff]   ;;  %v2279_v21 = vld [vmem:[%s2775_s1 + $0x34] ss:$12 sps:$4 sm:$0xff]   ;;  %v2282_v24 = vld [vmem:[%s2775_s1 + $0x38] ss:$12 sps:$4 sm:$0xff]  }
  0x12   : > { %2081 = vmatprep.subr.bf16.mxu1 %v2342_v3  ;;  %486 = vmatprep.subr.bf16.mxu0 %v2267_v12  ;;  %v2281_v23 = vld [vmem:[%s2775_s1 + $0x30] ss:$12 sps:$4 sm:$0xff]   ;;  %v2285_v26 = vld [vmem:[%s2775_s1 + $0x18] ss:$12 sps:$4 sm:$0xff]   ;;  %v2289_v29 = vld [vmem:[%s2775_s1] ss:$12 sps:$4 sm:$0xff]  }
  0x13   : > { %v2283_v25 = vld [vmem:[%s2775_s1 + $0x1c] ss:$12 sps:$4 sm:$0xff]   ;;  %v2287_v28 = vld [vmem:[%s2775_s1 + $0x4] ss:$12 sps:$4 sm:$0xff]   ;;  %v1959_v35 = vld [vmem:[%s2779_s5] ss:$0 sm:$0xff] }
  0x14   : > { %v2290_v30 = vld [vmem:[%s2775_s1 + $0x8] ss:$12 sps:$4 sm:$0xff]   ;;  %v1960_v37 = vld [vmem:[%s2780_s6] ss:$0 sm:$0xff]  ;;  %v2506_v42 = vshrl.u32 %v339_v41, 7  ;;  %vm681_vm1 = vcmask 1043456  }
  0x15   : > { %487 = vmatpush1.bf16.msra.mxu0 %v2269_v13  ;;  %2082 = vmatpush3.bf16.msra.mxu1 %v2270_v14  ;;  %v337_v45 = vld [vmem:[%s2776_s2] sm:$0x7]  ;;  %vm618_vm2 = vcmask 130048   ;;  %vm664_vm4 = vcmask 64512  }
  0x16   : > { %2083 = vmatprep.subr.bf16.mxu1 %v2342_v3  ;;  %488 = vmatprep.subr.bf16.mxu0 %v2271_v15  ;;  %v341_v43 = vsub.s32 0, %v2506_v42  ;;  %v349_v44 = vsub.s32 2, %v2506_v42  ;;  %v345_v61 = vsub.s32 1, %v2506_v42 }
  0x18   : > { %v342_v46 = vrot.slane %v337_v45, %v341_v43  ;;  %v350_v47 = vrot.slane %v337_v45, %v349_v44  ;;  %v346_v62 = vrot.slane %v337_v45, %v345_v61 }
  0x19   : > { %489 = vmatpush1.bf16.msra.mxu0 %v2273_v16  ;;  %2084 = vmatpush3.bf16.msra.mxu1 %v2274_v17 }
  0x1a   : > { %490 = vmatprep.subr.bf16.mxu0 %v2275_v18  ;;  %2085 = vmatprep.subr.bf16.mxu1 %v2342_v3 }
  0x1d   : > { %491 = vmatpush1.bf16.msra.mxu0 %v2277_v19  ;;  %2086 = vmatpush3.bf16.msra.mxu1 %v2278_v20 }
  0x1e   : > { %492 = vmatprep.subr.bf16.mxu0 %v2279_v21  ;;  %2087 = vmatprep.subr.bf16.mxu1 %v2342_v3 }
  0x21   : > { %493 = vmatpush1.bf16.msra.mxu0 %v2281_v23  ;;  %2088 = vmatpush3.bf16.msra.mxu1 %v2282_v24 }
  0x22   : > { %494 = vmatprep.subr.bf16.mxu0 %v2283_v25  ;;  %2089 = vmatprep.subr.bf16.mxu1 %v2342_v3  ;;  %v566_v25 = vand.u32 127, %v339_v41 }
  0x24   : > { %vm2570_vm3 = vcmp.le.s32.totalorder %v566_v25, %v2506_v42 }
  0x25   : > { %495 = vmatpush1.bf16.msra.mxu0 %v2285_v26  ;;  %2090 = vmatpush3.bf16.msra.mxu1 %v2286_v27 }
  0x26   : > { %496 = vmatprep.subr.bf16.mxu0 %v2287_v28  ;;  %2091 = vmatprep.subr.bf16.mxu1 %v2342_v3 }
  0x29   : > { %497 = vmatpush1.bf16.msra.mxu0 %v2289_v29  ;;  %2092 = vmatpush3.bf16.msra.mxu1 %v2290_v30 }
  0x2a   : > { %2103 = vmatprep.subr.bf16.mxu1 %v2342_v3  ;;  %2097 = vmatprep.subr.bf16.mxu0 %v2342_v3 }
  0x98   : > { %v279_v8 = vpop.xlane.xlu0 %278 }
  0x99   : > { %v281_v9 = vmul.f32 0.0078125, %v279_v8 }
  0x9b   : > { %v282_v10 = vsub.f32 %v275_v0, %v281_v9 }
  0x9d   : > { %v283_v11 = vmul.f32 %v282_v10, %v282_v10 }
  0x9f   : > { %284 = vadd.xlane.f32.xlu0 %v283_v11 }
 0x128   : > { %v285_v31 = vpop.xlane.xlu0 %284 }
 0x129   : > { %v286_v32 = vmul.f32 0.0078125, %v285_v31 }
 0x12b   : > { %v287_v33 = vadd.f32 1e-05, %v286_v32 }
 0x12d   : > { %2299 = vrsqrt.f32 %v287_v33 }
 0x13a   : > { %v2300_v34 = vpop.eup %2299 }
 0x13b   : > { %v289_v36 = vmul.f32 %v2300_v34, %v282_v10 }
 0x13d   : > { %v296_v38 = vmul.f32 %v1959_v35, %v289_v36 }
 0x13f   : > { %v303_v39 = vadd.f32 %v1960_v37, %v296_v38 }
 0x141   : > { %v304_v40 = vpack.c.bf16 %v303_v39, %v303_v39 }
 0x143   : > { %515 = vmatmul.mubr.bf16.vlgmr.msra.gmra.mxu0 %v304_v40  ;;  %2094 = vmatmul.mubr.bf16.vlgmr.msra.gmra.mxu1 %v304_v40 }
 0x144   : > { %2099 = vmatprep.mubr.msk.bf16.mxu0 %vm2344_vm0, %v2342_v3  ;;  %2105 = vmatprep.mubr.msk.bf16.mxu1 %vm2344_vm0, %v2342_v3 }
 0x203   : > { %v516_v48 = vpop.f32.mrf.mxu0  ;;  %v557_v49 = vpop.f32.mrf.mxu1 }
 0x204   : > { %v517_v50 = vadd.f32 %v516_v48, %v342_v46  ;;  %v558_v51 = vadd.f32 %v557_v49, %v350_v47 }
 0x205   : > { %v518_v52 = vpop.f32.mrf.mxu0  ;;  %v2095_v53 = vpop.f32.mrf.mxu1 }
 0x206   : > { %v2513_v54 = vpack.c.bf16 %v517_v50, %v517_v50  ;;  %v2515_v55 = vpack.c.bf16 %v558_v51, %v558_v51  ;;  %v519_v63 = vadd.f32 %v518_v52, %v346_v62 }
 0x207   : > { %v520_v56 = vpop.f32.mrf.mxu0  ;;  %v560_v57 = vpop.f32.mrf.mxu1 }
 0x208   : > { %728 = vrot.lane.b32.xlu1 %v2513_v54, %s2345_s23  ;;  %v683_v58 = vsel %vm681_vm1, %v2515_v55, 0 }
 0x209   : > { %v521_v59 = vpop.f32.mrf.mxu0  ;;  %v2096_v60 = vpop.f32.mrf.mxu1  ;;  %2104 = vmatpush3.bf16.msra.mxu1 %v683_v58 }
 0x20a   : > { %2115 = vmatprep.subr.bf16.mxu1 %v2342_v3 }
 0x231   : > { %568 = vxpose.xlu1.b32.start.end [1/1] (short) %v519_v63, 128  ;;  %v2291_v63 = vld [vmem:[%s2777_s3] sm:$0xff]  }
 0x27a   : > { %v729_v0 = vpop.permute.xlu1 %728 }
 0x28b   : > { %936 = vrot.lane.b32.xlu1 %v2513_v54, %s2346_s27 }
 0x2ad   : > { %v584_v1 = vpop.trf.xlu1 }
 0x2b1   : > { %v585_v2 = vpop.trf.xlu1 }
 0x2b2   : > { %v617_v4 = vpack.c.bf16 %v585_v2, %v584_v1 }
 0x2b4   : > { %2098 = vmatpush3.bf16.msra.mxu0 %v617_v4 }
 0x2b5   : > { %v586_v5 = vpop.trf.xlu1  ;;  %2109 = vmatprep.subr.bf16.mxu0 %v2342_v3 }
 0x2b7   : > { %2100 = vmatmul.mubr.msk.bf16.vlgmr.msra.gmra.mxu0 %vm618_vm2, %v2513_v54 }
 0x2b8   : > { %2111 = vmatprep.mubr.msk.bf16.mxu0 %vm2344_vm0, %v2342_v3 }
 0x2b9   : > { %v587_v6 = vpop.trf.xlu1 }
 0x2ba   : > { %v726_v7 = vpack.c.bf16 %v587_v6, %v586_v5 }
 0x2bc   : > { %2110 = vmatpush3.bf16.msra.mxu0 %v726_v7 }
 0x2bd   : > { %v2530_v8 = vpop.trf.xlu1  ;;  %2121 = vmatprep.subr.bf16.mxu0 %v2342_v3 }
 0x2bf   : > { %2112 = vmatmul.mubr.msk.bf16.vlgmr.msra.gmra.mxu0 %vm618_vm2, %v729_v0  ;;  %v2292_v0 = vld [vmem:[%s2777_s3 + $0x8] sm:$0xff]  }
 0x2c0   : > { %2123 = vmatprep.mubr.msk.bf16.mxu0 %vm2344_vm0, %v2342_v3  ;;  %2122 = vmatpush3.bf16.msra.mxu0 %v2292_v0 }
 0x2c1   : > { %v2536_v9 = vpop.trf.xlu1  ;;  %2133 = vmatprep.subr.bf16.mxu0 %v2342_v3 }
 0x2c5   : > { %v2538_v10 = vpop.trf.xlu1 }
 0x2c9   : > { %v2540_v11 = vpop.trf.xlu1 }
 0x2ca   : > { %v1094_v12 = vpack.c.bf16 %v2540_v11, %v2538_v10 }
 0x2cd   : > { %v2544_v13 = vpop.trf.xlu1 }
 0x2d1   : > { %v2546_v14 = vpop.trf.xlu1 }
 0x2d2   : > { %v1253_v15 = vpack.c.bf16 %v2546_v14, %v2544_v13 }
 0x2d5   : > { %v2550_v16 = vpop.trf.xlu1 }
 0x2d9   : > { %v2552_v17 = vpop.trf.xlu1 }
 0x2da   : > { %v1412_v18 = vpack.c.bf16 %v2552_v17, %v2550_v16 }
 0x2dd   : > { %v2556_v19 = vpop.trf.xlu1 }
 0x2e1   : > { %v2558_v20 = vpop.trf.xlu1 }
 0x2e2   : > { %v1571_v21 = vpack.c.bf16 %v2558_v20, %v2556_v19 }
 0x2e5   : > { %v2562_v22 = vpop.trf.xlu1 }
 0x2e9   : > { %v2564_v23 = vpop.trf.xlu1 }
 0x2ea   : > { %v1730_v24 = vpack.c.bf16 %v2564_v23, %v2562_v22 }
 0x377   : > { %v656_v26 = vpop.f32.mrf.mxu0 }
 0x378   : > { %v662_v28 = vmul.f32 0.25, %v656_v26  ;;  %v935_v26 = vpack.c.bf16 %v2536_v9, %v2530_v8 }
 0x379   : > { %v2101_v29 = vpop.f32.mrf.mxu0 }
 0x37a   : > { %v663_v30 = vsel %vm2570_vm3, %v662_v28, -inf }
 0x37b   : > { %v659_v31 = vpop.f32.mrf.mxu0  ;;  %v665_v32 = vsel %vm664_vm4, %v663_v30, -inf }
 0x37c   : > { %666 = vmax.xlane.f32.xlu0 %v665_v32  ;;  %v937_v31 = vpop.permute.xlu1 %936 }
 0x37d   : > { %v2102_v33 = vpop.f32.mrf.mxu0 }
 0x37f   : > { %v767_v34 = vpop.f32.mrf.mxu0 }
 0x380   : > { %v773_v35 = vmul.f32 0.25, %v767_v34 }
 0x381   : > { %v2113_v36 = vpop.f32.mrf.mxu0 }
 0x382   : > { %v774_v37 = vsel %vm2570_vm3, %v773_v35, -inf }
 0x383   : > { %v770_v38 = vpop.f32.mrf.mxu0  ;;  %v775_v39 = vsel %vm664_vm4, %v774_v37, -inf }
 0x384   : > { %776 = vmax.xlane.f32.xlu0 %v775_v39 }
 0x385   : > { %v2114_v40 = vpop.f32.mrf.mxu0 }
 0x405   : > { %v667_v41 = vpop.xlane.xlu0 %666 }
 0x406   : > { %v668_v42 = vsub.f32 %v663_v30, %v667_v41 }
 0x408   : > { %v669_v43 = vmul.f32 1.442695, %v668_v42 }
 0x40a   : > { %2301 = vpow2.f32 %v669_v43 }
 0x40d   : > { %v777_v44 = vpop.xlane.xlu0 %776 }
 0x40e   : > { %v778_v45 = vsub.f32 %v774_v37, %v777_v44 }
 0x410   : > { %v779_v46 = vmul.f32 1.442695, %v778_v45 }
 0x412   : > { %2303 = vpow2.f32 %v779_v46 }
 0x417   : > { %v2302_v47 = vpop.eup %2301 }
 0x418   : > { %v671_v48 = vsel %vm664_vm4, %v2302_v47, 0.0 }
 0x419   : > { %672 = vadd.xlane.f32.xlu0 %v671_v48 }
 0x41f   : > { %v2304_v49 = vpop.eup %2303 }
 0x420   : > { %v781_v50 = vsel %vm664_vm4, %v2304_v49, 0.0 }
 0x421   : > { %782 = vadd.xlane.f32.xlu0 %v781_v50 }
 0x437   : > { %788 = vrot.lane.b32.xlu0 %v2515_v55, %s2345_s23 }
 0x4a2   : > { %v673_v51 = vpop.xlane.xlu0 %672 }
 0x4a3   : > { %2305 = vrcp.f32 %v673_v51 }
 0x4aa   : > { %v783_v52 = vpop.xlane.xlu0 %782 }
 0x4ab   : > { %2307 = vrcp.f32 %v783_v52 }
 0x4ae   : > { %v789_v57 = vpop.permute.xlu0 %788 }
 0x4af   : > { %v794_v59 = vsel %vm681_vm1, %v789_v57, 0 }
 0x4b0   : > { %v2306_v53 = vpop.eup %2305 }
 0x4b1   : > { %v675_v56 = vmul.f32 %v2306_v53, %v2302_v47 }
 0x4b3   : > { %v676_v58 = vpack.c.bf16 %v675_v56, %v675_v56 }
 0x4b5   : > { %2106 = vmatmul.mubr.msk.bf16.vlgmr.msra.gmra.mxu1 %vm664_vm4, %v676_v58 }
 0x4b6   : > { %2116 = vmatpush3.bf16.msra.mxu1 %v794_v59  ;;  %2117 = vmatprep.mubr.msk.bf16.mxu1 %vm2344_vm0, %v2342_v3 }
 0x4b7   : > { %2127 = vmatprep.subr.bf16.mxu1 %v2342_v3 }
 0x4b8   : > { %v2308_v60 = vpop.eup %2307 }
 0x4b9   : > { %v785_v61 = vmul.f32 %v2308_v60, %v2304_v49  ;;  %v2293_v60 = vld [vmem:[%s2777_s3 + $0x10] sm:$0xff]  }
 0x4bb   : > { %v786_v62 = vpack.c.bf16 %v785_v61, %v785_v61 }
 0x4bd   : > { %2118 = vmatmul.mubr.msk.bf16.vlgmr.msra.gmra.mxu1 %vm664_vm4, %v786_v62 }
 0x4be   : > { %2129 = vmatprep.mubr.msk.bf16.mxu1 %vm2344_vm0, %v2342_v3  ;;  %2128 = vmatpush3.bf16.msra.mxu1 %v2291_v63 }
 0x4bf   : > { %2139 = vmatprep.subr.bf16.mxu1 %v2342_v3 }
 0x575   : > { %v719_v1 = vpop.f32.mrf.mxu1 }
 0x576   : > { %v725_v2 = vpack.c.bf16 %v719_v1, %v719_v1 }
 0x577   : > { %v2107_v4 = vpop.f32.mrf.mxu1 }
 0x578   : > { %2130 = vmatmul.mubr.msk.bf16.vlgmr.msra.gmra.mxu1 %vm618_vm2, %v725_v2 }
 0x579   : > { %v722_v5 = vpop.f32.mrf.mxu1  ;;  %2141 = vmatprep.mubr.msk.bf16.mxu1 %vm2344_vm0, %v2342_v3 }
 0x57b   : > { %v2108_v6 = vpop.f32.mrf.mxu1 }
 0x57d   : > { %v830_v7 = vpop.f32.mrf.mxu1 }
 0x57e   : > { %v836_v25 = vpack.c.bf16 %v830_v7, %v830_v7 }
 0x57f   : > { %v2119_v28 = vpop.f32.mrf.mxu1 }
 0x580   : > { %2124 = vmatmul.mubr.msk.bf16.vlgmr.msra.gmra.mxu0 %vm618_vm2, %v836_v25 }
 0x581   : > { %2134 = vmatpush3.bf16.msra.mxu0 %v935_v26  ;;  %v833_v29 = vpop.f32.mrf.mxu1  ;;  %2135 = vmatprep.mubr.msk.bf16.mxu0 %vm2344_vm0, %v2342_v3 }
 0x582   : > { %2145 = vmatprep.subr.bf16.mxu0 %v2342_v3 }
 0x583   : > { %v2120_v30 = vpop.f32.mrf.mxu1 }
 0x588   : > { %2136 = vmatmul.mubr.msk.bf16.vlgmr.msra.gmra.mxu0 %vm618_vm2, %v937_v31 }
 0x589   : > { %2147 = vmatprep.mubr.msk.bf16.mxu0 %vm2344_vm0, %v2342_v3  ;;  %2146 = vmatpush3.bf16.msra.mxu0 %v2293_v60 }
 0x58a   : > { %2157 = vmatprep.subr.bf16.mxu0 %v2342_v3 }
 0x638   : > { %v929_v32 = vpop.f32.mrf.mxu1 }
 0x63a   : > { %v2131_v33 = vpop.f32.mrf.mxu1 }
 0x63c   : > { %v932_v8 = vpop.f32.mrf.mxu1 }
 0x63e   : > { %v2132_v9 = vpop.f32.mrf.mxu1 }
 0x640   : > { %v880_v34 = vpop.f32.mrf.mxu0 }
 0x641   : > { %v2612_v35 = vadd.f32 %v929_v32, %v880_v34 }
 0x642   : > { %v2125_v36 = vpop.f32.mrf.mxu0 }
 0x644   : > { %v883_v37 = vpop.f32.mrf.mxu0 }
 0x646   : > { %v2126_v38 = vpop.f32.mrf.mxu0 }
 0x648   : > { %v975_v39 = vpop.f32.mrf.mxu0 }
 0x649   : > { %v981_v40 = vmul.f32 0.25, %v975_v39 }
 0x64a   : > { %v2137_v41 = vpop.f32.mrf.mxu0 }
 0x64b   : > { %v982_v42 = vsel %vm2570_vm3, %v981_v40, -inf  ;;  %v2294_v40 = vld [vmem:[%s2777_s3 + $0x18] sm:$0xff]  }
 0x64c   : > { %v978_v43 = vpop.f32.mrf.mxu0  ;;  %v983_v44 = vsel %vm664_vm4, %v982_v42, -inf }
 0x64d   : > { %984 = vmax.xlane.f32.xlu0 %v983_v44 }
 0x64e   : > { %v2138_v45 = vpop.f32.mrf.mxu0 }
 0x6d6   : > { %v985_v46 = vpop.xlane.xlu0 %984 }
 0x6d7   : > { %v986_v47 = vsub.f32 %v982_v42, %v985_v46 }
 0x6d9   : > { %v987_v48 = vmul.f32 1.442695, %v986_v47 }
 0x6db   : > { %2309 = vpow2.f32 %v987_v48 }
 0x6e8   : > { %v2310_v49 = vpop.eup %2309 }
 0x6e9   : > { %v989_v50 = vsel %vm664_vm4, %v2310_v49, 0.0 }
 0x6ea   : > { %990 = vadd.xlane.f32.xlu0 %v989_v50 }
 0x700   : > { %995 = vrot.lane.b32.xlu0 %v2515_v55, %s2346_s27 }
 0x704   : > { %1095 = vrot.lane.b32.xlu0 %v2513_v54, %s2347_s10 }
 0x773   : > { %v991_v51 = vpop.xlane.xlu0 %990 }
 0x774   : > { %2311 = vrcp.f32 %v991_v51 }
 0x777   : > { %v996_v52 = vpop.permute.xlu0 %995 }
 0x778   : > { %v1001_v53 = vsel %vm681_vm1, %v996_v52, 0 }
 0x779   : > { %2140 = vmatpush3.bf16.msra.mxu1 %v1001_v53 }
 0x77a   : > { %2151 = vmatprep.subr.bf16.mxu1 %v2342_v3 }
 0x77b   : > { %v1096_v59 = vpop.permute.xlu0 %1095 }
 0x781   : > { %v2312_v56 = vpop.eup %2311 }
 0x782   : > { %v993_v57 = vmul.f32 %v2312_v56, %v2310_v49 }
 0x784   : > { %v994_v58 = vpack.c.bf16 %v993_v57, %v993_v57 }
 0x786   : > { %2142 = vmatmul.mubr.msk.bf16.vlgmr.msra.gmra.mxu1 %vm664_vm4, %v994_v58 }
 0x787   : > { %2152 = vmatpush3.bf16.msra.mxu1 %v1094_v12  ;;  %2153 = vmatprep.mubr.msk.bf16.mxu1 %vm2344_vm0, %v2342_v3 }
 0x788   : > { %2163 = vmatprep.subr.bf16.mxu1 %v2342_v3 }
 0x78e   : > { %2154 = vmatmul.mubr.msk.bf16.vlgmr.msra.gmra.mxu1 %vm618_vm2, %v1096_v59 }
 0x78f   : > { %2165 = vmatprep.mubr.msk.bf16.mxu1 %vm2344_vm0, %v2342_v3  ;;  %2164 = vmatpush3.bf16.msra.mxu1 %v2294_v40 }
 0x790   : > { %2175 = vmatprep.subr.bf16.mxu1 %v2342_v3 }
 0x846   : > { %v1037_v10 = vpop.f32.mrf.mxu1 }
 0x847   : > { %v1043_v11 = vpack.c.bf16 %v1037_v10, %v1037_v10 }
 0x848   : > { %v2143_v12 = vpop.f32.mrf.mxu1 }
 0x849   : > { %2148 = vmatmul.mubr.msk.bf16.vlgmr.msra.gmra.mxu0 %vm618_vm2, %v1043_v11 }
 0x84a   : > { %v1040_v61 = vpop.f32.mrf.mxu1  ;;  %2159 = vmatprep.mubr.msk.bf16.mxu0 %vm2344_vm0, %v2342_v3 }
 0x84c   : > { %v2144_v62 = vpop.f32.mrf.mxu1 }
 0x84e   : > { %v1134_v63 = vpop.f32.mrf.mxu1 }
 0x84f   : > { %v1140_v0 = vmul.f32 0.25, %v1134_v63 }
 0x850   : > { %v2155_v1 = vpop.f32.mrf.mxu1 }
 0x851   : > { %v1141_v2 = vsel %vm2570_vm3, %v1140_v0, -inf }
 0x852   : > { %v1137_v4 = vpop.f32.mrf.mxu1  ;;  %v1142_v5 = vsel %vm664_vm4, %v1141_v2, -inf }
 0x853   : > { %1143 = vmax.xlane.f32.xlu0 %v1142_v5 }
 0x854   : > { %v2156_v6 = vpop.f32.mrf.mxu1 }
 0x869   : > { %1154 = vrot.lane.b32.xlu0 %v2515_v55, %s2347_s10 }
 0x86d   : > { %1254 = vrot.lane.b32.xlu0 %v2513_v54, %s2348_s13 }
 0x8dc   : > { %v1144_v7 = vpop.xlane.xlu0 %1143 }
 0x8dd   : > { %v1145_v25 = vsub.f32 %v1141_v2, %v1144_v7  ;;  %v2295_v2 = vld [vmem:[%s2777_s3 + $0x20] sm:$0xff]  }
 0x8df   : > { %v1146_v26 = vmul.f32 1.442695, %v1145_v25 }
 0x8e0   : > { %v1155_v28 = vpop.permute.xlu0 %1154 }
 0x8e1   : > { %2313 = vpow2.f32 %v1146_v26  ;;  %v1160_v29 = vsel %vm681_vm1, %v1155_v28, 0 }
 0x8e2   : > { %2158 = vmatpush3.bf16.msra.mxu0 %v1160_v29 }
 0x8e3   : > { %2169 = vmatprep.subr.bf16.mxu0 %v2342_v3 }
 0x8ee   : > { %v2314_v30 = vpop.eup %2313 }
 0x8ef   : > { %v1148_v31 = vsel %vm664_vm4, %v2314_v30, 0.0 }
 0x8f0   : > { %1149 = vadd.xlane.f32.xlu1 %v1148_v31 }
 0x909   : > { %v1087_v32 = vpop.f32.mrf.mxu0 }
 0x90a   : > { %v1093_v33 = vadd.f32 %v1087_v32, %v2612_v35  ;;  %v1255_v35 = vpop.permute.xlu0 %1254 }
 0x90b   : > { %v2149_v8 = vpop.f32.mrf.mxu0 }
 0x90d   : > { %v1090_v9 = vpop.f32.mrf.mxu0 }
 0x90f   : > { %v2150_v34 = vpop.f32.mrf.mxu0 }
 0x979   : > { %v1150_v36 = vpop.xlane.xlu1 %1149 }
 0x97a   : > { %2315 = vrcp.f32 %v1150_v36 }
 0x987   : > { %v2316_v37 = vpop.eup %2315 }
 0x988   : > { %v1152_v38 = vmul.f32 %v2316_v37, %v2314_v30 }
 0x98a   : > { %v1153_v39 = vpack.c.bf16 %v1152_v38, %v1152_v38 }
 0x98c   : > { %2160 = vmatmul.mubr.msk.bf16.vlgmr.msra.gmra.mxu0 %vm664_vm4, %v1153_v39 }
 0x98d   : > { %2170 = vmatpush3.bf16.msra.mxu0 %v1253_v15  ;;  %2171 = vmatprep.mubr.msk.bf16.mxu0 %vm2344_vm0, %v2342_v3 }
 0x98e   : > { %2181 = vmatprep.subr.bf16.mxu0 %v2342_v3 }
 0x994   : > { %2172 = vmatmul.mubr.msk.bf16.vlgmr.msra.gmra.mxu0 %vm618_vm2, %v1255_v35 }
 0x995   : > { %2183 = vmatprep.mubr.msk.bf16.mxu0 %vm2344_vm0, %v2342_v3  ;;  %2182 = vmatpush3.bf16.msra.mxu0 %v2295_v2 }
 0x996   : > { %2193 = vmatprep.subr.bf16.mxu0 %v2342_v3 }
 0xa4c   : > { %v1196_v13 = vpop.f32.mrf.mxu0 }
 0xa4d   : > { %v1202_v14 = vpack.c.bf16 %v1196_v13, %v1196_v13 }
 0xa4e   : > { %v2161_v15 = vpop.f32.mrf.mxu0 }
 0xa4f   : > { %2166 = vmatmul.mubr.msk.bf16.vlgmr.msra.gmra.mxu1 %vm618_vm2, %v1202_v14 }
 0xa50   : > { %v1199_v41 = vpop.f32.mrf.mxu0  ;;  %2177 = vmatprep.mubr.msk.bf16.mxu1 %vm2344_vm0, %v2342_v3 }
 0xa52   : > { %v2162_v42 = vpop.f32.mrf.mxu0 }
 0xa54   : > { %v1293_v43 = vpop.f32.mrf.mxu0 }
 0xa55   : > { %v1299_v44 = vmul.f32 0.25, %v1293_v43  ;;  %v2296_v43 = vld [vmem:[%s2777_s3 + $0x28] sm:$0xff]  }
 0xa56   : > { %v2173_v45 = vpop.f32.mrf.mxu0 }
 0xa57   : > { %v1300_v46 = vsel %vm2570_vm3, %v1299_v44, -inf }
 0xa58   : > { %v1296_v47 = vpop.f32.mrf.mxu0  ;;  %v1301_v48 = vsel %vm664_vm4, %v1300_v46, -inf }
 0xa59   : > { %1302 = vmax.xlane.f32.xlu0 %v1301_v48 }
 0xa5a   : > { %v2174_v49 = vpop.f32.mrf.mxu0 }
 0xae2   : > { %v1303_v50 = vpop.xlane.xlu0 %1302 }
 0xae3   : > { %v1304_v51 = vsub.f32 %v1300_v46, %v1303_v50 }
 0xae5   : > { %v1305_v52 = vmul.f32 1.442695, %v1304_v51 }
 0xae7   : > { %2317 = vpow2.f32 %v1305_v52 }
 0xaf4   : > { %v2318_v53 = vpop.eup %2317 }
 0xaf5   : > { %v1307_v56 = vsel %vm664_vm4, %v2318_v53, 0.0 }
 0xaf6   : > { %1308 = vadd.xlane.f32.xlu1 %v1307_v56 }
 0xb07   : > { %1313 = vrot.lane.b32.xlu1 %v2515_v55, %s2348_s13 }
 0xb0b   : > { %1413 = vrot.lane.b32.xlu1 %v2513_v54, %s2349_s16 }
 0xb0f   : > { %v1246_v57 = vpop.f32.mrf.mxu1 }
 0xb10   : > { %v1252_v58 = vadd.f32 %v1246_v57, %v1093_v33 }
 0xb11   : > { %v2167_v59 = vpop.f32.mrf.mxu1 }
 0xb13   : > { %v1249_v60 = vpop.f32.mrf.mxu1 }
 0xb15   : > { %v2168_v10 = vpop.f32.mrf.mxu1 }
 0xb7f   : > { %v1309_v11 = vpop.xlane.xlu1 %1308 }
 0xb80   : > { %2319 = vrcp.f32 %v1309_v11 }
 0xb83   : > { %v1314_v12 = vpop.permute.xlu1 %1313 }
 0xb84   : > { %v1319_v61 = vsel %vm681_vm1, %v1314_v12, 0 }
 0xb85   : > { %2176 = vmatpush3.bf16.msra.mxu1 %v1319_v61 }
 0xb86   : > { %2187 = vmatprep.subr.bf16.mxu1 %v2342_v3 }
 0xb87   : > { %v1414_v1 = vpop.permute.xlu1 %1413 }
 0xb8d   : > { %v2320_v62 = vpop.eup %2319 }
 0xb8e   : > { %v1311_v63 = vmul.f32 %v2320_v62, %v2318_v53 }
 0xb90   : > { %v1312_v0 = vpack.c.bf16 %v1311_v63, %v1311_v63 }
 0xb92   : > { %2178 = vmatmul.mubr.msk.bf16.vlgmr.msra.gmra.mxu1 %vm664_vm4, %v1312_v0 }
 0xb93   : > { %2188 = vmatpush3.bf16.msra.mxu1 %v1412_v18  ;;  %2189 = vmatprep.mubr.msk.bf16.mxu1 %vm2344_vm0, %v2342_v3 }
 0xb94   : > { %2199 = vmatprep.subr.bf16.mxu1 %v2342_v3 }
 0xb9a   : > { %2190 = vmatmul.mubr.msk.bf16.vlgmr.msra.gmra.mxu1 %vm618_vm2, %v1414_v1 }
 0xb9b   : > { %2201 = vmatprep.mubr.msk.bf16.mxu1 %vm2344_vm0, %v2342_v3  ;;  %2200 = vmatpush3.bf16.msra.mxu1 %v2296_v43 }
 0xb9c   : > { %2211 = vmatprep.subr.bf16.mxu1 %v2342_v3 }
 0xc52   : > { %v1355_v16 = vpop.f32.mrf.mxu1 }
 0xc53   : > { %v1361_v17 = vpack.c.bf16 %v1355_v16, %v1355_v16 }
 0xc54   : > { %v2179_v18 = vpop.f32.mrf.mxu1 }
 0xc55   : > { %2184 = vmatmul.mubr.msk.bf16.vlgmr.msra.gmra.mxu0 %vm618_vm2, %v1361_v17  ;;  %v2297_v17 = vld [vmem:[%s2777_s3 + $0x30] sm:$0xff]  }
 0xc56   : > { %v1358_v4 = vpop.f32.mrf.mxu1  ;;  %2195 = vmatprep.mubr.msk.bf16.mxu0 %vm2344_vm0, %v2342_v3 }
 0xc58   : > { %v2180_v5 = vpop.f32.mrf.mxu1 }
 0xc5a   : > { %v1452_v6 = vpop.f32.mrf.mxu1 }
 0xc5b   : > { %v1458_v7 = vmul.f32 0.25, %v1452_v6 }
 0xc5c   : > { %v2191_v25 = vpop.f32.mrf.mxu1 }
 0xc5d   : > { %v1459_v26 = vsel %vm2570_vm3, %v1458_v7, -inf }
 0xc5e   : > { %v1455_v28 = vpop.f32.mrf.mxu1  ;;  %v1460_v29 = vsel %vm664_vm4, %v1459_v26, -inf }
 0xc5f   : > { %1461 = vmax.xlane.f32.xlu0 %v1460_v29 }
 0xc60   : > { %v2192_v30 = vpop.f32.mrf.mxu1 }
 0xc75   : > { %1472 = vrot.lane.b32.xlu0 %v2515_v55, %s2349_s16 }
 0xc79   : > { %1572 = vrot.lane.b32.xlu0 %v2513_v54, %s2350_s19 }
 0xce8   : > { %v1462_v31 = vpop.xlane.xlu0 %1461 }
 0xce9   : > { %v1463_v32 = vsub.f32 %v1459_v26, %v1462_v31 }
 0xceb   : > { %v1464_v33 = vmul.f32 1.442695, %v1463_v32 }
 0xcec   : > { %v1473_v8 = vpop.permute.xlu0 %1472 }
 0xced   : > { %2321 = vpow2.f32 %v1464_v33  ;;  %v1478_v9 = vsel %vm681_vm1, %v1473_v8, 0 }
 0xcee   : > { %2194 = vmatpush3.bf16.msra.mxu0 %v1478_v9 }
 0xcef   : > { %2205 = vmatprep.subr.bf16.mxu0 %v2342_v3 }
 0xcf0   : > { %v1573_v42 = vpop.permute.xlu0 %1572 }
 0xcfa   : > { %v2322_v34 = vpop.eup %2321 }
 0xcfb   : > { %v1466_v36 = vsel %vm664_vm4, %v2322_v34, 0.0 }
 0xcfc   : > { %1467 = vadd.xlane.f32.xlu1 %v1466_v36 }
 0xd15   : > { %v1405_v37 = vpop.f32.mrf.mxu0 }
 0xd16   : > { %v1411_v38 = vadd.f32 %v1405_v37, %v1252_v58 }
 0xd17   : > { %v2185_v39 = vpop.f32.mrf.mxu0 }
 0xd19   : > { %v1408_v35 = vpop.f32.mrf.mxu0 }
 0xd1b   : > { %v2186_v40 = vpop.f32.mrf.mxu0 }
 0xd85   : > { %v1468_v13 = vpop.xlane.xlu1 %1467 }
 0xd86   : > { %2323 = vrcp.f32 %v1468_v13  ;;  %v2298_v13 = vld [vmem:[%s2777_s3 + $0x38] sm:$0xff]  }
 0xd93   : > { %v2324_v14 = vpop.eup %2323 }
 0xd94   : > { %v1470_v15 = vmul.f32 %v2324_v14, %v2322_v34 }
 0xd96   : > { %v1471_v41 = vpack.c.bf16 %v1470_v15, %v1470_v15 }
 0xd98   : > { %2196 = vmatmul.mubr.msk.bf16.vlgmr.msra.gmra.mxu0 %vm664_vm4, %v1471_v41 }
 0xd99   : > { %2206 = vmatpush3.bf16.msra.mxu0 %v1571_v21  ;;  %2207 = vmatprep.mubr.msk.bf16.mxu0 %vm2344_vm0, %v2342_v3 }
 0xd9a   : > { %2217 = vmatprep.subr.bf16.mxu0 %v2342_v3 }
 0xda0   : > { %2208 = vmatmul.mubr.msk.bf16.vlgmr.msra.gmra.mxu0 %vm618_vm2, %v1573_v42 }
 0xda1   : > { %2219 = vmatprep.mubr.msk.bf16.mxu0 %vm2344_vm0, %v2342_v3  ;;  %2218 = vmatpush3.bf16.msra.mxu0 %v2297_v17 }
 0xda2   : > { %2229 = vmatprep.subr.bf16.mxu0 %v2342_v3 }
 0xe58   : > { %v1514_v19 = vpop.f32.mrf.mxu0 }
 0xe59   : > { %v1520_v20 = vpack.c.bf16 %v1514_v19, %v1514_v19 }
 0xe5a   : > { %v2197_v21 = vpop.f32.mrf.mxu0 }
 0xe5b   : > { %2202 = vmatmul.mubr.msk.bf16.vlgmr.msra.gmra.mxu1 %vm618_vm2, %v1520_v20  ;;  %v2017_v21 = vld [vmem:[%s2778_s4] ss:$0 sm:$0xff] }
 0xe5c   : > { %v1517_v44 = vpop.f32.mrf.mxu0  ;;  %2213 = vmatprep.mubr.msk.bf16.mxu1 %vm2344_vm0, %v2342_v3 }
 0xe5e   : > { %v2198_v45 = vpop.f32.mrf.mxu0 }
 0xe5f   : > { %v2333_v45 = vld [vmem:[%s2408_s29] sm:$0xff] }
 0xe60   : > { %v1611_v46 = vpop.f32.mrf.mxu0 }
 0xe61   : > { %v1617_v47 = vmul.f32 0.25, %v1611_v46 }
 0xe62   : > { %v2209_v48 = vpop.f32.mrf.mxu0 }
 0xe63   : > { %v1618_v49 = vsel %vm2570_vm3, %v1617_v47, -inf }
 0xe64   : > { %v1614_v50 = vpop.f32.mrf.mxu0  ;;  %v1619_v51 = vsel %vm664_vm4, %v1618_v49, -inf }
 0xe65   : > { %1620 = vmax.xlane.f32.xlu0 %v1619_v51 }
 0xe66   : > { %v2210_v52 = vpop.f32.mrf.mxu0 }
 0xeee   : > { %v1621_v53 = vpop.xlane.xlu0 %1620 }
 0xeef   : > { %v1622_v56 = vsub.f32 %v1618_v49, %v1621_v53 }
 0xef1   : > { %v1623_v57 = vmul.f32 1.442695, %v1622_v56 }
 0xef3   : > { %2325 = vpow2.f32 %v1623_v57 }
 0xf00   : > { %v2326_v58 = vpop.eup %2325 }
 0xf01   : > { %v1625_v59 = vsel %vm664_vm4, %v2326_v58, 0.0 }
 0xf02   : > { %1626 = vadd.xlane.f32.xlu1 %v1625_v59 }
 0xf13   : > { %1631 = vrot.lane.b32.xlu1 %v2515_v55, %s2350_s19 }
 0xf17   : > { %1731 = vrot.lane.b32.xlu1 %v2513_v54, %s2351_s22 }
 0xf1b   : > { %v1564_v60 = vpop.f32.mrf.mxu1 }
 0xf1c   : > { %v1570_v10 = vadd.f32 %v1564_v60, %v1411_v38 }
 0xf1d   : > { %v2203_v11 = vpop.f32.mrf.mxu1 }
 0xf1f   : > { %v1567_v12 = vpop.f32.mrf.mxu1 }
 0xf21   : > { %v2204_v61 = vpop.f32.mrf.mxu1 }
 0xf8b   : > { %v1627_v62 = vpop.xlane.xlu1 %1626 }
 0xf8c   : > { %2327 = vrcp.f32 %v1627_v62 }
 0xf8f   : > { %v1632_v63 = vpop.permute.xlu1 %1631 }
 0xf90   : > { %v1637_v0 = vsel %vm681_vm1, %v1632_v63, 0 }
 0xf91   : > { %2212 = vmatpush3.bf16.msra.mxu1 %v1637_v0 }
 0xf92   : > { %2223 = vmatprep.subr.bf16.mxu1 %v2342_v3 }
 0xf93   : > { %v1732_v54 = vpop.permute.xlu1 %1731 }
 0xf99   : > { %v2328_v1 = vpop.eup %2327 }
 0xf9a   : > { %v1629_v2 = vmul.f32 %v2328_v1, %v2326_v58 }
 0xf9c   : > { %v1630_v16 = vpack.c.bf16 %v1629_v2, %v1629_v2 }
 0xf9e   : > { %2214 = vmatmul.mubr.msk.bf16.vlgmr.msra.gmra.mxu1 %vm664_vm4, %v1630_v16 }
 0xf9f   : > { %2224 = vmatpush3.bf16.msra.mxu1 %v1730_v24  ;;  %2225 = vmatprep.mubr.msk.bf16.mxu1 %vm2344_vm0, %v2342_v3 }
 0xfa0   : > { %2235 = vmatprep.subr.bf16.mxu1 %v2342_v3 }
 0xfa6   : > { %2226 = vmatmul.mubr.msk.bf16.vlgmr.msra.gmra.mxu1 %vm618_vm2, %v1732_v54 }
 0xfa7   : > { %2237 = vmatprep.mubr.msk.bf16.mxu1 %vm2344_vm0, %v2342_v3  ;;  %2236 = vmatpush3.bf16.msra.mxu1 %v2298_v13 }
0x105e   : > { %v1673_v22 = vpop.f32.mrf.mxu1 }
0x105f   : > { %v1679_v23 = vpack.c.bf16 %v1673_v22, %v1673_v22 }
0x1060   : > { %v2215_v24 = vpop.f32.mrf.mxu1 }
0x1061   : > { %2220 = vmatmul.mubr.msk.bf16.vlgmr.msra.gmra.mxu0 %vm618_vm2, %v1679_v23 }
0x1062   : > { %v1676_v18 = vpop.f32.mrf.mxu1  ;;  %2231 = vmatprep.mubr.msk.bf16.mxu0 %vm2344_vm0, %v2342_v3 }
0x1064   : > { %v2216_v4 = vpop.f32.mrf.mxu1 }
0x1066   : > { %v1770_v5 = vpop.f32.mrf.mxu1 }
0x1067   : > { %v1776_v6 = vmul.f32 0.25, %v1770_v5 }
0x1068   : > { %v2227_v7 = vpop.f32.mrf.mxu1 }
0x1069   : > { %v1777_v25 = vsel %vm2570_vm3, %v1776_v6, -inf }
0x106a   : > { %v1773_v26 = vpop.f32.mrf.mxu1  ;;  %v1778_v28 = vsel %vm664_vm4, %v1777_v25, -inf }
0x106b   : > { %1779 = vmax.xlane.f32.xlu0 %v1778_v28 }
0x106c   : > { %v2228_v29 = vpop.f32.mrf.mxu1 }
0x1081   : > { %1790 = vrot.lane.b32.xlu0 %v2515_v55, %s2351_s22 }
0x10f4   : > { %v1780_v30 = vpop.xlane.xlu0 %1779 }
0x10f5   : > { %v1781_v31 = vsub.f32 %v1777_v25, %v1780_v30 }
0x10f7   : > { %v1782_v32 = vmul.f32 1.442695, %v1781_v31 }
0x10f8   : > { %v1791_v33 = vpop.permute.xlu0 %1790 }
0x10f9   : > { %2329 = vpow2.f32 %v1782_v32  ;;  %v1796_v3 = vsel %vm681_vm1, %v1791_v33, 0 }
0x10fa   : > { %2230 = vmatpush3.bf16.msra.mxu0 %v1796_v3 }
0x1106   : > { %v2330_v8 = vpop.eup %2329 }
0x1107   : > { %v1784_v27 = vsel %vm664_vm4, %v2330_v8, 0.0 }
0x1108   : > { %1785 = vadd.xlane.f32.xlu1 %v1784_v27 }
0x1121   : > { %v1723_v9 = vpop.f32.mrf.mxu0 }
0x1122   : > { %v1729_v34 = vadd.f32 %v1723_v9, %v1570_v10 }
0x1123   : > { %v2221_v36 = vpop.f32.mrf.mxu0 }
0x1125   : > { %v1726_v37 = vpop.f32.mrf.mxu0 }
0x1127   : > { %v2222_v38 = vpop.f32.mrf.mxu0 }
0x1191   : > { %v1786_v39 = vpop.xlane.xlu1 %1785 }
0x1192   : > { %2331 = vrcp.f32 %v1786_v39 }
0x119f   : > { %v2332_v55 = vpop.eup %2331 }
0x11a0   : > { %v1788_v35 = vmul.f32 %v2332_v55, %v2330_v8 }
0x11a2   : > { %v1789_v40 = vpack.c.bf16 %v1788_v35, %v1788_v35 }
0x11a4   : > { %2232 = vmatmul.mubr.msk.bf16.vlgmr.msra.gmra.mxu0 %vm664_vm4, %v1789_v40 }
0x1264   : > { %v1832_v14 = vpop.f32.mrf.mxu0 }
0x1265   : > { %v1838_v15 = vpack.c.bf16 %v1832_v14, %v1832_v14 }
0x1266   : > { %v2233_v41 = vpop.f32.mrf.mxu0 }
0x1267   : > { %2238 = vmatmul.mubr.msk.bf16.vlgmr.msra.gmra.mxu1 %vm618_vm2, %v1838_v15 }
0x1268   : > { %v1835_v42 = vpop.f32.mrf.mxu0 }
0x126a   : > { %v2234_v43 = vpop.f32.mrf.mxu0 }
0x1327   : > { %v1882_v19 = vpop.f32.mrf.mxu1 }
0x1328   : > { %v1888_v20 = vadd.f32 %v1882_v19, %v1729_v34 }
0x1329   : > { %v2239_v44 = vpop.f32.mrf.mxu1 }
0x132a   : > { %v1889_v46 = vadd.f32 %v2333_v45, %v1888_v20 }
0x132b   : > { %v1885_v47 = vpop.f32.mrf.mxu1 }
0x132c   : > { %v1897_v48 = vadd.f32 %v2017_v21, %v1889_v46 }
0x132d   : > { %v2240_v49 = vpop.f32.mrf.mxu1 }
0x132e   : > { %1898 = vst [vmem:[%s273_s12] sm:$0xff] %v1897_v48 }
0x132f PF: > { %s17_s24 = sadd.s32 1, %s2340_s24  }
0x1330   : > { %p14_p4 = scmp.ge.s32.totalorder %s17_s24, 4  }
0x1332   :  { %16 = sbr.rel (!%p14_p4) target bundleno = 1 (0x1), region = 78 }

// kernel: transformer_forward.14
= control target key start
LH: loop header
LB: loop body
LE: loop exit
PB: predicated region body
PF: predicated region fallthrough
CT: control target
= control target key end

     0   :  { %s4190_s0 = inlined_call_operand.vmem [shape: f32[16,128], index: 0, kind: input, shape index: {}]   ;;  %s4191_s1 = inlined_call_operand.vmem [shape: bf16[128,2048], index: 1, kind: input, shape index: {}]   ;;  %s4192_s3 = inlined_call_operand.vmem [shape: bf16[2048,128], index: 3, kind: input, shape index: {}]   ;;  %s4193_s5 = inlined_call_operand.vmem [shape: f32[1,128], index: 5, kind: input, shape index: {}]   ;;  %s4194_s6 = inlined_call_operand.vmem [shape: f32[1,128], index: 6, kind: input, shape index: {}]   ;;  %s4195_s2 = inlined_call_operand.vmem [shape: f32[1,2048], index: 2, kind: input, shape index: {}]   ;;  %s4196_s4 = inlined_call_operand.vmem [shape: f32[1,128], index: 4, kind: input, shape index: {}]   ;;  %s4197_s7 = inlined_call_operand.vmem [shape: f32[16,128], index: 7, kind: output, shape index: {}]  }
   0x1   :  { %v27_v0 = vld [vmem:[%s4190_s0] sm:$0xff]  ;;  %v28_v1 = vld [vmem:[%s4190_s0 + $0x8] sm:$0xff] }
   0x2   :  { %31 = vadd.xlane.f32.xlu0 %v27_v0  ;;  %v183_v2 = vld [vmem:[%s4191_s1 + $0x380] sm:$0xff]  ;;  %v184_v4 = vld [vmem:[%s4191_s1 + $0x388] sm:$0xff] }
   0x3   :  { %v191_v3 = vld [vmem:[%s4191_s1 + $0x3c0] sm:$0xff]  ;;  %v192_v6 = vld [vmem:[%s4191_s1 + $0x3c8] sm:$0xff] }
   0x4   :  { %v2797_v5 = vcombine.high %v183_v2, %v191_v3  ;;  %v2796_v7 = vcombine.low %v183_v2, %v191_v3  ;;  %v2799_v8 = vcombine.high %v184_v4, %v192_v6  ;;  %v2798_v9 = vcombine.low %v184_v4, %v192_v6  ;;  %v167_v18 = vld [vmem:[%s4191_s1 + $0x300] sm:$0xff]  ;;  %v168_v20 = vld [vmem:[%s4191_s1 + $0x308] sm:$0xff] }
   0x5   :  { %v175_v19 = vld [vmem:[%s4191_s1 + $0x340] sm:$0xff]  ;;  %v176_v22 = vld [vmem:[%s4191_s1 + $0x348] sm:$0xff] }
   0x6   :  { %33 = vadd.xlane.f32.xlu0 %v28_v1  ;;  %923 = vmatprep.subr.bf16.mxu0 %v2797_v5  ;;  %v2781_v21 = vcombine.high %v167_v18, %v175_v19  ;;  %v2783_v23 = vcombine.high %v168_v20, %v176_v22  ;;  %v2780_v24 = vcombine.low %v167_v18, %v175_v19  ;;  %v151_v26 = vld [vmem:[%s4191_s1 + $0x280] sm:$0xff]  ;;  %v152_v28 = vld [vmem:[%s4191_s1 + $0x288] sm:$0xff] }
   0x7   :  { %966 = vmatprep.subr.bf16.mxu1 %v2799_v8  ;;  %924 = vmatpush1.bf16.msra.mxu0 %v2796_v7  ;;  %v2782_v25 = vcombine.low %v168_v20, %v176_v22  ;;  %v159_v27 = vld [vmem:[%s4191_s1 + $0x2c0] sm:$0xff]  ;;  %v160_v30 = vld [vmem:[%s4191_s1 + $0x2c8] sm:$0xff]  ;;  %v3252_v20 = vmov 0  }
   0x8   :  { %967 = vmatpush1.bf16.msra.mxu1 %v2798_v9  ;;  %925 = vmatprep.subr.bf16.mxu0 %v2781_v21  ;;  %v2765_v29 = vcombine.high %v151_v26, %v159_v27  ;;  %v2767_v31 = vcombine.high %v152_v28, %v160_v30  ;;  %v2764_v32 = vcombine.low %v151_v26, %v159_v27  ;;  %v135_v34 = vld [vmem:[%s4191_s1 + $0x200] sm:$0xff]  ;;  %v136_v36 = vld [vmem:[%s4191_s1 + $0x208] sm:$0xff] }
   0x9   :  { %968 = vmatprep.subr.bf16.mxu1 %v2783_v23  ;;  %v2766_v33 = vcombine.low %v152_v28, %v160_v30  ;;  %v143_v35 = vld [vmem:[%s4191_s1 + $0x240] sm:$0xff]  ;;  %v144_v38 = vld [vmem:[%s4191_s1 + $0x248] sm:$0xff]  ;;  %955 = vmatprep.mubr.bf16.mxu0 %v3252_v20 }
   0xa   :  { %v2749_v37 = vcombine.high %v135_v34, %v143_v35  ;;  %v2751_v39 = vcombine.high %v136_v36, %v144_v38  ;;  %v2748_v40 = vcombine.low %v135_v34, %v143_v35  ;;  %v2750_v41 = vcombine.low %v136_v36, %v144_v38  ;;  %v119_v42 = vld [vmem:[%s4191_s1 + $0x180] sm:$0xff]  ;;  %v120_v44 = vld [vmem:[%s4191_s1 + $0x188] sm:$0xff]  ;;  %998 = vmatprep.mubr.bf16.mxu1 %v3252_v20  ;;  %v169_v34 = vld [vmem:[%s4191_s1 + $0x310] sm:$0xff] }
   0xb   :  { %926 = vmatpush1.bf16.msra.mxu0 %v2780_v24  ;;  %v127_v43 = vld [vmem:[%s4191_s1 + $0x1c0] sm:$0xff]  ;;  %v128_v46 = vld [vmem:[%s4191_s1 + $0x1c8] sm:$0xff]  ;;  %v170_v35 = vld [vmem:[%s4191_s1 + $0x318] sm:$0xff] }
   0xc   :  { %969 = vmatpush1.bf16.msra.mxu1 %v2782_v25  ;;  %927 = vmatprep.subr.bf16.mxu0 %v2765_v29  ;;  %v2733_v45 = vcombine.high %v119_v42, %v127_v43  ;;  %v2735_v47 = vcombine.high %v120_v44, %v128_v46  ;;  %v2732_v48 = vcombine.low %v119_v42, %v127_v43  ;;  %v103_v50 = vld [vmem:[%s4191_s1 + $0x100] sm:$0xff]  ;;  %v104_v52 = vld [vmem:[%s4191_s1 + $0x108] sm:$0xff]  ;;  %v178_v36 = vld [vmem:[%s4191_s1 + $0x358] sm:$0xff] }
   0xd   :  { %970 = vmatprep.subr.bf16.mxu1 %v2767_v31  ;;  %v2734_v49 = vcombine.low %v120_v44, %v128_v46  ;;  %v111_v51 = vld [vmem:[%s4191_s1 + $0x140] sm:$0xff]  ;;  %v112_v54 = vld [vmem:[%s4191_s1 + $0x148] sm:$0xff]  ;;  %v162_v42 = vld [vmem:[%s4191_s1 + $0x2d8] sm:$0xff] }
   0xe   :  { %v2717_v53 = vcombine.high %v103_v50, %v111_v51  ;;  %v2719_v55 = vcombine.high %v104_v52, %v112_v54  ;;  %v2716_v56 = vcombine.low %v103_v50, %v111_v51  ;;  %v2718_v57 = vcombine.low %v104_v52, %v112_v54  ;;  %v87_v58 = vld [vmem:[%s4191_s1 + $0x80] sm:$0xff]  ;;  %v88_v60 = vld [vmem:[%s4191_s1 + $0x88] sm:$0xff]  ;;  %v138_v50 = vld [vmem:[%s4191_s1 + $0x218] sm:$0xff] }
   0xf   :  { %928 = vmatpush1.bf16.msra.mxu0 %v2764_v32  ;;  %v95_v59 = vld [vmem:[%s4191_s1 + $0xc0] sm:$0xff]  ;;  %v96_v62 = vld [vmem:[%s4191_s1 + $0xc8] sm:$0xff]  ;;  %v146_v51 = vld [vmem:[%s4191_s1 + $0x258] sm:$0xff] }
  0x10   :  { %971 = vmatpush1.bf16.msra.mxu1 %v2766_v33  ;;  %929 = vmatprep.subr.bf16.mxu0 %v2749_v37  ;;  %v2701_v61 = vcombine.high %v87_v58, %v95_v59  ;;  %v2703_v63 = vcombine.high %v88_v60, %v96_v62  ;;  %v71_v2 = vld [vmem:[%s4191_s1] sm:$0xff]  ;;  %v72_v4 = vld [vmem:[%s4191_s1 + $0x8] sm:$0xff] }
  0x11   :  { %972 = vmatprep.subr.bf16.mxu1 %v2751_v39  ;;  %v79_v3 = vld [vmem:[%s4191_s1 + $0x40] sm:$0xff]  ;;  %v80_v6 = vld [vmem:[%s4191_s1 + $0x48] sm:$0xff] }
  0x12   :  { %v2685_v5 = vcombine.high %v71_v2, %v79_v3  ;;  %v2687_v7 = vcombine.high %v72_v4, %v80_v6  ;;  %v2684_v8 = vcombine.low %v71_v2, %v79_v3  ;;  %v2686_v9 = vcombine.low %v72_v4, %v80_v6  ;;  %v2682_v29 = vld [vmem:[%s4193_s5] ss:$0 sm:$0xff]  ;;  %v106_v2 = vld [vmem:[%s4191_s1 + $0x118] sm:$0xff] }
  0x13   :  { %930 = vmatpush1.bf16.msra.mxu0 %v2748_v40  ;;  %v2683_v31 = vld [vmem:[%s4194_s6] ss:$0 sm:$0xff]  ;;  %v161_v40 = vld [vmem:[%s4191_s1 + $0x2d0] sm:$0xff]  ;;  %v114_v3 = vld [vmem:[%s4191_s1 + $0x158] sm:$0xff] }
  0x14   :  { %973 = vmatpush1.bf16.msra.mxu1 %v2750_v41  ;;  %931 = vmatprep.subr.bf16.mxu0 %v2733_v45  ;;  %v154_v41 = vld [vmem:[%s4191_s1 + $0x298] sm:$0xff]  ;;  %v2787_v45 = vcombine.high %v170_v35, %v178_v36 }
  0x15   :  { %974 = vmatprep.subr.bf16.mxu1 %v2735_v47  ;;  %v2786_v47 = vcombine.low %v170_v35, %v178_v36  ;;  %v179_v35 = vld [vmem:[%s4191_s1 + $0x360] sm:$0xff]  ;;  %v172_v36 = vld [vmem:[%s4191_s1 + $0x328] sm:$0xff] }
  0x17   :  { %932 = vmatpush1.bf16.msra.mxu0 %v2732_v48  ;;  %v137_v48 = vld [vmem:[%s4191_s1 + $0x210] sm:$0xff] }
  0x18   :  { %975 = vmatpush1.bf16.msra.mxu1 %v2734_v49  ;;  %933 = vmatprep.subr.bf16.mxu0 %v2717_v53  ;;  %v145_v49 = vld [vmem:[%s4191_s1 + $0x250] sm:$0xff]  ;;  %v2771_v53 = vcombine.high %v154_v41, %v162_v42 }
  0x19   :  { %976 = vmatprep.subr.bf16.mxu1 %v2719_v55  ;;  %v2770_v55 = vcombine.low %v154_v41, %v162_v42  ;;  %v155_v41 = vld [vmem:[%s4191_s1 + $0x2a0] sm:$0xff] }
  0x1a   :  { %v163_v42 = vld [vmem:[%s4191_s1 + $0x2e0] sm:$0xff] }
  0x1b   :  { %934 = vmatpush1.bf16.msra.mxu0 %v2716_v56  ;;  %v121_v56 = vld [vmem:[%s4191_s1 + $0x190] sm:$0xff] }
  0x1c   :  { %977 = vmatpush1.bf16.msra.mxu1 %v2718_v57  ;;  %935 = vmatprep.subr.bf16.mxu0 %v2701_v61  ;;  %v129_v57 = vld [vmem:[%s4191_s1 + $0x1d0] sm:$0xff]  ;;  %v2755_v61 = vcombine.high %v138_v50, %v146_v51 }
  0x1d   :  { %978 = vmatprep.subr.bf16.mxu1 %v2703_v63  ;;  %v2754_v63 = vcombine.low %v138_v50, %v146_v51  ;;  %v2737_v4 = vcombine.high %v121_v56, %v129_v57  ;;  %v2736_v6 = vcombine.low %v121_v56, %v129_v57  ;;  %v139_v50 = vld [vmem:[%s4191_s1 + $0x220] sm:$0xff]  ;;  %v2772_v56 = vcombine.low %v155_v41, %v163_v42 }
  0x1e   :  { %v147_v51 = vld [vmem:[%s4191_s1 + $0x260] sm:$0xff] }
  0x8b   :  { %v32_v10 = vpop.xlane.xlu0 %31 }
  0x8c   :  { %v36_v11 = vmul.f32 0.0078125, %v32_v10  ;;  %v185_v10 = vld [vmem:[%s4191_s1 + $0x390] sm:$0xff] }
  0x8e   :  { %v3311_v12 = vsub.f32 %v27_v0, %v36_v11  ;;  %v2700_v0 = vcombine.low %v87_v58, %v95_v59  ;;  %v193_v11 = vld [vmem:[%s4191_s1 + $0x3d0] sm:$0xff]  ;;  %v122_v58 = vld [vmem:[%s4191_s1 + $0x198] sm:$0xff] }
  0x8f   :  { %v34_v13 = vpop.xlane.xlu0 %33  ;;  %v130_v59 = vld [vmem:[%s4191_s1 + $0x1d8] sm:$0xff] }
  0x90   :  { %v37_v14 = vmul.f32 0.0078125, %v34_v13  ;;  %v40_v15 = vmul.f32 %v3311_v12, %v3311_v12  ;;  %936 = vmatpush1.bf16.msra.mxu0 %v2700_v0  ;;  %v186_v13 = vld [vmem:[%s4191_s1 + $0x398] sm:$0xff]  ;;  %v105_v0 = vld [vmem:[%s4191_s1 + $0x110] sm:$0xff] }
  0x91   :  { %937 = vmatprep.subr.bf16.mxu0 %v2685_v5  ;;  %v2739_v5 = vcombine.high %v122_v58, %v130_v59 }
  0x92   :  { %v3315_v16 = vsub.f32 %v28_v1, %v37_v14  ;;  %42 = vadd.xlane.f32.xlu1 %v40_v15  ;;  %v2702_v1 = vcombine.low %v88_v60, %v96_v62  ;;  %v2801_v14 = vcombine.high %v185_v10, %v193_v11  ;;  %v194_v15 = vld [vmem:[%s4191_s1 + $0x3d8] sm:$0xff]  ;;  %v2753_v60 = vcombine.high %v137_v48, %v145_v49 }
  0x93   :  { %v2802_v18 = vcombine.low %v186_v13, %v194_v15  ;;  %v2803_v19 = vcombine.high %v186_v13, %v194_v15  ;;  %v2752_v62 = vcombine.low %v137_v48, %v145_v49 }
  0x94   :  { %v41_v17 = vmul.f32 %v3315_v16, %v3315_v16  ;;  %979 = vmatpush1.bf16.msra.mxu1 %v2702_v1  ;;  %938 = vmatpush1.bf16.msra.mxu0 %v2684_v8  ;;  %v113_v1 = vld [vmem:[%s4191_s1 + $0x150] sm:$0xff] }
  0x95   :  { %980 = vmatprep.subr.bf16.mxu1 %v2687_v7  ;;  %1009 = vmatprep.subr.bf16.mxu0 %v2801_v14  ;;  %v2738_v7 = vcombine.low %v122_v58, %v130_v59  ;;  %v89_v8 = vld [vmem:[%s4191_s1 + $0x90] sm:$0xff]  ;;  %v2721_v13 = vcombine.high %v105_v0, %v113_v1  ;;  %v2723_v14 = vcombine.high %v106_v2, %v114_v3  ;;  %v123_v58 = vld [vmem:[%s4191_s1 + $0x1a0] sm:$0xff] }
  0x96   :  { %44 = vadd.xlane.f32.xlu1 %v41_v17  ;;  %v2800_v17 = vcombine.low %v185_v10, %v193_v11  ;;  %v90_v10 = vld [vmem:[%s4191_s1 + $0x98] sm:$0xff]  ;;  %v2720_v15 = vcombine.low %v105_v0, %v113_v1  ;;  %v131_v59 = vld [vmem:[%s4191_s1 + $0x1e0] sm:$0xff]  ;;  %v2756_v0 = vcombine.low %v139_v50, %v147_v51 }
  0x97   :  { %v98_v11 = vld [vmem:[%s4191_s1 + $0xd8] sm:$0xff] }
  0x98   :  { %981 = vmatpush1.bf16.msra.mxu1 %v2686_v9  ;;  %v97_v9 = vld [vmem:[%s4191_s1 + $0xd0] sm:$0xff] }
  0x99   :  { %1052 = vmatprep.subr.bf16.mxu1 %v2803_v19  ;;  %v81_v19 = vld [vmem:[%s4191_s1 + $0x50] sm:$0xff] }
 0x11b   :  { %v43_v21 = vpop.xlane.xlu1 %42 }
 0x11c   :  { %v46_v22 = vmul.f32 0.0078125, %v43_v21  ;;  %v74_v21 = vld [vmem:[%s4191_s1 + $0x18] sm:$0xff] }
 0x11e   :  { %v48_v23 = vadd.f32 1e-05, %v46_v22  ;;  %v82_v22 = vld [vmem:[%s4191_s1 + $0x58] sm:$0xff] }
 0x11f   :  { %v45_v24 = vpop.xlane.xlu1 %44 }
 0x120   :  { %3246 = vrsqrt.f32 %v48_v23  ;;  %v47_v25 = vmul.f32 0.0078125, %v45_v24  ;;  %v2705_v23 = vcombine.high %v89_v8, %v97_v9  ;;  %v2707_v24 = vcombine.high %v90_v10, %v98_v11 }
 0x122   :  { %v49_v26 = vadd.f32 1e-05, %v47_v25  ;;  %v2704_v25 = vcombine.low %v89_v8, %v97_v9  ;;  %v2740_v8 = vcombine.low %v123_v58, %v131_v59 }
 0x124   :  { %3248 = vrsqrt.f32 %v49_v26  ;;  %v2706_v26 = vcombine.low %v90_v10, %v98_v11  ;;  %v91_v10 = vld [vmem:[%s4191_s1 + $0xa0] sm:$0xff] }
 0x125   :  { %v99_v11 = vld [vmem:[%s4191_s1 + $0xe0] sm:$0xff] }
 0x12d   :  { %v3247_v27 = vpop.eup %3246 }
 0x12e   :  { %v52_v28 = vmul.f32 %v3247_v27, %v3311_v12  ;;  %v177_v12 = vld [vmem:[%s4191_s1 + $0x350] sm:$0xff]  ;;  %v187_v27 = vld [vmem:[%s4191_s1 + $0x3a0] sm:$0xff] }
 0x12f   :  { %v2785_v44 = vcombine.high %v169_v34, %v177_v12  ;;  %v2784_v46 = vcombine.low %v169_v34, %v177_v12  ;;  %v2690_v34 = vcombine.low %v74_v21, %v82_v22  ;;  %v171_v12 = vld [vmem:[%s4191_s1 + $0x320] sm:$0xff] }
 0x130   :  { %v60_v32 = vmul.f32 %v2682_v29, %v52_v28  ;;  %v195_v28 = vld [vmem:[%s4191_s1 + $0x3e0] sm:$0xff]  ;;  %v2788_v48 = vcombine.low %v171_v12, %v179_v35 }
 0x131   :  { %v3249_v30 = vpop.eup %3248 }
 0x132   :  { %v53_v33 = vmul.f32 %v3249_v30, %v3315_v16  ;;  %v68_v38 = vadd.f32 %v2683_v31, %v60_v32  ;;  %v153_v16 = vld [vmem:[%s4191_s1 + $0x290] sm:$0xff]  ;;  %v196_v30 = vld [vmem:[%s4191_s1 + $0x3e8] sm:$0xff]  ;;  %v2691_v32 = vcombine.high %v74_v21, %v82_v22  ;;  %v75_v21 = vld [vmem:[%s4191_s1 + $0x20] sm:$0xff] }
 0x133   :  { %v2769_v52 = vcombine.high %v153_v16, %v161_v40  ;;  %v2768_v54 = vcombine.low %v153_v16, %v161_v40  ;;  %v2804_v16 = vcombine.low %v187_v27, %v195_v28  ;;  %v83_v22 = vld [vmem:[%s4191_s1 + $0x60] sm:$0xff] }
 0x134   :  { %v61_v37 = vmul.f32 %v2682_v29, %v53_v33  ;;  %v188_v29 = vld [vmem:[%s4191_s1 + $0x3a8] sm:$0xff] }
 0x135   :  { %v2806_v40 = vcombine.low %v188_v29, %v196_v30 }
 0x136   :  { %v69_v39 = vadd.f32 %v2683_v31, %v61_v37  ;;  %v180_v37 = vld [vmem:[%s4191_s1 + $0x368] sm:$0xff] }
 0x137   :  { %v2790_v49 = vcombine.low %v172_v36, %v180_v37 }
 0x138   :  { %v3449_v43 = vpack.c.bf16 %v69_v39, %v68_v38  ;;  %v2805_v38 = vcombine.high %v187_v27, %v195_v28  ;;  %v2807_v39 = vcombine.high %v188_v29, %v196_v30  ;;  %v2708_v27 = vcombine.low %v91_v10, %v99_v11  ;;  %v189_v29 = vld [vmem:[%s4191_s1 + $0x3b0] sm:$0xff] }
 0x139   :  { %v197_v30 = vld [vmem:[%s4191_s1 + $0x3f0] sm:$0xff] }
 0x13a   :  { %956 = vmatmul.mubr.bf16.vlgmr.msra.gmra.mxu0 %v3449_v43  ;;  %999 = vmatmul.mubr.bf16.vlgmr.msra.gmra.mxu1 %v3449_v43 }
 0x13b   :  { %1010 = vmatpush1.bf16.msra.mxu0 %v2800_v17  ;;  %1053 = vmatpush1.bf16.msra.mxu1 %v2802_v18  ;;  %v2722_v17 = vcombine.low %v106_v2, %v114_v3  ;;  %v73_v18 = vld [vmem:[%s4191_s1 + $0x10] sm:$0xff]  ;;  %v107_v2 = vld [vmem:[%s4191_s1 + $0x120] sm:$0xff] }
 0x13c   :  { %1011 = vmatprep.subr.bf16.mxu0 %v2785_v44  ;;  %1054 = vmatprep.subr.bf16.mxu1 %v2787_v45  ;;  %v2689_v31 = vcombine.high %v73_v18, %v81_v19  ;;  %v2688_v33 = vcombine.low %v73_v18, %v81_v19  ;;  %v156_v44 = vld [vmem:[%s4191_s1 + $0x2a8] sm:$0xff]  ;;  %v115_v3 = vld [vmem:[%s4191_s1 + $0x160] sm:$0xff] }
 0x13d   :  { %1041 = vmatprep.mubr.bf16.mxu0 %v3252_v20  ;;  %1084 = vmatprep.mubr.bf16.mxu1 %v3252_v20  ;;  %v164_v45 = vld [vmem:[%s4191_s1 + $0x2e8] sm:$0xff]  ;;  %v2724_v18 = vcombine.low %v107_v2, %v115_v3 }
 0x13e   :  { %v2774_v57 = vcombine.low %v156_v44, %v164_v45 }
 0x13f   :  { %1012 = vmatpush1.bf16.msra.mxu0 %v2784_v46  ;;  %1055 = vmatpush1.bf16.msra.mxu1 %v2786_v47  ;;  %v2789_v46 = vcombine.high %v171_v12, %v179_v35  ;;  %v2791_v47 = vcombine.high %v172_v36, %v180_v37  ;;  %v2692_v12 = vcombine.low %v75_v21, %v83_v22  ;;  %v173_v36 = vld [vmem:[%s4191_s1 + $0x330] sm:$0xff] }
 0x140   :  { %1013 = vmatprep.subr.bf16.mxu0 %v2769_v52  ;;  %1056 = vmatprep.subr.bf16.mxu1 %v2771_v53  ;;  %v140_v52 = vld [vmem:[%s4191_s1 + $0x228] sm:$0xff]  ;;  %v181_v37 = vld [vmem:[%s4191_s1 + $0x370] sm:$0xff] }
 0x141   :  { %v148_v53 = vld [vmem:[%s4191_s1 + $0x268] sm:$0xff] }
 0x142   :  { %v2758_v1 = vcombine.low %v140_v52, %v148_v53 }
 0x143   :  { %1014 = vmatpush1.bf16.msra.mxu0 %v2768_v54  ;;  %1057 = vmatpush1.bf16.msra.mxu1 %v2770_v55  ;;  %v2773_v54 = vcombine.high %v155_v41, %v163_v42  ;;  %v2775_v55 = vcombine.high %v156_v44, %v164_v45  ;;  %v2808_v41 = vcombine.low %v189_v29, %v197_v30 }
 0x144   :  { %1015 = vmatprep.subr.bf16.mxu0 %v2753_v60  ;;  %1058 = vmatprep.subr.bf16.mxu1 %v2755_v61  ;;  %v124_v60 = vld [vmem:[%s4191_s1 + $0x1a8] sm:$0xff]  ;;  %v2793_v44 = vcombine.high %v173_v36, %v181_v37 }
 0x145   :  { %v132_v61 = vld [vmem:[%s4191_s1 + $0x1e8] sm:$0xff] }
 0x146   :  { %v2742_v9 = vcombine.low %v124_v60, %v132_v61 }
 0x147   :  { %1016 = vmatpush1.bf16.msra.mxu0 %v2752_v62  ;;  %1059 = vmatpush1.bf16.msra.mxu1 %v2754_v63  ;;  %v2757_v62 = vcombine.high %v139_v50, %v147_v51  ;;  %v2759_v63 = vcombine.high %v140_v52, %v148_v53  ;;  %v2792_v50 = vcombine.low %v173_v36, %v181_v37  ;;  %v3121_v36 = vld [vmem:[%s4192_s3 + $0xb8] sm:$0xff]   ;;  %v3122_v37 = vld [vmem:[%s4192_s3 + $0x70] sm:$0xff]  }
 0x148   :  { %1017 = vmatprep.subr.bf16.mxu0 %v2737_v4  ;;  %1060 = vmatprep.subr.bf16.mxu1 %v2739_v5  ;;  %v108_v4 = vld [vmem:[%s4191_s1 + $0x128] sm:$0xff] }
 0x149   :  { %v116_v5 = vld [vmem:[%s4191_s1 + $0x168] sm:$0xff] }
 0x14a   :  { %v2726_v19 = vcombine.low %v108_v4, %v116_v5 }
 0x14b   :  { %1018 = vmatpush1.bf16.msra.mxu0 %v2736_v6  ;;  %1061 = vmatpush1.bf16.msra.mxu1 %v2738_v7  ;;  %v2741_v6 = vcombine.high %v123_v58, %v131_v59  ;;  %v2743_v7 = vcombine.high %v124_v60, %v132_v61 }
 0x14c   :  { %1019 = vmatprep.subr.bf16.mxu0 %v2721_v13  ;;  %1062 = vmatprep.subr.bf16.mxu1 %v2723_v14  ;;  %v92_v13 = vld [vmem:[%s4191_s1 + $0xa8] sm:$0xff] }
 0x14d   :  { %v100_v14 = vld [vmem:[%s4191_s1 + $0xe8] sm:$0xff] }
 0x14e   :  { %v2710_v28 = vcombine.low %v92_v13, %v100_v14 }
 0x14f   :  { %1020 = vmatpush1.bf16.msra.mxu0 %v2720_v15  ;;  %1063 = vmatpush1.bf16.msra.mxu1 %v2722_v17  ;;  %v2725_v15 = vcombine.high %v107_v2, %v115_v3  ;;  %v2727_v17 = vcombine.high %v108_v4, %v116_v5  ;;  %v109_v5 = vld [vmem:[%s4191_s1 + $0x130] sm:$0xff] }
 0x150   :  { %1021 = vmatprep.subr.bf16.mxu0 %v2705_v23  ;;  %1064 = vmatprep.subr.bf16.mxu1 %v2707_v24  ;;  %v76_v23 = vld [vmem:[%s4191_s1 + $0x28] sm:$0xff] }
 0x151   :  { %v84_v24 = vld [vmem:[%s4191_s1 + $0x68] sm:$0xff] }
 0x152   :  { %v2694_v35 = vcombine.low %v76_v23, %v84_v24 }
 0x153   :  { %1022 = vmatpush1.bf16.msra.mxu0 %v2704_v25  ;;  %1065 = vmatpush1.bf16.msra.mxu1 %v2706_v26  ;;  %v2709_v25 = vcombine.high %v91_v10, %v99_v11  ;;  %v2711_v26 = vcombine.high %v92_v13, %v100_v14  ;;  %v93_v14 = vld [vmem:[%s4191_s1 + $0xb0] sm:$0xff] }
 0x154   :  { %1023 = vmatprep.subr.bf16.mxu0 %v2689_v31  ;;  %1066 = vmatprep.subr.bf16.mxu1 %v2691_v32  ;;  %v190_v31 = vld [vmem:[%s4191_s1 + $0x3b8] sm:$0xff] }
 0x155   :  { %v198_v32 = vld [vmem:[%s4191_s1 + $0x3f8] sm:$0xff] }
 0x156   :  { %v2810_v42 = vcombine.low %v190_v31, %v198_v32 }
 0x157   :  { %1024 = vmatpush1.bf16.msra.mxu0 %v2688_v33  ;;  %1067 = vmatpush1.bf16.msra.mxu1 %v2690_v34  ;;  %v2693_v33 = vcombine.high %v75_v21, %v83_v22  ;;  %v2695_v34 = vcombine.high %v76_v23, %v84_v24  ;;  %v77_v24 = vld [vmem:[%s4191_s1 + $0x30] sm:$0xff] }
 0x158   :  { %1095 = vmatprep.subr.bf16.mxu0 %v2805_v38  ;;  %1138 = vmatprep.subr.bf16.mxu1 %v2807_v39  ;;  %v174_v38 = vld [vmem:[%s4191_s1 + $0x338] sm:$0xff] }
 0x159   :  { %v182_v39 = vld [vmem:[%s4191_s1 + $0x378] sm:$0xff] }
 0x15a   :  { %1042 = vmatmul.mubr.bf16.vlgmr.msra.gmra.mxu0 %v3449_v43  ;;  %1085 = vmatmul.mubr.bf16.vlgmr.msra.gmra.mxu1 %v3449_v43  ;;  %v2795_v45 = vcombine.high %v174_v38, %v182_v39  ;;  %v2794_v51 = vcombine.low %v174_v38, %v182_v39  ;;  %v3123_v38 = vld [vmem:[%s4192_s3 + $0xf0] sm:$0xff]  }
 0x15b   :  { %1096 = vmatpush1.bf16.msra.mxu0 %v2804_v16  ;;  %1139 = vmatpush1.bf16.msra.mxu1 %v2806_v40  ;;  %v2809_v16 = vcombine.high %v189_v29, %v197_v30  ;;  %v2811_v40 = vcombine.high %v190_v31, %v198_v32  ;;  %v3124_v39 = vld [vmem:[%s4192_s3 + $0x30] sm:$0xff]  }
 0x15c   :  { %1097 = vmatprep.subr.bf16.mxu0 %v2789_v46  ;;  %1140 = vmatprep.subr.bf16.mxu1 %v2791_v47  ;;  %v157_v46 = vld [vmem:[%s4191_s1 + $0x2b0] sm:$0xff] }
 0x15d   :  { %1127 = vmatprep.mubr.bf16.mxu0 %v3252_v20  ;;  %1170 = vmatprep.mubr.bf16.mxu1 %v3252_v20  ;;  %v165_v47 = vld [vmem:[%s4191_s1 + $0x2f0] sm:$0xff] }
 0x15e   :  { %v2777_v52 = vcombine.high %v157_v46, %v165_v47  ;;  %v2776_v58 = vcombine.low %v157_v46, %v165_v47  ;;  %v3132_v46 = vld [vmem:[%s4192_s3 + $0x20] sm:$0xff]  }
 0x15f   :  { %1098 = vmatpush1.bf16.msra.mxu0 %v2788_v48  ;;  %1141 = vmatpush1.bf16.msra.mxu1 %v2790_v49  ;;  %v158_v48 = vld [vmem:[%s4191_s1 + $0x2b8] sm:$0xff]  ;;  %v3133_v47 = vld [vmem:[%s4192_s3 + $0xa0] sm:$0xff]  }
 0x160   :  { %1099 = vmatprep.subr.bf16.mxu0 %v2773_v54  ;;  %1142 = vmatprep.subr.bf16.mxu1 %v2775_v55  ;;  %v166_v49 = vld [vmem:[%s4191_s1 + $0x2f8] sm:$0xff]  ;;  %v141_v54 = vld [vmem:[%s4191_s1 + $0x230] sm:$0xff] }
 0x161   :  { %v2779_v53 = vcombine.high %v158_v48, %v166_v49  ;;  %v149_v55 = vld [vmem:[%s4191_s1 + $0x270] sm:$0xff]  ;;  %v2778_v59 = vcombine.low %v158_v48, %v166_v49  ;;  %v3134_v48 = vld [vmem:[%s4192_s3 + $0x58] sm:$0xff]  }
 0x162   :  { %v2761_v60 = vcombine.high %v141_v54, %v149_v55  ;;  %v3135_v49 = vld [vmem:[%s4192_s3 + $0xd8] sm:$0xff]  }
 0x163   :  { %1100 = vmatpush1.bf16.msra.mxu0 %v2772_v56  ;;  %1143 = vmatpush1.bf16.msra.mxu1 %v2774_v57  ;;  %v142_v56 = vld [vmem:[%s4191_s1 + $0x238] sm:$0xff] }
 0x164   :  { %1101 = vmatprep.subr.bf16.mxu0 %v2757_v62  ;;  %1144 = vmatprep.subr.bf16.mxu1 %v2759_v63  ;;  %v150_v57 = vld [vmem:[%s4191_s1 + $0x278] sm:$0xff]  ;;  %v125_v62 = vld [vmem:[%s4191_s1 + $0x1b0] sm:$0xff] }
 0x165   :  { %v2763_v61 = vcombine.high %v142_v56, %v150_v57  ;;  %v133_v63 = vld [vmem:[%s4191_s1 + $0x1f0] sm:$0xff]  ;;  %v2762_v2 = vcombine.low %v142_v56, %v150_v57  ;;  %v3142_v56 = vld [vmem:[%s4192_s3 + $0x48] sm:$0xff]  }
 0x166   :  { %v2745_v3 = vcombine.high %v125_v62, %v133_v63  ;;  %v3143_v57 = vld [vmem:[%s4192_s3 + $0xc8] sm:$0xff]  }
 0x167   :  { %1102 = vmatpush1.bf16.msra.mxu0 %v2756_v0  ;;  %1145 = vmatpush1.bf16.msra.mxu1 %v2758_v1  ;;  %v134_v0 = vld [vmem:[%s4191_s1 + $0x1f8] sm:$0xff]  ;;  %v2760_v1 = vcombine.low %v141_v54, %v149_v55  ;;  %v3140_v54 = vld [vmem:[%s4192_s3 + $0x10] sm:$0xff]  }
 0x168   :  { %1103 = vmatprep.subr.bf16.mxu0 %v2741_v6  ;;  %1146 = vmatprep.subr.bf16.mxu1 %v2743_v7  ;;  %v117_v6 = vld [vmem:[%s4191_s1 + $0x170] sm:$0xff]  ;;  %v110_v7 = vld [vmem:[%s4191_s1 + $0x138] sm:$0xff] }
 0x169   :  { %v2729_v11 = vcombine.high %v109_v5, %v117_v6  ;;  %v3141_v55 = vld [vmem:[%s4192_s3 + $0x90] sm:$0xff]  }
 0x16b   :  { %1104 = vmatpush1.bf16.msra.mxu0 %v2740_v8  ;;  %1147 = vmatpush1.bf16.msra.mxu1 %v2742_v9  ;;  %v118_v8 = vld [vmem:[%s4191_s1 + $0x178] sm:$0xff]  ;;  %v2744_v9 = vcombine.low %v125_v62, %v133_v63  ;;  %v3147_v62 = vld [vmem:[%s4192_s3 + $0xc0] sm:$0xff]  }
 0x16c   :  { %1105 = vmatprep.subr.bf16.mxu0 %v2725_v15  ;;  %1148 = vmatprep.subr.bf16.mxu1 %v2727_v17  ;;  %v2731_v13 = vcombine.high %v110_v7, %v118_v8  ;;  %v101_v15 = vld [vmem:[%s4191_s1 + $0xf0] sm:$0xff]  ;;  %v94_v17 = vld [vmem:[%s4191_s1 + $0xb8] sm:$0xff]  ;;  %v2730_v21 = vcombine.low %v110_v7, %v118_v8 }
 0x16d   :  { %v2713_v22 = vcombine.high %v93_v14, %v101_v15 }
 0x16f   :  { %1106 = vmatpush1.bf16.msra.mxu0 %v2724_v18  ;;  %1149 = vmatpush1.bf16.msra.mxu1 %v2726_v19  ;;  %v102_v18 = vld [vmem:[%s4191_s1 + $0xf8] sm:$0xff]  ;;  %v2728_v19 = vcombine.low %v109_v5, %v117_v6  ;;  %v200_v5 = vld [vmem:[%s4195_s2 + $0x8] sm:$0xff] }
 0x170   :  { %1107 = vmatprep.subr.bf16.mxu0 %v2709_v25  ;;  %1150 = vmatprep.subr.bf16.mxu1 %v2711_v26  ;;  %v2715_v23 = vcombine.high %v94_v17, %v102_v18  ;;  %v85_v25 = vld [vmem:[%s4191_s1 + $0x70] sm:$0xff]  ;;  %v78_v26 = vld [vmem:[%s4191_s1 + $0x38] sm:$0xff]  ;;  %v2714_v29 = vcombine.low %v94_v17, %v102_v18 }
 0x171   :  { %v2697_v30 = vcombine.high %v77_v24, %v85_v25  ;;  %v2696_v32 = vcombine.low %v77_v24, %v85_v25 }
 0x173   :  { %1108 = vmatpush1.bf16.msra.mxu0 %v2708_v27  ;;  %1151 = vmatpush1.bf16.msra.mxu1 %v2710_v28  ;;  %v86_v27 = vld [vmem:[%s4191_s1 + $0x78] sm:$0xff]  ;;  %v2712_v28 = vcombine.low %v93_v14, %v101_v15 }
 0x174   :  { %1109 = vmatprep.subr.bf16.mxu0 %v2693_v33  ;;  %1152 = vmatprep.subr.bf16.mxu1 %v2695_v34  ;;  %v2699_v31 = vcombine.high %v78_v26, %v86_v27  ;;  %v2698_v33 = vcombine.low %v78_v26, %v86_v27  ;;  %v3118_v34 = vld [vmem:[%s4192_s3 + $0x78] sm:$0xff]  }
 0x177   :  { %1110 = vmatpush1.bf16.msra.mxu0 %v2692_v12  ;;  %1153 = vmatpush1.bf16.msra.mxu1 %v2694_v35  ;;  %v3119_v12 = vld [vmem:[%s4192_s3 + $0xf8] sm:$0xff]  }
 0x178   :  { %1181 = vmatprep.subr.bf16.mxu0 %v2809_v16  ;;  %1224 = vmatprep.subr.bf16.mxu1 %v2811_v40  ;;  %v3120_v35 = vld [vmem:[%s4192_s3 + $0x38] sm:$0xff]   ;;  %v3125_v16 = vld [vmem:[%s4192_s3 + $0xb0] sm:$0xff]   ;;  %v3126_v40 = vld [vmem:[%s4192_s3 + $0x68] sm:$0xff]  }
 0x17a   :  { %1128 = vmatmul.mubr.bf16.vlgmr.msra.gmra.mxu0 %v3449_v43  ;;  %1171 = vmatmul.mubr.bf16.vlgmr.msra.gmra.mxu1 %v3449_v43 }
 0x17b   :  { %1182 = vmatpush1.bf16.msra.mxu0 %v2808_v41  ;;  %1225 = vmatpush1.bf16.msra.mxu1 %v2810_v42  ;;  %v3128_v41 = vld [vmem:[%s4192_s3 + $0x28] sm:$0xff]  }
 0x17c   :  { %1183 = vmatprep.subr.bf16.mxu0 %v2793_v44  ;;  %1226 = vmatprep.subr.bf16.mxu1 %v2795_v45  ;;  %v3129_v42 = vld [vmem:[%s4192_s3 + $0xa8] sm:$0xff]   ;;  %v3130_v44 = vld [vmem:[%s4192_s3 + $0x60] sm:$0xff]  }
 0x17d   :  { %1213 = vmatprep.mubr.bf16.mxu0 %v3252_v20  ;;  %1256 = vmatprep.mubr.bf16.mxu1 %v3252_v20  ;;  %v126_v20 = vld [vmem:[%s4191_s1 + $0x1b8] sm:$0xff]  ;;  %v3131_v45 = vld [vmem:[%s4192_s3 + $0xe0] sm:$0xff]  }
 0x17e   :  { %v2747_v4 = vcombine.high %v126_v20, %v134_v0  ;;  %v2746_v10 = vcombine.low %v126_v20, %v134_v0  ;;  %v3148_v20 = vld [vmem:[%s4192_s3] sm:$0xff]  }
 0x17f   :  { %1184 = vmatpush1.bf16.msra.mxu0 %v2792_v50  ;;  %1227 = vmatpush1.bf16.msra.mxu1 %v2794_v51  ;;  %v3136_v50 = vld [vmem:[%s4192_s3 + $0x18] sm:$0xff]   ;;  %v3149_v0 = vld [vmem:[%s4192_s3 + $0x80] sm:$0xff]  }
 0x180   :  { %1185 = vmatprep.subr.bf16.mxu0 %v2777_v52  ;;  %1228 = vmatprep.subr.bf16.mxu1 %v2779_v53  ;;  %v3137_v51 = vld [vmem:[%s4192_s3 + $0x98] sm:$0xff]   ;;  %v3138_v52 = vld [vmem:[%s4192_s3 + $0x50] sm:$0xff]  }
 0x181   :  { %v3139_v53 = vld [vmem:[%s4192_s3 + $0xd0] sm:$0xff]  }
 0x183   :  { %1186 = vmatpush1.bf16.msra.mxu0 %v2776_v58  ;;  %1229 = vmatpush1.bf16.msra.mxu1 %v2778_v59  ;;  %v203_v58 = vlaneseq  ;;  %v3144_v59 = vld [vmem:[%s4192_s3 + $0x8] sm:$0xff]  }
 0x184   :  { %1187 = vmatprep.subr.bf16.mxu0 %v2761_v60  ;;  %1230 = vmatprep.subr.bf16.mxu1 %v2763_v61  ;;  %v3145_v60 = vld [vmem:[%s4192_s3 + $0x88] sm:$0xff]   ;;  %v3146_v61 = vld [vmem:[%s4192_s3 + $0x40] sm:$0xff]  }
 0x185   :  { %v3807_v63 = vshrl.u32 %v203_v58, 7  ;;  %v3156_v58 = vld [vmem:[%s4192_s3 + $0x130] sm:$0xff]  }
 0x187   :  { %1188 = vmatpush1.bf16.msra.mxu0 %v2760_v1  ;;  %1231 = vmatpush1.bf16.msra.mxu1 %v2762_v2  ;;  %v3150_v1 = vld [vmem:[%s4192_s3 + $0x178] sm:$0xff]   ;;  %v209_v6 = vsub.s32 1, %v3807_v63  ;;  %v217_v7 = vsub.s32 3, %v3807_v63  ;;  %v229_v14 = vsub.s32 6, %v3807_v63  ;;  %v225_v15 = vsub.s32 5, %v3807_v63 }
 0x188   :  { %1189 = vmatprep.subr.bf16.mxu0 %v2745_v3  ;;  %1232 = vmatprep.subr.bf16.mxu1 %v2747_v4  ;;  %v3151_v2 = vld [vmem:[%s4192_s3 + $0x1f8] sm:$0xff]   ;;  %v205_v3 = vsub.s32 0, %v3807_v63  ;;  %v213_v4 = vsub.s32 2, %v3807_v63  ;;  %v233_v17 = vsub.s32 7, %v3807_v63 }
 0x18a   :  { %v3828_v8 = vrot.slane %v200_v5, %v205_v3 }
 0x18b   :  { %1190 = vmatpush1.bf16.msra.mxu0 %v2744_v9  ;;  %1233 = vmatpush1.bf16.msra.mxu1 %v2746_v10  ;;  %v3830_v9 = vrot.slane %v200_v5, %v213_v4  ;;  %v3832_v10 = vrot.slane %v200_v5, %v209_v6 }
 0x18c   :  { %1191 = vmatprep.subr.bf16.mxu0 %v2729_v11  ;;  %1234 = vmatprep.subr.bf16.mxu1 %v2731_v13  ;;  %v3834_v11 = vrot.slane %v200_v5, %v217_v7  ;;  %v221_v13 = vsub.s32 4, %v3807_v63  ;;  %v3178_v63 = vld [vmem:[%s4192_s3 + $0x140] sm:$0xff]  }
 0x18e   :  { %v3842_v18 = vrot.slane %v200_v5, %v221_v13 }
 0x18f   :  { %1192 = vmatpush1.bf16.msra.mxu0 %v2728_v19  ;;  %1235 = vmatpush1.bf16.msra.mxu1 %v2730_v21  ;;  %v3846_v19 = vrot.slane %v200_v5, %v229_v14  ;;  %v3850_v21 = vrot.slane %v200_v5, %v225_v15 }
 0x190   :  { %1193 = vmatprep.subr.bf16.mxu0 %v2713_v22  ;;  %1236 = vmatprep.subr.bf16.mxu1 %v2715_v23  ;;  %v3854_v22 = vrot.slane %v200_v5, %v233_v17  ;;  %v3859_v23 = vld [vmem:[%s4195_s2] sm:$0xff]  ;;  %v3167_v5 = vld [vmem:[%s4192_s3 + $0x1d8] sm:$0xff]  }
 0x191   :  { %v210_v26 = vrot.slane %v3859_v23, %v209_v6  ;;  %v218_v27 = vrot.slane %v3859_v23, %v217_v7  ;;  %v3168_v6 = vld [vmem:[%s4192_s3 + $0x118] sm:$0xff]  }
 0x192   :  { %v3169_v7 = vld [vmem:[%s4192_s3 + $0x198] sm:$0xff]  }
 0x193   :  { %1194 = vmatpush1.bf16.msra.mxu0 %v2712_v28  ;;  %1237 = vmatpush1.bf16.msra.mxu1 %v2714_v29  ;;  %v206_v28 = vrot.slane %v3859_v23, %v205_v3  ;;  %v214_v29 = vrot.slane %v3859_v23, %v213_v4  ;;  %v3165_v3 = vld [vmem:[%s4192_s3 + $0x1a0] sm:$0xff]   ;;  %v3166_v4 = vld [vmem:[%s4192_s3 + $0x158] sm:$0xff]  }
 0x194   :  { %1195 = vmatprep.subr.bf16.mxu0 %v2697_v30  ;;  %1238 = vmatprep.subr.bf16.mxu1 %v2699_v31 }
 0x197   :  { %1196 = vmatpush1.bf16.msra.mxu0 %v2696_v32  ;;  %1239 = vmatpush1.bf16.msra.mxu1 %v2698_v33 }
 0x198   :  { %2941 = vmatprep.subr.bf16.mxu0 %v3118_v34  ;;  %2963 = vmatprep.subr.bf16.mxu1 %v3119_v12 }
 0x19a   :  { %1214 = vmatmul.mubr.bf16.vlgmr.msra.gmra.mxu0 %v3449_v43  ;;  %1257 = vmatmul.mubr.bf16.vlgmr.msra.gmra.mxu1 %v3449_v43  ;;  %v3127_v43 = vld [vmem:[%s4192_s3 + $0xe8] sm:$0xff]  }
 0x19b   :  { %2942 = vmatpush3.bf16.msra.mxu0 %v3120_v35  ;;  %2964 = vmatpush3.bf16.msra.mxu1 %v3121_v36 }
 0x19c   :  { %2943 = vmatprep.subr.bf16.mxu0 %v3122_v37  ;;  %2965 = vmatprep.subr.bf16.mxu1 %v3123_v38 }
 0x19f   :  { %2944 = vmatpush3.bf16.msra.mxu0 %v3124_v39  ;;  %2966 = vmatpush3.bf16.msra.mxu1 %v3125_v16 }
 0x1a0   :  { %2945 = vmatprep.subr.bf16.mxu0 %v3126_v40  ;;  %2967 = vmatprep.subr.bf16.mxu1 %v3127_v43 }
 0x1a3   :  { %2946 = vmatpush3.bf16.msra.mxu0 %v3128_v41  ;;  %2968 = vmatpush3.bf16.msra.mxu1 %v3129_v42 }
 0x1a4   :  { %2947 = vmatprep.subr.bf16.mxu0 %v3130_v44  ;;  %2969 = vmatprep.subr.bf16.mxu1 %v3131_v45 }
 0x1a7   :  { %2948 = vmatpush3.bf16.msra.mxu0 %v3132_v46  ;;  %2970 = vmatpush3.bf16.msra.mxu1 %v3133_v47 }
 0x1a8   :  { %2949 = vmatprep.subr.bf16.mxu0 %v3134_v48  ;;  %2971 = vmatprep.subr.bf16.mxu1 %v3135_v49 }
 0x1ab   :  { %2950 = vmatpush3.bf16.msra.mxu0 %v3136_v50  ;;  %2972 = vmatpush3.bf16.msra.mxu1 %v3137_v51 }
 0x1ac   :  { %2951 = vmatprep.subr.bf16.mxu0 %v3138_v52  ;;  %2973 = vmatprep.subr.bf16.mxu1 %v3139_v53  ;;  %v3152_v52 = vld [vmem:[%s4192_s3 + $0x138] sm:$0xff]  }
 0x1ad   :  { %v3153_v53 = vld [vmem:[%s4192_s3 + $0x1b8] sm:$0xff]  }
 0x1af   :  { %2952 = vmatpush3.bf16.msra.mxu0 %v3140_v54  ;;  %2974 = vmatpush3.bf16.msra.mxu1 %v3141_v55 }
 0x1b0   :  { %2953 = vmatprep.subr.bf16.mxu0 %v3142_v56  ;;  %2975 = vmatprep.subr.bf16.mxu1 %v3143_v57  ;;  %v3154_v56 = vld [vmem:[%s4192_s3 + $0x170] sm:$0xff]  }
 0x1b1   :  { %v3155_v57 = vld [vmem:[%s4192_s3 + $0x1f0] sm:$0xff]  }
 0x1b3   :  { %2954 = vmatpush3.bf16.msra.mxu0 %v3144_v59  ;;  %2976 = vmatpush3.bf16.msra.mxu1 %v3145_v60  ;;  %v3157_v59 = vld [vmem:[%s4192_s3 + $0x1b0] sm:$0xff]   ;;  %v3158_v60 = vld [vmem:[%s4192_s3 + $0x168] sm:$0xff]  }
 0x1b4   :  { %2955 = vmatprep.subr.bf16.mxu0 %v3146_v61  ;;  %2977 = vmatprep.subr.bf16.mxu1 %v3147_v62  ;;  %v3159_v61 = vld [vmem:[%s4192_s3 + $0x1e8] sm:$0xff]  }
 0x1b5   :  { %v3160_v62 = vld [vmem:[%s4192_s3 + $0x128] sm:$0xff]  }
 0x1b7   :  { %2956 = vmatpush3.bf16.msra.mxu0 %v3148_v20  ;;  %2978 = vmatpush3.bf16.msra.mxu1 %v3149_v0  ;;  %v3161_v20 = vld [vmem:[%s4192_s3 + $0x1a8] sm:$0xff]   ;;  %v3162_v0 = vld [vmem:[%s4192_s3 + $0x160] sm:$0xff]  }
 0x1b8   :  { %2985 = vmatprep.subr.bf16.mxu0 %v3150_v1  ;;  %3007 = vmatprep.subr.bf16.mxu1 %v3151_v2  ;;  %v3163_v1 = vld [vmem:[%s4192_s3 + $0x1e0] sm:$0xff]  }
 0x1b9   :  { %v3164_v2 = vld [vmem:[%s4192_s3 + $0x120] sm:$0xff]  }
 0x1fa   :  { %v957_v24 = vpop.f32.mrf.mxu0  ;;  %v1000_v25 = vpop.f32.mrf.mxu1 }
 0x1fb   :  { %v958_v37 = vadd.f32 %v957_v24, %v206_v28  ;;  %v1001_v38 = vadd.f32 %v1000_v25, %v214_v29  ;;  %v3170_v24 = vld [vmem:[%s4192_s3 + $0x150] sm:$0xff]  }
 0x1fc   :  { %v959_v30 = vpop.f32.mrf.mxu0  ;;  %v1002_v31 = vpop.f32.mrf.mxu1  ;;  %v3171_v25 = vld [vmem:[%s4192_s3 + $0x1d0] sm:$0xff]  }
 0x1fd   :  { %v960_v34 = vadd.f32 %v959_v30, %v210_v26  ;;  %v1003_v12 = vadd.f32 %v1002_v31, %v218_v27  ;;  %v1267_v48 = vmax.f32 %v958_v37, 0.0  ;;  %v1269_v49 = vmax.f32 %v1001_v38, 0.0  ;;  %v3174_v30 = vld [vmem:[%s4192_s3 + $0x148] sm:$0xff]  }
 0x1fe   :  { %v961_v32 = vpop.f32.mrf.mxu0  ;;  %v1004_v33 = vpop.f32.mrf.mxu1  ;;  %v3175_v31 = vld [vmem:[%s4192_s3 + $0x1c8] sm:$0xff]  }
 0x1ff   :  { %v962_v35 = vadd.f32 %v961_v32, %v206_v28  ;;  %v1005_v36 = vadd.f32 %v1004_v33, %v214_v29  ;;  %v1268_v44 = vmax.f32 %v960_v34, 0.0  ;;  %v1270_v45 = vmax.f32 %v1003_v12, 0.0 }
 0x200   :  { %v963_v39 = vpop.f32.mrf.mxu0  ;;  %v1006_v16 = vpop.f32.mrf.mxu1  ;;  %v226_v32 = vrot.slane %v3859_v23, %v225_v15  ;;  %v234_v33 = vrot.slane %v3859_v23, %v233_v17  ;;  %v222_v34 = vrot.slane %v3859_v23, %v221_v13  ;;  %v230_v12 = vrot.slane %v3859_v23, %v229_v14  ;;  %v3176_v15 = vld [vmem:[%s4192_s3 + $0x108] sm:$0xff]   ;;  %v3179_v13 = vld [vmem:[%s4192_s3 + $0x1c0] sm:$0xff]  }
 0x201   :  { %v964_v40 = vadd.f32 %v963_v39, %v210_v26  ;;  %v1007_v43 = vadd.f32 %v1006_v16, %v218_v27  ;;  %v1283_v41 = vmax.f32 %v962_v35, 0.0  ;;  %v1285_v42 = vmax.f32 %v1005_v36, 0.0  ;;  %v3172_v26 = vld [vmem:[%s4192_s3 + $0x110] sm:$0xff]   ;;  %v3177_v17 = vld [vmem:[%s4192_s3 + $0x188] sm:$0xff]  }
 0x202   :  { %v3173_v27 = vld [vmem:[%s4192_s3 + $0x190] sm:$0xff]  }
 0x203   :  { %v1284_v46 = vmax.f32 %v964_v40, 0.0  ;;  %v1286_v47 = vmax.f32 %v1007_v43, 0.0  ;;  %v1299_v54 = vpack.c.bf16 %v1283_v41, %v1267_v48  ;;  %v1301_v55 = vpack.c.bf16 %v1285_v42, %v1269_v49 }
 0x205   :  { %v1300_v50 = vpack.c.bf16 %v1284_v46, %v1268_v44  ;;  %v1302_v51 = vpack.c.bf16 %v1286_v47, %v1270_v45  ;;  %v3180_v46 = vld [vmem:[%s4192_s3 + $0x100] sm:$0xff]  }
 0x206   :  { %v3181_v47 = vld [vmem:[%s4192_s3 + $0x180] sm:$0xff]  }
 0x207   :  { %2378 = vmatprep.mubr.bf16.mxu0 %v1300_v50  ;;  %2419 = vmatprep.mubr.bf16.mxu1 %v1302_v51  ;;  %v3182_v50 = vld [vmem:[%s4192_s3 + $0x278] sm:$0xff]  }
 0x208   :  { %2379 = vmatmul.mubr.bf16.vlgmr.msra.gmra.mxu0 %v1299_v54  ;;  %2420 = vmatmul.mubr.bf16.vlgmr.msra.gmra.mxu1 %v1301_v55  ;;  %v3183_v51 = vld [vmem:[%s4192_s3 + $0x2f8] sm:$0xff]  }
 0x209   :  { %2986 = vmatpush3.bf16.msra.mxu0 %v3152_v52  ;;  %3008 = vmatpush3.bf16.msra.mxu1 %v3153_v53 }
 0x20a   :  { %2987 = vmatprep.subr.bf16.mxu0 %v3154_v56  ;;  %3009 = vmatprep.subr.bf16.mxu1 %v3155_v57 }
 0x20d   :  { %2988 = vmatpush3.bf16.msra.mxu0 %v3156_v58  ;;  %3010 = vmatpush3.bf16.msra.mxu1 %v3157_v59 }
 0x20e   :  { %2989 = vmatprep.subr.bf16.mxu0 %v3158_v60  ;;  %3011 = vmatprep.subr.bf16.mxu1 %v3159_v61  ;;  %v3184_v60 = vld [vmem:[%s4192_s3 + $0x238] sm:$0xff]  }
 0x20f   :  { %v3185_v61 = vld [vmem:[%s4192_s3 + $0x2b8] sm:$0xff]  }
 0x211   :  { %2990 = vmatpush3.bf16.msra.mxu0 %v3160_v62  ;;  %3012 = vmatpush3.bf16.msra.mxu1 %v3161_v20 }
 0x212   :  { %2991 = vmatprep.subr.bf16.mxu0 %v3162_v0  ;;  %3013 = vmatprep.subr.bf16.mxu1 %v3163_v1  ;;  %v3186_v0 = vld [vmem:[%s4192_s3 + $0x270] sm:$0xff]  }
 0x213   :  { %v3187_v1 = vld [vmem:[%s4192_s3 + $0x2f0] sm:$0xff]  }
 0x215   :  { %2992 = vmatpush3.bf16.msra.mxu0 %v3164_v2  ;;  %3014 = vmatpush3.bf16.msra.mxu1 %v3165_v3  ;;  %v3188_v2 = vld [vmem:[%s4192_s3 + $0x230] sm:$0xff]  }
 0x216   :  { %2993 = vmatprep.subr.bf16.mxu0 %v3166_v4  ;;  %3015 = vmatprep.subr.bf16.mxu1 %v3167_v5  ;;  %v3189_v3 = vld [vmem:[%s4192_s3 + $0x2b0] sm:$0xff]   ;;  %v3190_v4 = vld [vmem:[%s4192_s3 + $0x268] sm:$0xff]  }
 0x217   :  { %v3191_v5 = vld [vmem:[%s4192_s3 + $0x2e8] sm:$0xff]  }
 0x219   :  { %2994 = vmatpush3.bf16.msra.mxu0 %v3168_v6  ;;  %3016 = vmatpush3.bf16.msra.mxu1 %v3169_v7  ;;  %v3192_v6 = vld [vmem:[%s4192_s3 + $0x228] sm:$0xff]  }
 0x21a   :  { %v1043_v28 = vpop.f32.mrf.mxu0  ;;  %v1086_v29 = vpop.f32.mrf.mxu1  ;;  %2995 = vmatprep.subr.bf16.mxu0 %v3170_v24  ;;  %3017 = vmatprep.subr.bf16.mxu1 %v3171_v25  ;;  %v3193_v7 = vld [vmem:[%s4192_s3 + $0x2a8] sm:$0xff]   ;;  %v3194_v24 = vld [vmem:[%s4192_s3 + $0x260] sm:$0xff]  }
 0x21b   :  { %v1044_v40 = vadd.f32 %v1043_v28, %v222_v34  ;;  %v1087_v43 = vadd.f32 %v1086_v29, %v230_v12  ;;  %v3195_v25 = vld [vmem:[%s4192_s3 + $0x2e0] sm:$0xff]   ;;  %v3198_v28 = vld [vmem:[%s4192_s3 + $0x258] sm:$0xff]  }
 0x21c   :  { %v1045_v35 = vpop.f32.mrf.mxu0  ;;  %v1088_v36 = vpop.f32.mrf.mxu1  ;;  %v3199_v29 = vld [vmem:[%s4192_s3 + $0x2d8] sm:$0xff]  }
 0x21d   :  { %2996 = vmatpush3.bf16.msra.mxu0 %v3172_v26  ;;  %3018 = vmatpush3.bf16.msra.mxu1 %v3173_v27  ;;  %v1046_v14 = vadd.f32 %v1045_v35, %v226_v32  ;;  %v1089_v23 = vadd.f32 %v1088_v36, %v234_v33  ;;  %v1271_v56 = vmax.f32 %v1044_v40, 0.0  ;;  %v1273_v57 = vmax.f32 %v1087_v43, 0.0  ;;  %v3196_v26 = vld [vmem:[%s4192_s3 + $0x220] sm:$0xff]  }
 0x21e   :  { %v1047_v37 = vpop.f32.mrf.mxu0  ;;  %v1090_v38 = vpop.f32.mrf.mxu1  ;;  %2997 = vmatprep.subr.bf16.mxu0 %v3174_v30  ;;  %3019 = vmatprep.subr.bf16.mxu1 %v3175_v31  ;;  %v3197_v27 = vld [vmem:[%s4192_s3 + $0x2a0] sm:$0xff]   ;;  %v3200_v30 = vld [vmem:[%s4192_s3 + $0x218] sm:$0xff]  }
 0x21f   :  { %v1048_v39 = vadd.f32 %v1047_v37, %v222_v34  ;;  %v1091_v16 = vadd.f32 %v1090_v38, %v230_v12  ;;  %v1272_v52 = vmax.f32 %v1046_v14, 0.0  ;;  %v1274_v53 = vmax.f32 %v1089_v23, 0.0  ;;  %v3201_v31 = vld [vmem:[%s4192_s3 + $0x298] sm:$0xff]   ;;  %v3204_v34 = vld [vmem:[%s4192_s3 + $0x210] sm:$0xff]  }
 0x220   :  { %v1049_v41 = vpop.f32.mrf.mxu0  ;;  %v1092_v42 = vpop.f32.mrf.mxu1  ;;  %v3205_v12 = vld [vmem:[%s4192_s3 + $0x290] sm:$0xff]  }
 0x221   :  { %v1050_v44 = vadd.f32 %v1049_v41, %v226_v32  ;;  %v1093_v45 = vadd.f32 %v1092_v42, %v234_v33  ;;  %2998 = vmatpush3.bf16.msra.mxu0 %v3176_v15  ;;  %3020 = vmatpush3.bf16.msra.mxu1 %v3177_v17  ;;  %v1287_v48 = vmax.f32 %v1048_v39, 0.0  ;;  %v1289_v49 = vmax.f32 %v1091_v16, 0.0  ;;  %v3202_v32 = vld [vmem:[%s4192_s3 + $0x250] sm:$0xff]   ;;  %v3206_v15 = vld [vmem:[%s4192_s3 + $0x248] sm:$0xff]   ;;  %v3210_v39 = vld [vmem:[%s4192_s3 + $0x240] sm:$0xff]  }
 0x222   :  { %2999 = vmatprep.subr.bf16.mxu0 %v3178_v63  ;;  %3021 = vmatprep.subr.bf16.mxu1 %v3179_v13  ;;  %v3203_v33 = vld [vmem:[%s4192_s3 + $0x2d0] sm:$0xff]   ;;  %v3207_v17 = vld [vmem:[%s4192_s3 + $0x2c8] sm:$0xff]   ;;  %v3211_v16 = vld [vmem:[%s4192_s3 + $0x2c0] sm:$0xff]  }
 0x223   :  { %v1288_v54 = vmax.f32 %v1050_v44, 0.0  ;;  %v1290_v55 = vmax.f32 %v1093_v45, 0.0  ;;  %v1303_v62 = vpack.c.bf16 %v1287_v48, %v1271_v56  ;;  %v1305_v20 = vpack.c.bf16 %v1289_v49, %v1273_v57  ;;  %v3208_v63 = vld [vmem:[%s4192_s3 + $0x208] sm:$0xff]  }
 0x224   :  { %v3209_v13 = vld [vmem:[%s4192_s3 + $0x288] sm:$0xff]  }
 0x225   :  { %v1304_v58 = vpack.c.bf16 %v1288_v54, %v1272_v52  ;;  %v1306_v59 = vpack.c.bf16 %v1290_v55, %v1274_v53  ;;  %3000 = vmatpush3.bf16.msra.mxu0 %v3180_v46  ;;  %3022 = vmatpush3.bf16.msra.mxu1 %v3181_v47 }
 0x226   :  { %3029 = vmatprep.subr.bf16.mxu0 %v3182_v50  ;;  %3051 = vmatprep.subr.bf16.mxu1 %v3183_v51  ;;  %v3212_v50 = vld [vmem:[%s4192_s3 + $0x200] sm:$0xff]  }
 0x227   :  { %2460 = vmatprep.mubr.bf16.mxu0 %v1304_v58  ;;  %2501 = vmatprep.mubr.bf16.mxu1 %v1306_v59  ;;  %v3213_v51 = vld [vmem:[%s4192_s3 + $0x280] sm:$0xff]  }
 0x228   :  { %2461 = vmatmul.mubr.bf16.vlgmr.msra.gmra.mxu0 %v1303_v62  ;;  %2502 = vmatmul.mubr.bf16.vlgmr.msra.gmra.mxu1 %v1305_v20 }
 0x229   :  { %3030 = vmatpush3.bf16.msra.mxu0 %v3184_v60  ;;  %3052 = vmatpush3.bf16.msra.mxu1 %v3185_v61  ;;  %v3216_v60 = vld [vmem:[%s4192_s3 + $0x338] sm:$0xff]  }
 0x22a   :  { %3031 = vmatprep.subr.bf16.mxu0 %v3186_v0  ;;  %3053 = vmatprep.subr.bf16.mxu1 %v3187_v1  ;;  %v3217_v61 = vld [vmem:[%s4192_s3 + $0x3b8] sm:$0xff]   ;;  %v3218_v0 = vld [vmem:[%s4192_s3 + $0x370] sm:$0xff]  }
 0x22b   :  { %v3219_v1 = vld [vmem:[%s4192_s3 + $0x3f0] sm:$0xff]  }
 0x22d   :  { %3032 = vmatpush3.bf16.msra.mxu0 %v3188_v2  ;;  %3054 = vmatpush3.bf16.msra.mxu1 %v3189_v3  ;;  %v3220_v2 = vld [vmem:[%s4192_s3 + $0x330] sm:$0xff]  }
 0x22e   :  { %3033 = vmatprep.subr.bf16.mxu0 %v3190_v4  ;;  %3055 = vmatprep.subr.bf16.mxu1 %v3191_v5  ;;  %v3221_v3 = vld [vmem:[%s4192_s3 + $0x3b0] sm:$0xff]   ;;  %v3222_v4 = vld [vmem:[%s4192_s3 + $0x368] sm:$0xff]  }
 0x22f   :  { %v3223_v5 = vld [vmem:[%s4192_s3 + $0x3e8] sm:$0xff]  }
 0x231   :  { %3034 = vmatpush3.bf16.msra.mxu0 %v3192_v6  ;;  %3056 = vmatpush3.bf16.msra.mxu1 %v3193_v7  ;;  %v3224_v6 = vld [vmem:[%s4192_s3 + $0x328] sm:$0xff]  }
 0x232   :  { %3035 = vmatprep.subr.bf16.mxu0 %v3194_v24  ;;  %3057 = vmatprep.subr.bf16.mxu1 %v3195_v25  ;;  %v3225_v7 = vld [vmem:[%s4192_s3 + $0x3a8] sm:$0xff]   ;;  %v3226_v24 = vld [vmem:[%s4192_s3 + $0x360] sm:$0xff]  }
 0x233   :  { %v3227_v25 = vld [vmem:[%s4192_s3 + $0x3e0] sm:$0xff]  }
 0x235   :  { %3036 = vmatpush3.bf16.msra.mxu0 %v3196_v26  ;;  %3058 = vmatpush3.bf16.msra.mxu1 %v3197_v27  ;;  %v3228_v26 = vld [vmem:[%s4192_s3 + $0x320] sm:$0xff]  }
 0x236   :  { %3037 = vmatprep.subr.bf16.mxu0 %v3198_v28  ;;  %3059 = vmatprep.subr.bf16.mxu1 %v3199_v29  ;;  %v3229_v27 = vld [vmem:[%s4192_s3 + $0x3a0] sm:$0xff]   ;;  %v3230_v28 = vld [vmem:[%s4192_s3 + $0x358] sm:$0xff]  }
 0x237   :  { %v3231_v29 = vld [vmem:[%s4192_s3 + $0x3d8] sm:$0xff]  }
 0x239   :  { %3038 = vmatpush3.bf16.msra.mxu0 %v3200_v30  ;;  %3060 = vmatpush3.bf16.msra.mxu1 %v3201_v31  ;;  %v3232_v30 = vld [vmem:[%s4192_s3 + $0x318] sm:$0xff]  }
 0x23a   :  { %v1129_v35 = vpop.f32.mrf.mxu0  ;;  %v1172_v36 = vpop.f32.mrf.mxu1  ;;  %3039 = vmatprep.subr.bf16.mxu0 %v3202_v32  ;;  %3061 = vmatprep.subr.bf16.mxu1 %v3203_v33  ;;  %v3233_v31 = vld [vmem:[%s4192_s3 + $0x398] sm:$0xff]   ;;  %v3234_v32 = vld [vmem:[%s4192_s3 + $0x350] sm:$0xff]  }
 0x23b   :  { %v1130_v44 = vadd.f32 %v1129_v35, %v3828_v8  ;;  %v1173_v45 = vadd.f32 %v1172_v36, %v3830_v9  ;;  %v3235_v33 = vld [vmem:[%s4192_s3 + $0x3d0] sm:$0xff]  }
 0x23c   :  { %v1131_v37 = vpop.f32.mrf.mxu0  ;;  %v1174_v38 = vpop.f32.mrf.mxu1 }
 0x23d   :  { %3040 = vmatpush3.bf16.msra.mxu0 %v3204_v34  ;;  %3062 = vmatpush3.bf16.msra.mxu1 %v3205_v12  ;;  %v1132_v40 = vadd.f32 %v1131_v37, %v3832_v10  ;;  %v1175_v43 = vadd.f32 %v1174_v38, %v3834_v11  ;;  %v1275_v56 = vmax.f32 %v1130_v44, 0.0  ;;  %v1277_v57 = vmax.f32 %v1173_v45, 0.0  ;;  %v3236_v34 = vld [vmem:[%s4192_s3 + $0x310] sm:$0xff]  }
 0x23e   :  { %v1133_v14 = vpop.f32.mrf.mxu0  ;;  %v1176_v23 = vpop.f32.mrf.mxu1  ;;  %3041 = vmatprep.subr.bf16.mxu0 %v3206_v15  ;;  %3063 = vmatprep.subr.bf16.mxu1 %v3207_v17  ;;  %v3237_v12 = vld [vmem:[%s4192_s3 + $0x390] sm:$0xff]   ;;  %v3238_v15 = vld [vmem:[%s4192_s3 + $0x348] sm:$0xff]  }
 0x23f   :  { %v1134_v41 = vadd.f32 %v1133_v14, %v3828_v8  ;;  %v1177_v42 = vadd.f32 %v1176_v23, %v3830_v9  ;;  %v3214_v9 = vld [vmem:[%s4192_s3 + $0x378] sm:$0xff]   ;;  %v1278_v53 = vmax.f32 %v1175_v43, 0.0  ;;  %v3239_v17 = vld [vmem:[%s4192_s3 + $0x3c8] sm:$0xff]  }
 0x240   :  { %v1135_v46 = vpop.f32.mrf.mxu0  ;;  %v1178_v47 = vpop.f32.mrf.mxu1 }
 0x241   :  { %v1136_v48 = vadd.f32 %v1135_v46, %v3832_v10  ;;  %v1179_v49 = vadd.f32 %v1178_v47, %v3834_v11  ;;  %3042 = vmatpush3.bf16.msra.mxu0 %v3208_v63  ;;  %3064 = vmatpush3.bf16.msra.mxu1 %v3209_v13  ;;  %v1291_v52 = vmax.f32 %v1134_v41, 0.0  ;;  %v1293_v8 = vmax.f32 %v1177_v42, 0.0  ;;  %v3215_v10 = vld [vmem:[%s4192_s3 + $0x3f8] sm:$0xff]   ;;  %v3240_v63 = vld [vmem:[%s4192_s3 + $0x308] sm:$0xff]  }
 0x242   :  { %3043 = vmatprep.subr.bf16.mxu0 %v3210_v39  ;;  %3065 = vmatprep.subr.bf16.mxu1 %v3211_v16  ;;  %v1276_v11 = vmax.f32 %v1132_v40, 0.0  ;;  %v3241_v13 = vld [vmem:[%s4192_s3 + $0x388] sm:$0xff]   ;;  %v3242_v39 = vld [vmem:[%s4192_s3 + $0x340] sm:$0xff]  }
 0x243   :  { %v1292_v54 = vmax.f32 %v1136_v48, 0.0  ;;  %v1294_v55 = vmax.f32 %v1179_v49, 0.0  ;;  %v1307_v62 = vpack.c.bf16 %v1291_v52, %v1275_v56  ;;  %v1309_v20 = vpack.c.bf16 %v1293_v8, %v1277_v57  ;;  %v3243_v16 = vld [vmem:[%s4192_s3 + $0x3c0] sm:$0xff]  }
 0x245   :  { %v1308_v58 = vpack.c.bf16 %v1292_v54, %v1276_v11  ;;  %v1310_v59 = vpack.c.bf16 %v1294_v55, %v1278_v53  ;;  %3044 = vmatpush3.bf16.msra.mxu0 %v3212_v50  ;;  %3066 = vmatpush3.bf16.msra.mxu1 %v3213_v51  ;;  %v3244_v50 = vld [vmem:[%s4192_s3 + $0x300] sm:$0xff]  }
 0x246   :  { %3073 = vmatprep.subr.bf16.mxu0 %v3214_v9  ;;  %3095 = vmatprep.subr.bf16.mxu1 %v3215_v10  ;;  %v3245_v51 = vld [vmem:[%s4192_s3 + $0x380] sm:$0xff]  }
 0x247   :  { %2542 = vmatprep.mubr.bf16.mxu0 %v1308_v58  ;;  %2583 = vmatprep.mubr.bf16.mxu1 %v1310_v59 }
 0x248   :  { %2543 = vmatmul.mubr.bf16.vlgmr.msra.gmra.mxu0 %v1307_v62  ;;  %2584 = vmatmul.mubr.bf16.vlgmr.msra.gmra.mxu1 %v1309_v20 }
 0x249   :  { %3074 = vmatpush3.bf16.msra.mxu0 %v3216_v60  ;;  %3096 = vmatpush3.bf16.msra.mxu1 %v3217_v61 }
 0x24a   :  { %3075 = vmatprep.subr.bf16.mxu0 %v3218_v0  ;;  %3097 = vmatprep.subr.bf16.mxu1 %v3219_v1 }
 0x24d   :  { %3076 = vmatpush3.bf16.msra.mxu0 %v3220_v2  ;;  %3098 = vmatpush3.bf16.msra.mxu1 %v3221_v3 }
 0x24e   :  { %3077 = vmatprep.subr.bf16.mxu0 %v3222_v4  ;;  %3099 = vmatprep.subr.bf16.mxu1 %v3223_v5 }
 0x251   :  { %3078 = vmatpush3.bf16.msra.mxu0 %v3224_v6  ;;  %3100 = vmatpush3.bf16.msra.mxu1 %v3225_v7 }
 0x252   :  { %3079 = vmatprep.subr.bf16.mxu0 %v3226_v24  ;;  %3101 = vmatprep.subr.bf16.mxu1 %v3227_v25  ;;  %v2812_v24 = vld [vmem:[%s4196_s4] ss:$0 sm:$0xff] }
 0x255   :  { %3080 = vmatpush3.bf16.msra.mxu0 %v3228_v26  ;;  %3102 = vmatpush3.bf16.msra.mxu1 %v3229_v27 }
 0x256   :  { %3081 = vmatprep.subr.bf16.mxu0 %v3230_v28  ;;  %3103 = vmatprep.subr.bf16.mxu1 %v3231_v29 }
 0x259   :  { %3082 = vmatpush3.bf16.msra.mxu0 %v3232_v30  ;;  %3104 = vmatpush3.bf16.msra.mxu1 %v3233_v31 }
 0x25a   :  { %v1215_v35 = vpop.f32.mrf.mxu0  ;;  %v1258_v36 = vpop.f32.mrf.mxu1  ;;  %3083 = vmatprep.subr.bf16.mxu0 %v3234_v32  ;;  %3105 = vmatprep.subr.bf16.mxu1 %v3235_v33 }
 0x25b   :  { %v1216_v44 = vadd.f32 %v1215_v35, %v3842_v18  ;;  %v1259_v45 = vadd.f32 %v1258_v36, %v3846_v19 }
 0x25c   :  { %v1217_v37 = vpop.f32.mrf.mxu0  ;;  %v1260_v38 = vpop.f32.mrf.mxu1 }
 0x25d   :  { %3084 = vmatpush3.bf16.msra.mxu0 %v3236_v34  ;;  %3106 = vmatpush3.bf16.msra.mxu1 %v3237_v12  ;;  %v1218_v40 = vadd.f32 %v1217_v37, %v3850_v21  ;;  %v1261_v43 = vadd.f32 %v1260_v38, %v3854_v22  ;;  %v1279_v10 = vmax.f32 %v1216_v44, 0.0 }
 0x25e   :  { %v1219_v14 = vpop.f32.mrf.mxu0  ;;  %v1262_v23 = vpop.f32.mrf.mxu1  ;;  %3085 = vmatprep.subr.bf16.mxu0 %v3238_v15  ;;  %3107 = vmatprep.subr.bf16.mxu1 %v3239_v17 }
 0x25f   :  { %v1220_v41 = vadd.f32 %v1219_v14, %v3842_v18  ;;  %v1263_v42 = vadd.f32 %v1262_v23, %v3846_v19  ;;  %v1280_v19 = vmax.f32 %v1218_v40, 0.0  ;;  %v1282_v8 = vmax.f32 %v1261_v43, 0.0 }
 0x260   :  { %v1221_v46 = vpop.f32.mrf.mxu0  ;;  %v1264_v47 = vpop.f32.mrf.mxu1 }
 0x261   :  { %v1222_v48 = vadd.f32 %v1221_v46, %v3850_v21  ;;  %v1265_v49 = vadd.f32 %v1264_v47, %v3854_v22  ;;  %3086 = vmatpush3.bf16.msra.mxu0 %v3240_v63  ;;  %3108 = vmatpush3.bf16.msra.mxu1 %v3241_v13  ;;  %v1295_v52 = vmax.f32 %v1220_v41, 0.0  ;;  %v1297_v18 = vmax.f32 %v1263_v42, 0.0 }
 0x262   :  { %3087 = vmatprep.subr.bf16.mxu0 %v3242_v39  ;;  %3109 = vmatprep.subr.bf16.mxu1 %v3243_v16  ;;  %v1281_v22 = vmax.f32 %v1259_v45, 0.0 }
 0x263   :  { %v1296_v9 = vmax.f32 %v1222_v48, 0.0  ;;  %v1298_v21 = vmax.f32 %v1265_v49, 0.0  ;;  %v1311_v54 = vpack.c.bf16 %v1295_v52, %v1279_v10 }
 0x264   :  { %v1313_v55 = vpack.c.bf16 %v1297_v18, %v1281_v22 }
 0x265   :  { %v1312_v11 = vpack.c.bf16 %v1296_v9, %v1280_v19  ;;  %v1314_v53 = vpack.c.bf16 %v1298_v21, %v1282_v8  ;;  %3088 = vmatpush3.bf16.msra.mxu0 %v3244_v50  ;;  %3110 = vmatpush3.bf16.msra.mxu1 %v3245_v51 }
 0x267   :  { %2624 = vmatprep.mubr.bf16.mxu0 %v1312_v11  ;;  %2665 = vmatprep.mubr.bf16.mxu1 %v1314_v53 }
 0x268   :  { %2625 = vmatmul.mubr.bf16.vlgmr.msra.gmra.mxu0 %v1311_v54  ;;  %2666 = vmatmul.mubr.bf16.vlgmr.msra.gmra.mxu1 %v1313_v55  ;;  %v3250_v54 = vld [vmem:[%s4190_s0] sm:$0xff] }
 0x2c8   :  { %v2957_v56 = vpop.f32.mrf.mxu0  ;;  %v2979_v57 = vpop.f32.mrf.mxu1 }
 0x2ca   :  { %v2958_v58 = vpop.f32.mrf.mxu0  ;;  %v2980_v59 = vpop.f32.mrf.mxu1 }
 0x2cb   :  { %v2959_v7 = vadd.f32 %v2958_v58, %v2957_v56  ;;  %v2981_v31 = vadd.f32 %v2980_v59, %v2979_v57  ;;  %v3251_v59 = vld [vmem:[%s4190_s0 + $0x8] sm:$0xff] }
 0x2cc   :  { %v2960_v60 = vpop.f32.mrf.mxu0  ;;  %v2982_v61 = vpop.f32.mrf.mxu1 }
 0x2cd   :  { %v2381_v28 = vadd.f32 %v2959_v7, %v2812_v24 }
 0x2ce   :  { %v2961_v62 = vpop.f32.mrf.mxu0  ;;  %v2983_v20 = vpop.f32.mrf.mxu1 }
 0x2cf   :  { %v2962_v29 = vadd.f32 %v2961_v62, %v2960_v60  ;;  %v2422_v34 = vadd.f32 %v2981_v31, %v2381_v28  ;;  %v2984_v36 = vadd.f32 %v2983_v20, %v2982_v61 }
 0x2d1   :  { %v2384_v12 = vadd.f32 %v2962_v29, %v2812_v24 }
 0x2d3   :  { %v2425_v38 = vadd.f32 %v2984_v36, %v2384_v12 }
 0x2e8   :  { %v3001_v0 = vpop.f32.mrf.mxu0  ;;  %v3023_v1 = vpop.f32.mrf.mxu1 }
 0x2ea   :  { %v3002_v2 = vpop.f32.mrf.mxu0  ;;  %v3024_v3 = vpop.f32.mrf.mxu1 }
 0x2eb   :  { %v3003_v32 = vadd.f32 %v3002_v2, %v3001_v0  ;;  %v3025_v63 = vadd.f32 %v3024_v3, %v3023_v1 }
 0x2ec   :  { %v3004_v4 = vpop.f32.mrf.mxu0  ;;  %v3026_v5 = vpop.f32.mrf.mxu1 }
 0x2ed   :  { %v2463_v15 = vadd.f32 %v3003_v32, %v2422_v34 }
 0x2ee   :  { %v3005_v6 = vpop.f32.mrf.mxu0  ;;  %v3027_v25 = vpop.f32.mrf.mxu1 }
 0x2ef   :  { %v3006_v17 = vadd.f32 %v3005_v6, %v3004_v4  ;;  %v2504_v23 = vadd.f32 %v3025_v63, %v2463_v15  ;;  %v3028_v40 = vadd.f32 %v3027_v25, %v3026_v5 }
 0x2f1   :  { %v2466_v39 = vadd.f32 %v3006_v17, %v2425_v38 }
 0x2f3   :  { %v2507_v45 = vadd.f32 %v3028_v40, %v2466_v39 }
 0x308   :  { %v3045_v26 = vpop.f32.mrf.mxu0  ;;  %v3067_v27 = vpop.f32.mrf.mxu1 }
 0x30a   :  { %v3046_v30 = vpop.f32.mrf.mxu0  ;;  %v3068_v33 = vpop.f32.mrf.mxu1 }
 0x30b   :  { %v3047_v13 = vadd.f32 %v3046_v30, %v3045_v26  ;;  %v3069_v46 = vadd.f32 %v3068_v33, %v3067_v27 }
 0x30c   :  { %v3048_v35 = vpop.f32.mrf.mxu0  ;;  %v3070_v37 = vpop.f32.mrf.mxu1 }
 0x30d   :  { %v2545_v43 = vadd.f32 %v3047_v13, %v2504_v23 }
 0x30e   :  { %v3049_v14 = vpop.f32.mrf.mxu0  ;;  %v3071_v16 = vpop.f32.mrf.mxu1 }
 0x30f   :  { %v3050_v41 = vadd.f32 %v3049_v14, %v3048_v35  ;;  %v2586_v49 = vadd.f32 %v3069_v46, %v2545_v43  ;;  %v3072_v19 = vadd.f32 %v3071_v16, %v3070_v37 }
 0x311   :  { %v2548_v50 = vadd.f32 %v3050_v41, %v2507_v45 }
 0x313   :  { %v2589_v22 = vadd.f32 %v3072_v19, %v2548_v50 }
 0x328   :  { %v3089_v42 = vpop.f32.mrf.mxu0  ;;  %v3111_v44 = vpop.f32.mrf.mxu1 }
 0x32a   :  { %v3090_v47 = vpop.f32.mrf.mxu0  ;;  %v3112_v48 = vpop.f32.mrf.mxu1 }
 0x32b   :  { %v3091_v51 = vadd.f32 %v3090_v47, %v3089_v42  ;;  %v3113_v9 = vadd.f32 %v3112_v48, %v3111_v44 }
 0x32c   :  { %v3092_v52 = vpop.f32.mrf.mxu0  ;;  %v3114_v18 = vpop.f32.mrf.mxu1 }
 0x32d   :  { %v2627_v8 = vadd.f32 %v3091_v51, %v2586_v49 }
 0x32e   :  { %v3093_v21 = vpop.f32.mrf.mxu0  ;;  %v3115_v10 = vpop.f32.mrf.mxu1 }
 0x32f   :  { %v2668_v11 = vadd.f32 %v3113_v9, %v2627_v8  ;;  %v3094_v53 = vadd.f32 %v3093_v21, %v3092_v52  ;;  %v3116_v57 = vadd.f32 %v3115_v10, %v3114_v18 }
 0x331   :  { %v2674_v55 = vadd.f32 %v3250_v54, %v2668_v11  ;;  %v2630_v56 = vadd.f32 %v3094_v53, %v2589_v22 }
 0x333   :  { %2676 = vst [vmem:[%s4197_s7] sm:$0xff] %v2674_v55  ;;  %v2671_v58 = vadd.f32 %v3116_v57, %v2630_v56 }
 0x335   :  { %v2675_v60 = vadd.f32 %v3251_v59, %v2671_v58 }
 0x337   :  { %2677 = vst [vmem:[%s4197_s7 + $0x8] sm:$0xff] %v2675_v60 }

</bundles_post_ra>
